<compile_context>
chip_gen: v6e
topology: v6e:2x2x1
jax: 0.10.0
libtpu: 0.0.40
codegen_flags: <defaults>
</compile_context>

<pallas_src>
import functools

import jax
import jax.numpy as jnp
from jax.experimental import pallas as pl
from jax.experimental.pallas import tpu as pltpu


def _round_up(x, m):
    return ((x + m - 1) // m) * m


# ----------------------------------------------------------------------------
# Pallas kernel: complex per-mode channel contraction on the MXU.
#   xr, xi : (Mt, B,   Cin )   f32
#   wr, wi : (Mt, Cin, Cout)   f32
#   or, oi : (Mt, B,   Cout)   f32
# Each grid step handles one tile of Fourier modes; the mode axis is the
# batch dim of the matmuls, Cin is the contraction dim.  Complex product is
# done with 3 real matmuls (Gauss trick) instead of 4.
# ----------------------------------------------------------------------------
def _spectral_mix_kernel(xr_ref, xi_ref, wr_ref, wi_ref, or_ref, oi_ref):
    xr = xr_ref[...]
    xi = xi_ref[...]
    wr = wr_ref[...]
    wi = wi_ref[...]

    mm = functools.partial(
        jnp.einsum,
        "mbi,mio->mbo",
        preferred_element_type=jnp.float32,
        precision=jax.lax.Precision.HIGHEST,
    )
    # (xr + i*xi)(wr + i*wi):
    #   t1 = xr*wr, t2 = xi*wi, t3 = (xr+xi)*(wr+wi)
    #   real = t1 - t2 ; imag = t3 - t1 - t2
    t1 = mm(xr, wr)
    t2 = mm(xi, wi)
    t3 = mm(xr + xi, wr + wi)

    or_ref[...] = t1 - t2
    oi_ref[...] = t3 - t1 - t2


def compl_mul_fused_pallas(x_modes, w_r, w_i, mode_tile=32):
    """Complex contraction out[b,o,m] = sum_i x[b,i,m] * w[i,o,m].

    x_modes : complex64 (B, Cin, Mtot)   -- both frequency corners, flattened
    w_r,w_i : float32   (Cin, Cout, Mtot)
    returns : complex64 (B, Cout, Mtot)
    """
    B, Cin, Mtot = x_modes.shape
    Cout = w_r.shape[1]

    # Clamp the mode tile so small problems do not pad/iterate over dead modes.
    mode_tile = max(1, min(int(mode_tile), Mtot))

    # Pad batch / channel dims to sublane multiples and the mode axis to a
    # multiple of the tile (zero padding -> zero outputs, sliced off below).
    Bp = _round_up(B, 8)
    Cip = _round_up(Cin, 8)
    Cop = _round_up(Cout, 8)
    Mp = _round_up(Mtot, mode_tile)

    # Mode-leading layout: the Cin contraction becomes a mode-batched matmul.
    xr = jnp.transpose(jnp.real(x_modes).astype(jnp.float32), (2, 0, 1))
    xi = jnp.transpose(jnp.imag(x_modes).astype(jnp.float32), (2, 0, 1))
    wr = jnp.transpose(w_r.astype(jnp.float32), (2, 0, 1))
    wi = jnp.transpose(w_i.astype(jnp.float32), (2, 0, 1))

    xr = jnp.pad(xr, ((0, Mp - Mtot), (0, Bp - B), (0, Cip - Cin)))
    xi = jnp.pad(xi, ((0, Mp - Mtot), (0, Bp - B), (0, Cip - Cin)))
    wr = jnp.pad(wr, ((0, Mp - Mtot), (0, Cip - Cin), (0, Cop - Cout)))
    wi = jnp.pad(wi, ((0, Mp - Mtot), (0, Cip - Cin), (0, Cop - Cout)))

    grid = (Mp // mode_tile,)
    x_spec = pl.BlockSpec((mode_tile, Bp, Cip), lambda m: (m, 0, 0))
    w_spec = pl.BlockSpec((mode_tile, Cip, Cop), lambda m: (m, 0, 0))
    o_spec = pl.BlockSpec((mode_tile, Bp, Cop), lambda m: (m, 0, 0))

    out_r, out_i = pl.pallas_call(
        _spectral_mix_kernel,
        out_shape=(
            jax.ShapeDtypeStruct((Mp, Bp, Cop), jnp.float32),
            jax.ShapeDtypeStruct((Mp, Bp, Cop), jnp.float32),
        ),
        grid_spec=pltpu.PrefetchScalarGridSpec(
            num_scalar_prefetch=0,
            grid=grid,
            in_specs=[x_spec, x_spec, w_spec, w_spec],
            out_specs=(o_spec, o_spec),
        ),
        compiler_params=pltpu.CompilerParams(
            dimension_semantics=("parallel",),
            vmem_limit_bytes=32 * 1024 * 1024,
        ),
    )(xr, xi, wr, wi)

    out_r = out_r[:Mtot, :B, :Cout]
    out_i = out_i[:Mtot, :B, :Cout]
    out = jax.lax.complex(out_r, out_i)          # complex64 (Mtot, B, Cout)
    return jnp.transpose(out, (1, 2, 0))         # (B, Cout, Mtot)


# ----------------------------------------------------------------------------
# SpectralConv2d forward.
# ----------------------------------------------------------------------------
def spectral_conv2d_forward(x, params, modes1, modes2, mode_tile=32):
    """x: float32 (B, Cin, H, W) -> float32 (B, Cout, H, W)."""
    B, Cin, H, W = x.shape
    w1_r, w1_i, w2_r, w2_i = params
    Cout = w1_r.shape[1]
    Wf = W // 2 + 1
    M = modes1 * modes2

    # TODO(synk): rfft2 / irfft2 have no Pallas primitive; they remain XLA ops.
    x_ft = jnp.fft.rfft2(x)                        # (B, Cin, H, Wf) complex64

    # Both frequency corners, flattened & fused along the mode axis.
    blk1 = x_ft[:, :, :modes1, :modes2].reshape(B, Cin, M)
    blk2 = x_ft[:, :, H - modes1:, :modes2].reshape(B, Cin, M)
    x_modes = jnp.concatenate([blk1, blk2], axis=-1)          # (B, Cin, 2M)

    wr = jnp.concatenate(
        [w1_r.reshape(Cin, Cout, M), w2_r.reshape(Cin, Cout, M)], axis=-1)
    wi = jnp.concatenate(
        [w1_i.reshape(Cin, Cout, M), w2_i.reshape(Cin, Cout, M)], axis=-1)

    out_modes = compl_mul_fused_pallas(x_modes, wr, wi, mode_tile=mode_tile)

    out1 = out_modes[:, :, :M].reshape(B, Cout, modes1, modes2)
    out2 = out_modes[:, :, M:].reshape(B, Cout, modes1, modes2)

    if 2 * modes1 <= H and modes2 <= Wf:
        # Assemble out_ft with pad + concatenate (no full-spectrum zero-fill +
        # scatter).  This is the standard FNO configuration.
        top = jnp.pad(out1, ((0, 0), (0, 0), (0, 0), (0, Wf - modes2)))
        bot = jnp.pad(out2, ((0, 0), (0, 0), (0, 0), (0, Wf - modes2)))
        mid = jnp.zeros((B, Cout, H - 2 * modes1, Wf), dtype=out1.dtype)
        out_ft = jnp.concatenate([top, mid, bot], axis=2)      # (B,Cout,H,Wf)
    else:
        # Degenerate configs (overlapping corners): fall back to scatter,
        # matching the PyTorch in-place assignment semantics.
        out_ft = jnp.zeros((B, Cout, H, Wf), dtype=out1.dtype)
        out_ft = out_ft.at[:, :, :modes1, :modes2].set(out1)
        out_ft = out_ft.at[:, :, H - modes1:, :modes2].set(out2)

    return jnp.fft.irfft2(out_ft, s=(H, W))


def init_params(key, in_channels, out_channels, modes1, modes2):
    scale = 1.0 / (in_channels * out_channels)
    k1, k2, k3, k4 = jax.random.split(key, 4)
    shape = (in_channels, out_channels, modes1, modes2)
    # torch.rand(..., dtype=cfloat): real & imag uniform in [0, 1), then * scale
    w1_r = scale * jax.random.uniform(k1, shape, dtype=jnp.float32)
    w1_i = scale * jax.random.uniform(k2, shape, dtype=jnp.float32)
    w2_r = scale * jax.random.uniform(k3, shape, dtype=jnp.float32)
    w2_i = scale * jax.random.uniform(k4, shape, dtype=jnp.float32)
    return (w1_r, w1_i, w2_r, w2_i)


def reference_forward(x, params, modes1, modes2):
    """Pure-JAX reference mirroring the PyTorch module."""
    B, Cin, H, W = x.shape
    w1_r, w1_i, w2_r, w2_i = params
    Cout = w1_r.shape[1]
    Wf = W // 2 + 1
    w1 = (w1_r + 1j * w1_i).astype(jnp.complex64)
    w2 = (w2_r + 1j * w2_i).astype(jnp.complex64)
    x_ft = jnp.fft.rfft2(x)
    out_ft = jnp.zeros((B, Cout, H, Wf), dtype=jnp.complex64)
    out_ft = out_ft.at[:, :, :modes1, :modes2].set(
        jnp.einsum('bixy,ioxy->boxy', x_ft[:, :, :modes1, :modes2], w1,
                   precision=jax.lax.Precision.HIGHEST))
    out_ft = out_ft.at[:, :, H - modes1:, :modes2].set(
        jnp.einsum('bixy,ioxy->boxy', x_ft[:, :, H - modes1:, :modes2], w2,
                   precision=jax.lax.Precision.HIGHEST))
    return jnp.fft.irfft2(out_ft, s=(H, W))


if __name__ == "__main__":
    B, Cin, Cout, H, W = 2, 4, 4, 16, 16
    modes1, modes2 = 4, 4

    key = jax.random.PRNGKey(0)
    kx, kp = jax.random.split(key)
    x = jax.random.normal(kx, (B, Cin, H, W), dtype=jnp.float32)
    params = init_params(kp, Cin, Cout, modes1, modes2)

    fwd = jax.jit(spectral_conv2d_forward,
                  static_argnames=("modes1", "modes2", "mode_tile"))
    out = fwd(x, params, modes1=modes1, modes2=modes2, mode_tile=16)
    out = jax.block_until_ready(out)

    ref = jax.block_until_ready(reference_forward(x, params, modes1, modes2))
    assert out.shape == (B, Cout, H, W)
    max_err = float(jnp.max(jnp.abs(out - ref)))
    assert jnp.allclose(out, ref, atol=1e-4, rtol=1e-4), (
        f"mismatch vs reference (max abs err {max_err})")

    print("KERNEL_OK")
</pallas_src>

<mosaic_0001>
module attributes {stable_mosaic.version = 11 : i64} {
  func.func @_spectral_mix_kernel(%arg0: i32, %arg1: memref<16x8x8xf32, #tpu.memory_space<vmem>>, %arg2: memref<16x8x8xf32, #tpu.memory_space<vmem>>, %arg3: memref<16x8x8xf32, #tpu.memory_space<vmem>>, %arg4: memref<16x8x8xf32, #tpu.memory_space<vmem>>, %arg5: memref<16x8x8xf32, #tpu.memory_space<vmem>>, %arg6: memref<16x8x8xf32, #tpu.memory_space<vmem>>) attributes {dimension_semantics = [#tpu.dimension_semantics<parallel>], iteration_bounds = array<i64: 2>, scalar_prefetch = 0 : i64, scratch_operands = 0 : i64, tpu.core_type = #tpu.core_type<tc>, window_params = [{transform_indices = @transform_0, window_bounds = array<i64: 16, 8, 8>}, {transform_indices = @transform_1, window_bounds = array<i64: 16, 8, 8>}, {transform_indices = @transform_2, window_bounds = array<i64: 16, 8, 8>}, {transform_indices = @transform_3, window_bounds = array<i64: 16, 8, 8>}, {transform_indices = @transform_4, window_bounds = array<i64: 16, 8, 8>}, {transform_indices = @transform_5, window_bounds = array<i64: 16, 8, 8>}]} {
    %c0 = arith.constant 0 : index
    %c0_0 = arith.constant 0 : index
    %c0_1 = arith.constant 0 : index
    %0 = vector.load %arg1[%c0, %c0_0, %c0_1] : memref<16x8x8xf32, #tpu.memory_space<vmem>>, vector<16x8x8xf32>
    %c0_2 = arith.constant 0 : index
    %c0_3 = arith.constant 0 : index
    %c0_4 = arith.constant 0 : index
    %1 = vector.load %arg2[%c0_2, %c0_3, %c0_4] : memref<16x8x8xf32, #tpu.memory_space<vmem>>, vector<16x8x8xf32>
    %c0_5 = arith.constant 0 : index
    %c0_6 = arith.constant 0 : index
    %c0_7 = arith.constant 0 : index
    %2 = vector.load %arg3[%c0_5, %c0_6, %c0_7] : memref<16x8x8xf32, #tpu.memory_space<vmem>>, vector<16x8x8xf32>
    %c0_8 = arith.constant 0 : index
    %c0_9 = arith.constant 0 : index
    %c0_10 = arith.constant 0 : index
    %3 = vector.load %arg4[%c0_8, %c0_9, %c0_10] : memref<16x8x8xf32, #tpu.memory_space<vmem>>, vector<16x8x8xf32>
    "tpu.trace_start"() <{level = 10 : i32, message = "mbi,mio->mbo"}> : () -> ()
    %cst = arith.constant dense<0.000000e+00> : vector<16x8x8xf32>
    %4 = tpu.matmul %0, %2, %cst {dimension_numbers = #tpu.dot_dimension_numbers<[2], [1], [1], [2], [0, 0, 0, 1, 1, 2], [0], [0]>, precision = #tpu.contract_precision<fp32>} : vector<16x8x8xf32>, vector<16x8x8xf32>, vector<16x8x8xf32> -> vector<16x8x8xf32>
    %cst_11 = arith.constant dense<0.000000e+00> : vector<16x8x8xf32>
    %5 = tpu.matmul %1, %3, %cst_11 {dimension_numbers = #tpu.dot_dimension_numbers<[2], [1], [1], [2], [0, 0, 0, 1, 1, 2], [0], [0]>, precision = #tpu.contract_precision<fp32>} : vector<16x8x8xf32>, vector<16x8x8xf32>, vector<16x8x8xf32> -> vector<16x8x8xf32>
    "tpu.trace_stop"() : () -> ()
    %6 = arith.addf %0, %1 : vector<16x8x8xf32>
    %7 = arith.addf %2, %3 : vector<16x8x8xf32>
    "tpu.trace_start"() <{level = 10 : i32, message = "mbi,mio->mbo"}> : () -> ()
    %cst_12 = arith.constant dense<0.000000e+00> : vector<16x8x8xf32>
    %8 = tpu.matmul %6, %7, %cst_12 {dimension_numbers = #tpu.dot_dimension_numbers<[2], [1], [1], [2], [0, 0, 0, 1, 1, 2], [0], [0]>, precision = #tpu.contract_precision<fp32>} : vector<16x8x8xf32>, vector<16x8x8xf32>, vector<16x8x8xf32> -> vector<16x8x8xf32>
    "tpu.trace_stop"() : () -> ()
    %9 = arith.subf %4, %5 : vector<16x8x8xf32>
    %c0_13 = arith.constant 0 : index
    %c0_14 = arith.constant 0 : index
    %c0_15 = arith.constant 0 : index
    %10 = vector.load %arg5[%c0_13, %c0_14, %c0_15] : memref<16x8x8xf32, #tpu.memory_space<vmem>>, vector<16x8x8xf32>
    tpu.vector_store %arg5[%c0_13, %c0_14, %c0_15], %9 {strides = array<i32>} : memref<16x8x8xf32, #tpu.memory_space<vmem>>, vector<16x8x8xf32>,
    %11 = arith.subf %8, %4 : vector<16x8x8xf32>
    %12 = arith.subf %11, %5 : vector<16x8x8xf32>
    %c0_16 = arith.constant 0 : index
    %c0_17 = arith.constant 0 : index
    %c0_18 = arith.constant 0 : index
    %13 = vector.load %arg6[%c0_16, %c0_17, %c0_18] : memref<16x8x8xf32, #tpu.memory_space<vmem>>, vector<16x8x8xf32>
    tpu.vector_store %arg6[%c0_16, %c0_17, %c0_18], %12 {strides = array<i32>} : memref<16x8x8xf32, #tpu.memory_space<vmem>>, vector<16x8x8xf32>,
    return
  }
  func.func @transform_0(%arg0: i32) -> (i32, i32, i32) {
    %c0_i32 = arith.constant 0 : i32
    %c0_i32_0 = arith.constant 0 : i32
    %c0_i32_1 = arith.constant 0 : i32
    return %arg0, %c0_i32, %c0_i32_0 : i32, i32, i32
  }
  func.func @transform_1(%arg0: i32) -> (i32, i32, i32) {
    %c0_i32 = arith.constant 0 : i32
    %c0_i32_0 = arith.constant 0 : i32
    %c0_i32_1 = arith.constant 0 : i32
    return %arg0, %c0_i32, %c0_i32_0 : i32, i32, i32
  }
  func.func @transform_2(%arg0: i32) -> (i32, i32, i32) {
    %c0_i32 = arith.constant 0 : i32
    %c0_i32_0 = arith.constant 0 : i32
    %c0_i32_1 = arith.constant 0 : i32
    return %arg0, %c0_i32, %c0_i32_0 : i32, i32, i32
  }
  func.func @transform_3(%arg0: i32) -> (i32, i32, i32) {
    %c0_i32 = arith.constant 0 : i32
    %c0_i32_0 = arith.constant 0 : i32
    %c0_i32_1 = arith.constant 0 : i32
    return %arg0, %c0_i32, %c0_i32_0 : i32, i32, i32
  }
  func.func @transform_4(%arg0: i32) -> (i32, i32, i32) {
    %c0_i32 = arith.constant 0 : i32
    %c0_i32_0 = arith.constant 0 : i32
    %c0_i32_1 = arith.constant 0 : i32
    return %arg0, %c0_i32, %c0_i32_0 : i32, i32, i32
  }
  func.func @transform_5(%arg0: i32) -> (i32, i32, i32) {
    %c0_i32 = arith.constant 0 : i32
    %c0_i32_0 = arith.constant 0 : i32
    %c0_i32_1 = arith.constant 0 : i32
    return %arg0, %c0_i32, %c0_i32_0 : i32, i32, i32
  }
}

</mosaic_0001>

<bundles_post_ra>
// kernel: reverse.0
= control target key start
LH: loop header
LB: loop body
LE: loop exit
PB: predicated region body
PF: predicated region fallthrough
CT: control target
= control target key end

     0   :  { %v72_v3 = vlaneseq  ;;  %v65_v9 = vld [vmem:[#allocation0 + $0x7] ss:$-1 sm:$0xff]  ;;  %v79_v12 = vld [vmem:[#allocation0 + $0x17] ss:$-1 sm:$0xff]  ;;  %s331_s0 = inlined_call_operand.vmem [shape: f32[2,4,16,7], index: 0, kind: input, shape index: {}]   ;;  %s332_s1 = inlined_call_operand.vmem [shape: f32[2,4,16,7], index: 1, kind: output, shape index: {}]  }
   0x1   :  { %v45_v0 = vld [vmem:[%s331_s0] sm:$0xff]  ;;  %v47_v1 = vld [vmem:[%s331_s0 + $0x8] sm:$0xff]  ;;  %v49_v2 = vld [vmem:[%s331_s0 + $0x10] sm:$0xff]  ;;  %v66_v10 = vrot.slane %v65_v9, 1  ;;  %v80_v14 = vrot.slane %v79_v12, 1 }
   0x2   :  { %46 = vst [vmem:[#allocation0 + $0x8] sm:$0xff] %v45_v0  ;;  %48 = vst [vmem:[#allocation0 + $0x18] sm:$0xff] %v47_v1  ;;  %v51_v4 = vld [vmem:[%s331_s0 + $0x18] sm:$0xff]  ;;  %v53_v5 = vld [vmem:[%s331_s0 + $0x20] sm:$0xff]  ;;  %v73_v11 = vshrl.u32 %v72_v3, 7 }
   0x3   :  { %50 = vst [vmem:[#allocation0 + $0x28] sm:$0xff] %v49_v2  ;;  %v55_v6 = vld [vmem:[%s331_s0 + $0x28] sm:$0xff]  ;;  %52 = vst [vmem:[#allocation0 + $0x38] sm:$0xff] %v51_v4  ;;  %v57_v7 = vld [vmem:[%s331_s0 + $0x30] sm:$0xff] }
   0x4   :  { %54 = vst [vmem:[#allocation0 + $0x48] sm:$0xff] %v53_v5  ;;  %56 = vst [vmem:[#allocation0 + $0x58] sm:$0xff] %v55_v6  ;;  %v59_v8 = vld [vmem:[%s331_s0 + $0x38] sm:$0xff]  ;;  %v93_v13 = vld [vmem:[#allocation0 + $0x27] ss:$-1 sm:$0xff]  ;;  %vm74_vm0 = vcmp.lt.s32.totalorder %v73_v11, 7 }
   0x5   :  { %58 = vst [vmem:[#allocation0 + $0x68] sm:$0xff] %v57_v7  ;;  %60 = vst [vmem:[#allocation0 + $0x78] sm:$0xff] %v59_v8  ;;  %v94_v15 = vrot.slane %v93_v13, 1  ;;  %v107_v16 = vld [vmem:[#allocation0 + $0x37] ss:$-1 sm:$0xff] }
   0x6   :  { %67 = vst [vmem:[#allocation1] sm:$0xff] %v66_v10  ;;  %v108_v17 = vrot.slane %v107_v16, 1  ;;  %v121_v18 = vld [vmem:[#allocation0 + $0x47] ss:$-1 sm:$0xff]  ;;  %v135_v19 = vld [vmem:[#allocation0 + $0x57] ss:$-1 sm:$0xff] }
   0x7   :  { %81 = vst [vmem:[#allocation1 + $0x8] sm:$0xff] %v80_v14  ;;  %95 = vst [vmem:[#allocation1 + $0x10] sm:$0xff] %v94_v15  ;;  %v122_v20 = vrot.slane %v121_v18, 1  ;;  %v136_v21 = vrot.slane %v135_v19, 1  ;;  %v149_v22 = vld [vmem:[#allocation0 + $0x67] ss:$-1 sm:$0xff] }
   0x8   :  { %v163_v23 = vld [vmem:[#allocation0 + $0x77] ss:$-1 sm:$0xff]  ;;  %109 = vst [vmem:[#allocation1 + $0x18] sm:$0xff] %v108_v17  ;;  %v150_v24 = vrot.slane %v149_v22, 1 }
   0x9   :  { %v164_v25 = vrot.slane %v163_v23, 1  ;;  %v70_v26 = vld [vmem:[#allocation0 + $0xf] ss:$-1 sm:$0xff]  ;;  %v84_v27 = vld [vmem:[#allocation0 + $0x1f] ss:$-1 sm:$0xff]  ;;  %123 = vst [vmem:[#allocation1 + $0x20] sm:$0xff] %v122_v20 }
   0xa   :  { %v98_v28 = vld [vmem:[#allocation0 + $0x2f] ss:$-1 sm:$0xff]  ;;  %137 = vst [vmem:[#allocation1 + $0x28] sm:$0xff] %v136_v21  ;;  %v71_v29 = vrot.slane %v70_v26, 1  ;;  %v85_v30 = vrot.slane %v84_v27, 1  ;;  %151 = vst [vmem:[#allocation1 + $0x30] sm:$0xff] %v150_v24 }
   0xb   :  { %v99_v31 = vrot.slane %v98_v28, 1  ;;  %v112_v32 = vld [vmem:[#allocation0 + $0x3f] ss:$-1 sm:$0xff]  ;;  %165 = vst [vmem:[#allocation1 + $0x38] sm:$0xff] %v164_v25  ;;  %v126_v34 = vld [vmem:[#allocation0 + $0x4f] ss:$-1 sm:$0xff] }
   0xc   :  { %v113_v33 = vrot.slane %v112_v32, 1  ;;  %v140_v35 = vld [vmem:[#allocation0 + $0x5f] ss:$-1 sm:$0xff]  ;;  %75 = vst.msk [vmem:[#allocation1] sm:$0xff] %vm74_vm0, %v71_v29  ;;  %89 = vst.msk [vmem:[#allocation1 + $0x8] sm:$0xff] %vm74_vm0, %v85_v30  ;;  %v127_v36 = vrot.slane %v126_v34, 1 }
   0xd   :  { %103 = vst.msk [vmem:[#allocation1 + $0x10] sm:$0xff] %vm74_vm0, %v99_v31  ;;  %v141_v37 = vrot.slane %v140_v35, 1  ;;  %v154_v38 = vld [vmem:[#allocation0 + $0x6f] ss:$-1 sm:$0xff]  ;;  %v168_v39 = vld [vmem:[#allocation0 + $0x7f] ss:$-1 sm:$0xff] }
   0xe   :  { %117 = vst.msk [vmem:[#allocation1 + $0x18] sm:$0xff] %vm74_vm0, %v113_v33  ;;  %v155_v40 = vrot.slane %v154_v38, 1  ;;  %v169_v41 = vrot.slane %v168_v39, 1  ;;  %131 = vst.msk [vmem:[#allocation1 + $0x20] sm:$0xff] %vm74_vm0, %v127_v36 }
   0xf   :  { %145 = vst.msk [vmem:[#allocation1 + $0x28] sm:$0xff] %vm74_vm0, %v141_v37 }
  0x10   :  { %159 = vst.msk [vmem:[#allocation1 + $0x30] sm:$0xff] %vm74_vm0, %v155_v40  ;;  %173 = vst.msk [vmem:[#allocation1 + $0x38] sm:$0xff] %vm74_vm0, %v169_v41 }
  0x13   :  { %v216_v42 = vld [vmem:[#allocation1] sm:$0xff]  ;;  %v218_v43 = vld [vmem:[#allocation1 + $0x8] sm:$0xff] }
  0x14   :  { %v220_v44 = vld [vmem:[#allocation1 + $0x10] sm:$0xff]  ;;  %217 = vst [vmem:[%s332_s1] sm:$0xff] %v216_v42  ;;  %219 = vst [vmem:[%s332_s1 + $0x8] sm:$0xff] %v218_v43 }
  0x15   :  { %221 = vst [vmem:[%s332_s1 + $0x10] sm:$0xff] %v220_v44  ;;  %v222_v45 = vld [vmem:[#allocation1 + $0x18] sm:$0xff]  ;;  %v224_v46 = vld [vmem:[#allocation1 + $0x20] sm:$0xff] }
  0x16   :  { %223 = vst [vmem:[%s332_s1 + $0x18] sm:$0xff] %v222_v45  ;;  %v226_v47 = vld [vmem:[#allocation1 + $0x28] sm:$0xff]  ;;  %225 = vst [vmem:[%s332_s1 + $0x20] sm:$0xff] %v224_v46 }
  0x17   :  { %227 = vst [vmem:[%s332_s1 + $0x28] sm:$0xff] %v226_v47  ;;  %v228_v48 = vld [vmem:[#allocation1 + $0x30] sm:$0xff]  ;;  %v230_v49 = vld [vmem:[#allocation1 + $0x38] sm:$0xff] }
  0x18   :  { %229 = vst [vmem:[%s332_s1 + $0x30] sm:$0xff] %v228_v48  ;;  %231 = vst [vmem:[%s332_s1 + $0x38] sm:$0xff] %v230_v49 }

// kernel: spectral_conv2d_forward.1
= control target key start
LH: loop header
LB: loop body
LE: loop exit
PB: predicated region body
PF: predicated region fallthrough
CT: control target
= control target key end

     0   :  { %s24298_s18 = smov 0   ;;  %s26898_s0 = inlined_call_operand.vmem [shape: f32[32,8,8], index: 0, kind: input, shape index: {}]   ;;  %s26899_s1 = inlined_call_operand.vmem [shape: f32[32,8,8], index: 1, kind: input, shape index: {}]   ;;  %s26900_s2 = inlined_call_operand.vmem [shape: f32[32,8,8], index: 2, kind: input, shape index: {}]   ;;  %s26901_s3 = inlined_call_operand.vmem [shape: f32[32,8,8], index: 3, kind: input, shape index: {}]   ;;  %s26902_s4 = inlined_call_operand.vmem [shape: f32[32,8,8], index: 4, kind: output, shape index: {0}]   ;;  %s26903_s5 = inlined_call_operand.vmem [shape: f32[32,8,8], index: 5, kind: output, shape index: {1}]  }
   0x1 LB: > { %s22163_s19 = sadd.s32 4294967295, %s24264_s18   ;;  %p22167_p0 = scmp.ge.s32.totalorder %s24264_s18, 1  ;;  %s24264_s18 = sphi %s24298_s18, %s16_s18  }
   0x2   : > { %p224_p1 = scmp.lt.s32.totalorder %s24264_s18, 3 }
   0x4   : > { %p225_p2 = pnand %p22167_p0, %p224_p1 }
   0x5   : > { %s22168_s20 = sshll.u32 (!%p225_p2), %s22163_s19, 4 }
   0x6   : > { %228 = sbr.rel (%p225_p2) target bundleno = 801 (0x321), region = 36  ;;  %p273_p3 = scmp.lt.s32.totalorder (!%p225_p2), %s22168_s20, 31 }
   0xb   : > { %v24266_v0 = vmov 0.0   ;;  %vm24267_vm0 = vmmov 0   ;;  %s26905_s20 = smov (!%p273_p3, %s22168_s20), 31  ;;  %vm372_vm1 = vcmask 64512  }
   0xc   : > { %22758 = vmatprep.subr.mxu0 %v24266_v0  ;;  %22763 = vmatprep.subr.mxu1 %v24266_v0  ;;  %s24312_s21 = sshll.u32 %s26905_s20, 3 }
   0xd   : > { %22760 = vmatprep.mubr.msk.f32.mxu0 %vm24267_vm0, %v24266_v0  ;;  %22765 = vmatprep.mubr.msk.f32.mxu1 %vm24267_vm0, %v24266_v0  ;;  %s24318_s24 = scalar_lea.vmem %s26900_s2, %s24312_s21  ;;  %s24324_s27 = scalar_lea.vmem %s26898_s0, %s24312_s21 }
   0xe   : > { %v340_v1 = vld [vmem:[%s24318_s24] sm:$0xff]  ;;  %s24331_s30 = scalar_lea.vmem %s26899_s1, %s24312_s21  ;;  %v341_v3 = vld [vmem:[%s24318_s24 + $0x8] sm:$0xff]  ;;  %v310_v24 = vld [vmem:[%s24324_s27 + $0x10] sm:$0xff]  ;;  %s24996_s8 = scalar_lea.vmem %s26901_s3, %s24312_s21 }
   0xf   : > { %v308_v2 = vld [vmem:[%s24324_s27] sm:$0xff]  ;;  %v407_v4 = vand.u32 4294901760, %v340_v1  ;;  %v309_v7 = vld [vmem:[%s24324_s27 + $0x8] sm:$0xff]  ;;  %v24340_v10 = vand.u32 4294901760, %v341_v3  ;;  %v311_v25 = vld [vmem:[%s24324_s27 + $0x18] sm:$0xff]  ;;  %v1272_v30 = vsel %vm372_vm1, %v310_v24, 0  ;;  %s26000_s11 = scalar_lea.vmem %s26902_s4, %s24312_s21  ;;  %s26830_s14 = scalar_lea.vmem %s26903_s5, %s24312_s21 }
  0x10   : > { %v324_v5 = vld [vmem:[%s24331_s30] sm:$0xff]  ;;  %v374_v6 = vsel %vm372_vm1, %v308_v2, 0  ;;  %v823_v11 = vsel %vm372_vm1, %v309_v7, 0  ;;  %v327_v26 = vld [vmem:[%s24331_s30 + $0x18] sm:$0xff]  ;;  %v342_v27 = vld [vmem:[%s24318_s24 + $0x10] sm:$0xff]  ;;  %v24380_v37 = vand.u32 4294901760, %v1272_v30 }
  0x11   : > { %v442_v8 = vand.u32 4294901760, %v374_v6  ;;  %v24338_v9 = vadd.f32 %v324_v5, %v308_v2  ;;  %22759 = vmatpush3.msra.mxu0 %v407_v4  ;;  %v484_v12 = vsub.f32 %v340_v1, %v407_v4  ;;  %v24344_v14 = vand.u32 4294901760, %v823_v11  ;;  %v24370_v33 = vld [vmem:[%s24324_s27 + $0x20] sm:$0xff]  ;;  %v24389_v40 = vld [vmem:[%s24324_s27 + $0x28] sm:$0xff]  ;;  %v343_v46 = vld [vmem:[%s24318_s24 + $0x18] sm:$0xff] }
  0x12   : > { %22768 = vmatprep.subr.mxu0 %v24266_v0  ;;  %v24347_v17 = vsub.f32 %v341_v3, %v24340_v10  ;;  %v24357_v28 = vadd.f32 %v327_v26, %v311_v25  ;;  %v24367_v32 = vand.u32 4294901760, %v342_v27  ;;  %v328_v34 = vld [vmem:[%s24331_s30 + $0x20] sm:$0xff]  ;;  %v329_v41 = vld [vmem:[%s24331_s30 + $0x28] sm:$0xff]  ;;  %v24399_v44 = vsub.f32 %v1272_v30, %v24380_v37  ;;  %v24411_v47 = vld [vmem:[%s24324_s27 + $0x30] sm:$0xff] }
  0x13   : > { %v443_v13 = vsub.f32 %v374_v6, %v442_v8  ;;  %v485_v15 = vand.u32 4294901760, %v484_v12  ;;  %v24350_v20 = vsub.f32 %v823_v11, %v24344_v14  ;;  %v24377_v35 = vadd.f32 %v328_v34, %v24370_v33  ;;  %v330_v48 = vld [vmem:[%s24331_s30 + $0x30] sm:$0xff]  ;;  %v24431_v54 = vld [vmem:[%s24324_s27 + $0x38] sm:$0xff]  ;;  %v24454_v61 = vld [vmem:[%s24324_s27 + $0x40] sm:$0xff] }
  0x14   : > { %v934_v23 = vand.u32 4294901760, %v24347_v17  ;;  %v24386_v39 = vsub.f32 %v342_v27, %v24367_v32  ;;  %v24396_v42 = vadd.f32 %v329_v41, %v24389_v40  ;;  %v1342_v49 = vand.u32 4294901760, %v24399_v44  ;;  %v331_v55 = vld [vmem:[%s24331_s30 + $0x38] sm:$0xff]  ;;  %v332_v62 = vld [vmem:[%s24331_s30 + $0x40] sm:$0xff]  ;;  %v333_v5 = vld [vmem:[%s24331_s30 + $0x48] sm:$0xff] }
  0x15   : > { %v444_v16 = vand.u32 4294901760, %v443_v13  ;;  %v486_v18 = vsub.f32 %v484_v12, %v485_v15  ;;  %v893_v29 = vand.u32 4294901760, %v24350_v20  ;;  %v24417_v50 = vadd.f32 %v330_v48, %v24411_v47  ;;  %v344_v6 = vld [vmem:[%s24318_s24 + $0x20] sm:$0xff] }
  0x16   : > { %v935_v31 = vsub.f32 %v24347_v17, %v934_v23  ;;  %v1383_v45 = vand.u32 4294901760, %v24386_v39  ;;  %v1721_v51 = vsel %vm372_vm1, %v311_v25, 0  ;;  %v24428_v53 = vand.u32 4294901760, %v343_v46  ;;  %v24542_v26 = vld [vmem:[%s24324_s27 + $0x60] sm:$0xff] }
  0x17   : > { %v445_v19 = vsub.f32 %v443_v13, %v444_v16  ;;  %v487_v21 = vand.u32 4294901760, %v486_v18  ;;  %v894_v36 = vsub.f32 %v24350_v20, %v893_v29  ;;  %v24438_v56 = vadd.f32 %v331_v55, %v24431_v54  ;;  %v336_v27 = vld [vmem:[%s24331_s30 + $0x60] sm:$0xff] }
  0x18   : > { %v936_v38 = vand.u32 4294901760, %v935_v31  ;;  %v1384_v52 = vsub.f32 %v24386_v39, %v1383_v45  ;;  %v1343_v57 = vsub.f32 %v24399_v44, %v1342_v49  ;;  %v24442_v58 = vand.u32 4294901760, %v1721_v51 }
  0x19   : > { %v446_v22 = vand.u32 4294901760, %v445_v19  ;;  %22764 = vmatpush3.msra.mxu1 %v487_v21  ;;  %v895_v43 = vand.u32 4294901760, %v894_v36  ;;  %v24451_v60 = vsub.f32 %v343_v46, %v24428_v53  ;;  %v24461_v63 = vadd.f32 %v332_v62, %v24454_v61  ;;  %v335_v21 = vld [vmem:[%s24331_s30 + $0x58] sm:$0xff]  ;;  %v24567_v36 = vld [vmem:[%s24324_s27 + $0x68] sm:$0xff] }
  0x1a   : > { %22766 = vmatmul.mubr.f32.vlgmr.msra.gmra.mxu1 %v442_v8  ;;  %22773 = vmatprep.subr.mxu1 %v24266_v0  ;;  %v1385_v59 = vand.u32 4294901760, %v1384_v52  ;;  %v1344_v1 = vand.u32 4294901760, %v1343_v57  ;;  %v24466_v2 = vsub.f32 %v1721_v51, %v24442_v58  ;;  %v24550_v30 = vadd.f32 %v336_v27, %v24542_v26  ;;  %v346_v52 = vld [vmem:[%s24318_s24 + $0x30] sm:$0xff] }
  0x1b   : > { %22761 = vmatmul.mubr.f32.vlgmr.msra.gmra.mxu0 %v446_v22  ;;  %22774 = vmatpush3.msra.mxu1 %v407_v4  ;;  %v1832_v3 = vand.u32 4294901760, %v24451_v60  ;;  %v3068_v55 = vsel %vm372_vm1, %v24411_v47, 0 }
  0x1c   : > { %22769 = vmatpush3.msra.mxu0 %v484_v12  ;;  %22770 = vmatprep.mubr.msk.f32.mxu0 %vm24267_vm0, %v24266_v0  ;;  %v24496_v12 = vand.u32 4294901760, %v344_v6  ;;  %v24630_v62 = vand.u32 4294901760, %v3068_v55 }
  0x1d   : > { %22775 = vmatprep.mubr.msk.f32.mxu1 %vm24267_vm0, %v24266_v0  ;;  %22778 = vmatprep.subr.mxu0 %v24266_v0  ;;  %v1833_v11 = vsub.f32 %v24451_v60, %v1832_v3 }
  0x1e   : > { %22776 = vmatmul.mubr.f32.vlgmr.msra.gmra.mxu1 %v444_v16  ;;  %22783 = vmatprep.subr.mxu1 %v24266_v0  ;;  %v24519_v19 = vsub.f32 %v344_v6, %v24496_v12  ;;  %v3137_v6 = vsub.f32 %v3068_v55, %v24630_v62 }
  0x1f   : > { %22771 = vmatmul.mubr.f32.vlgmr.msra.gmra.mxu0 %v443_v13  ;;  %22784 = vmatpush3.msra.mxu1 %v407_v4  ;;  %v24474_v4 = vld [vmem:[%s24324_s27 + $0x48] sm:$0xff]  ;;  %v24499_v13 = vld [vmem:[%s24324_s27 + $0x50] sm:$0xff]  ;;  %v1834_v18 = vand.u32 4294901760, %v1833_v11 }
  0x20   : > { %22779 = vmatpush3.msra.mxu0 %v485_v15  ;;  %22780 = vmatprep.mubr.msk.f32.mxu0 %vm24267_vm0, %v24266_v0  ;;  %v24482_v7 = vadd.f32 %v333_v5, %v24474_v4  ;;  %v2281_v25 = vand.u32 4294901760, %v24519_v19  ;;  %v3138_v11 = vand.u32 4294901760, %v3137_v6 }
  0x21   : > { %22785 = vmatprep.mubr.msk.f32.mxu1 %vm24267_vm0, %v24266_v0  ;;  %22788 = vmatprep.subr.mxu0 %v24266_v0 }
  0x22   : > { %22786 = vmatmul.mubr.f32.vlgmr.msra.gmra.mxu1 %v442_v8  ;;  %22793 = vmatprep.subr.mxu1 %v24266_v0 }
  0x23   : > { %22781 = vmatmul.mubr.f32.vlgmr.msra.gmra.mxu0 %v442_v8  ;;  %22794 = vmatpush3.msra.mxu1 %v936_v38  ;;  %v1791_v8 = vand.u32 4294901760, %v24466_v2 }
  0x24   : > { %22789 = vmatpush3.msra.mxu0 %v24340_v10  ;;  %22790 = vmatprep.mubr.msk.f32.mxu0 %vm24267_vm0, %v24266_v0 }
  0x25   : > { %22795 = vmatprep.mubr.msk.f32.mxu1 %vm24267_vm0, %v24266_v0  ;;  %22798 = vmatprep.subr.mxu0 %v24266_v0  ;;  %v1792_v16 = vsub.f32 %v24466_v2, %v1791_v8 }
  0x26   : > { %22796 = vmatmul.mubr.f32.vlgmr.msra.gmra.mxu1 %v24344_v14  ;;  %22803 = vmatprep.subr.mxu1 %v24266_v0 }
  0x27   : > { %22791 = vmatmul.mubr.f32.vlgmr.msra.gmra.mxu0 %v895_v43  ;;  %22804 = vmatpush3.msra.mxu1 %v24340_v10 }
  0x28   : > { %22799 = vmatpush3.msra.mxu0 %v24347_v17  ;;  %22800 = vmatprep.mubr.msk.f32.mxu0 %vm24267_vm0, %v24266_v0 }
  0x29   : > { %22805 = vmatprep.mubr.msk.f32.mxu1 %vm24267_vm0, %v24266_v0  ;;  %22808 = vmatprep.subr.mxu0 %v24266_v0 }
  0x2a   : > { %22806 = vmatmul.mubr.f32.vlgmr.msra.gmra.mxu1 %v893_v29  ;;  %22813 = vmatprep.subr.mxu1 %v24266_v0  ;;  %v345_v29 = vld [vmem:[%s24318_s24 + $0x28] sm:$0xff] }
  0x2b   : > { %22801 = vmatmul.mubr.f32.vlgmr.msra.gmra.mxu0 %v24350_v20  ;;  %22814 = vmatpush3.msra.mxu1 %v24340_v10  ;;  %v2170_v10 = vsel %vm372_vm1, %v24370_v33, 0  ;;  %v24522_v20 = vld [vmem:[%s24324_s27 + $0x58] sm:$0xff]  ;;  %v2282_v33 = vsub.f32 %v24519_v19, %v2281_v25  ;;  %v24564_v34 = vand.u32 4294901760, %v345_v29 }
  0x2c   : > { %22809 = vmatpush3.msra.mxu0 %v934_v23  ;;  %22810 = vmatprep.mubr.msk.f32.mxu0 %vm24267_vm0, %v24266_v0  ;;  %v24510_v17 = vand.u32 4294901760, %v2170_v10  ;;  %v24529_v22 = vadd.f32 %v335_v21, %v24522_v20  ;;  %v1793_v23 = vand.u32 4294901760, %v1792_v16 }
  0x2d   : > { %22815 = vmatprep.mubr.msk.f32.mxu1 %vm24267_vm0, %v24266_v0  ;;  %22818 = vmatprep.subr.mxu0 %v24266_v0  ;;  %v2283_v41 = vand.u32 4294901760, %v2282_v33  ;;  %v24587_v43 = vsub.f32 %v345_v29, %v24564_v34  ;;  %v3966_v29 = vsel %vm372_vm1, %v24454_v61, 0 }
  0x2e   : > { %22816 = vmatmul.mubr.f32.vlgmr.msra.gmra.mxu1 %v24344_v14  ;;  %22823 = vmatprep.subr.mxu1 %v24266_v0  ;;  %v24534_v24 = vsub.f32 %v2170_v10, %v24510_v17  ;;  %v347_v10 = vld [vmem:[%s24318_s24 + $0x38] sm:$0xff] }
  0x2f   : > { %22811 = vmatmul.mubr.f32.vlgmr.msra.gmra.mxu0 %v24344_v14  ;;  %22824 = vmatpush3.msra.mxu1 %v1385_v59  ;;  %v334_v14 = vld [vmem:[%s24331_s30 + $0x50] sm:$0xff]  ;;  %v2730_v51 = vand.u32 4294901760, %v24587_v43  ;;  %v24626_v59 = vld [vmem:[%s24324_s27 + $0x78] sm:$0xff]  ;;  %v24668_v16 = vand.u32 4294901760, %v347_v10 }
  0x30   : > { %22819 = vmatpush3.msra.mxu0 %v24367_v32  ;;  %22820 = vmatprep.mubr.msk.f32.mxu0 %vm24267_vm0, %v24266_v0  ;;  %v24506_v15 = vadd.f32 %v334_v14, %v24499_v13  ;;  %v2240_v31 = vand.u32 4294901760, %v24534_v24 }
  0x31   : > { %22825 = vmatprep.mubr.msk.f32.mxu1 %vm24267_vm0, %v24266_v0  ;;  %22828 = vmatprep.subr.mxu0 %v24266_v0  ;;  %v2731_v57 = vsub.f32 %v24587_v43, %v2730_v51 }
  0x32   : > { %22826 = vmatmul.mubr.f32.vlgmr.msra.gmra.mxu1 %v24380_v37  ;;  %22833 = vmatprep.subr.mxu1 %v24266_v0 }
  0x33   : > { %22821 = vmatmul.mubr.f32.vlgmr.msra.gmra.mxu0 %v1344_v1  ;;  %22834 = vmatpush3.msra.mxu1 %v24367_v32 }
  0x34   : > { %22829 = vmatpush3.msra.mxu0 %v24386_v39  ;;  %22830 = vmatprep.mubr.msk.f32.mxu0 %vm24267_vm0, %v24266_v0  ;;  %v2241_v39 = vsub.f32 %v24534_v24, %v2240_v31 }
  0x35   : > { %22835 = vmatprep.mubr.msk.f32.mxu1 %vm24267_vm0, %v24266_v0  ;;  %22838 = vmatprep.subr.mxu0 %v24266_v0 }
  0x36   : > { %22836 = vmatmul.mubr.f32.vlgmr.msra.gmra.mxu1 %v1342_v49  ;;  %22843 = vmatprep.subr.mxu1 %v24266_v0  ;;  %v2242_v48 = vand.u32 4294901760, %v2241_v39 }
  0x37   : > { %22831 = vmatmul.mubr.f32.vlgmr.msra.gmra.mxu0 %v24399_v44  ;;  %22844 = vmatpush3.msra.mxu1 %v24367_v32  ;;  %v2619_v32 = vsel %vm372_vm1, %v24389_v40, 0  ;;  %v24590_v44 = vld [vmem:[%s24324_s27 + $0x70] sm:$0xff] }
  0x38   : > { %22839 = vmatpush3.msra.mxu0 %v1383_v45  ;;  %22840 = vmatprep.mubr.msk.f32.mxu0 %vm24267_vm0, %v24266_v0  ;;  %v24578_v40 = vand.u32 4294901760, %v2619_v32  ;;  %v338_v45 = vld [vmem:[%s24331_s30 + $0x70] sm:$0xff] }
  0x39   : > { %22845 = vmatprep.mubr.msk.f32.mxu1 %vm24267_vm0, %v24266_v0  ;;  %22848 = vmatprep.subr.mxu0 %v24266_v0  ;;  %v24597_v46 = vadd.f32 %v338_v45, %v24590_v44 }
  0x3a   : > { %22846 = vmatmul.mubr.f32.vlgmr.msra.gmra.mxu1 %v24380_v37  ;;  %22853 = vmatprep.subr.mxu1 %v24266_v0  ;;  %v2688_v49 = vsub.f32 %v2619_v32, %v24578_v40 }
  0x3b   : > { %22841 = vmatmul.mubr.f32.vlgmr.msra.gmra.mxu0 %v24380_v37  ;;  %22854 = vmatpush3.msra.mxu1 %v1834_v18  ;;  %v337_v37 = vld [vmem:[%s24331_s30 + $0x68] sm:$0xff] }
  0x3c   : > { %22849 = vmatpush3.msra.mxu0 %v24428_v53  ;;  %22850 = vmatprep.mubr.msk.f32.mxu0 %vm24267_vm0, %v24266_v0  ;;  %v24574_v38 = vadd.f32 %v337_v37, %v24567_v36 }
  0x3d   : > { %22855 = vmatprep.mubr.msk.f32.mxu1 %vm24267_vm0, %v24266_v0  ;;  %22858 = vmatprep.subr.mxu0 %v24266_v0 }
  0x3e   : > { %22856 = vmatmul.mubr.f32.vlgmr.msra.gmra.mxu1 %v24442_v58  ;;  %22863 = vmatprep.subr.mxu1 %v24266_v0 }
  0x3f   : > { %22851 = vmatmul.mubr.f32.vlgmr.msra.gmra.mxu0 %v1793_v23  ;;  %22864 = vmatpush3.msra.mxu1 %v24428_v53 }
  0x40   : > { %22859 = vmatpush3.msra.mxu0 %v24451_v60  ;;  %22860 = vmatprep.mubr.msk.f32.mxu0 %vm24267_vm0, %v24266_v0  ;;  %v339_v60 = vld [vmem:[%s24331_s30 + $0x78] sm:$0xff] }
  0x41   : > { %22865 = vmatprep.mubr.msk.f32.mxu1 %vm24267_vm0, %v24266_v0  ;;  %22868 = vmatprep.subr.mxu0 %v24266_v0  ;;  %v24633_v1 = vadd.f32 %v339_v60, %v24626_v59 }
  0x42   : > { %22866 = vmatmul.mubr.f32.vlgmr.msra.gmra.mxu1 %v1791_v8  ;;  %22873 = vmatprep.subr.mxu1 %v24266_v0 }
  0x43   : > { %22861 = vmatmul.mubr.f32.vlgmr.msra.gmra.mxu0 %v24466_v2  ;;  %22874 = vmatpush3.msra.mxu1 %v24428_v53  ;;  %v2689_v53 = vand.u32 4294901760, %v2688_v49  ;;  %v2732_v2 = vand.u32 4294901760, %v2731_v57 }
  0x44   : > { %22869 = vmatpush3.msra.mxu0 %v1832_v3  ;;  %22870 = vmatprep.mubr.msk.f32.mxu0 %vm24267_vm0, %v24266_v0 }
  0x45   : > { %22875 = vmatprep.mubr.msk.f32.mxu1 %vm24267_vm0, %v24266_v0  ;;  %22878 = vmatprep.subr.mxu0 %v24266_v0  ;;  %v2690_v47 = vsub.f32 %v2688_v49, %v2689_v53 }
  0x46   : > { %22876 = vmatmul.mubr.f32.vlgmr.msra.gmra.mxu1 %v24442_v58  ;;  %22883 = vmatprep.subr.mxu1 %v24266_v0 }
  0x47   : > { %22871 = vmatmul.mubr.f32.vlgmr.msra.gmra.mxu0 %v24442_v58  ;;  %22884 = vmatpush3.msra.mxu1 %v2283_v41  ;;  %v24620_v58 = vand.u32 4294901760, %v346_v52  ;;  %v2691_v5 = vand.u32 4294901760, %v2690_v47  ;;  %v350_v47 = vld [vmem:[%s24318_s24 + $0x50] sm:$0xff] }
  0x48   : > { %22879 = vmatpush3.msra.mxu0 %v24496_v12  ;;  %22880 = vmatprep.mubr.msk.f32.mxu0 %vm24267_vm0, %v24266_v0 }
  0x49   : > { %22885 = vmatprep.mubr.msk.f32.mxu1 %vm24267_vm0, %v24266_v0  ;;  %22888 = vmatprep.subr.mxu0 %v24266_v0  ;;  %v24642_v3 = vsub.f32 %v346_v52, %v24620_v58 }
  0x4a   : > { %22886 = vmatmul.mubr.f32.vlgmr.msra.gmra.mxu1 %v24510_v17  ;;  %22893 = vmatprep.subr.mxu1 %v24266_v0 }
  0x4b   : > { %22881 = vmatmul.mubr.f32.vlgmr.msra.gmra.mxu0 %v2242_v48  ;;  %22894 = vmatpush3.msra.mxu1 %v24496_v12  ;;  %v3179_v8 = vand.u32 4294901760, %v24642_v3  ;;  %v4415_v48 = vsel %vm372_vm1, %v24474_v4, 0 }
  0x4c   : > { %22889 = vmatpush3.msra.mxu0 %v24519_v19  ;;  %22890 = vmatprep.mubr.msk.f32.mxu0 %vm24267_vm0, %v24266_v0  ;;  %v24680_v19 = vsub.f32 %v347_v10, %v24668_v16 }
  0x4d   : > { %22895 = vmatprep.mubr.msk.f32.mxu1 %vm24267_vm0, %v24266_v0  ;;  %22898 = vmatprep.subr.mxu0 %v24266_v0  ;;  %v3180_v14 = vsub.f32 %v24642_v3, %v3179_v8 }
  0x4e   : > { %22896 = vmatmul.mubr.f32.vlgmr.msra.gmra.mxu1 %v2240_v31  ;;  %22903 = vmatprep.subr.mxu1 %v24266_v0 }
  0x4f   : > { %22891 = vmatmul.mubr.f32.vlgmr.msra.gmra.mxu0 %v24534_v24  ;;  %22904 = vmatpush3.msra.mxu1 %v24496_v12  ;;  %v3517_v12 = vsel %vm372_vm1, %v24431_v54, 0  ;;  %v3181_v54 = vand.u32 4294901760, %v3180_v14  ;;  %v3628_v24 = vand.u32 4294901760, %v24680_v19 }
  0x50   : > { %22899 = vmatpush3.msra.mxu0 %v2281_v25  ;;  %22900 = vmatprep.mubr.msk.f32.mxu0 %vm24267_vm0, %v24266_v0  ;;  %v24673_v18 = vand.u32 4294901760, %v3517_v12  ;;  %v348_v25 = vld [vmem:[%s24318_s24 + $0x40] sm:$0xff] }
  0x51   : > { %22905 = vmatprep.mubr.msk.f32.mxu1 %vm24267_vm0, %v24266_v0  ;;  %22908 = vmatprep.subr.mxu0 %v24266_v0  ;;  %v3629_v31 = vsub.f32 %v24680_v19, %v3628_v24  ;;  %v24706_v32 = vand.u32 4294901760, %v348_v25 }
  0x52   : > { %22906 = vmatmul.mubr.f32.vlgmr.msra.gmra.mxu1 %v24510_v17  ;;  %22913 = vmatprep.subr.mxu1 %v24266_v0  ;;  %v3586_v23 = vsub.f32 %v3517_v12, %v24673_v18 }
  0x53   : > { %22901 = vmatmul.mubr.f32.vlgmr.msra.gmra.mxu0 %v24510_v17  ;;  %22914 = vmatpush3.msra.mxu1 %v2732_v2  ;;  %v3139_v17 = vsub.f32 %v3137_v6, %v3138_v11  ;;  %v3630_v61 = vand.u32 4294901760, %v3629_v31  ;;  %v24718_v37 = vsub.f32 %v348_v25, %v24706_v32  ;;  %v4864_v2 = vsel %vm372_vm1, %v24499_v13, 0  ;;  %v352_v31 = vld [vmem:[%s24318_s24 + $0x60] sm:$0xff] }
  0x54   : > { %22909 = vmatpush3.msra.mxu0 %v24564_v34  ;;  %22910 = vmatprep.mubr.msk.f32.mxu0 %vm24267_vm0, %v24266_v0  ;;  %v3587_v27 = vand.u32 4294901760, %v3586_v23 }
  0x55   : > { %22915 = vmatprep.mubr.msk.f32.mxu1 %vm24267_vm0, %v24266_v0  ;;  %22918 = vmatprep.subr.mxu0 %v24266_v0  ;;  %v3140_v21 = vand.u32 4294901760, %v3139_v17  ;;  %v4077_v41 = vand.u32 4294901760, %v24718_v37 }
  0x56   : > { %22916 = vmatmul.mubr.f32.vlgmr.msra.gmra.mxu1 %v24578_v40  ;;  %22923 = vmatprep.subr.mxu1 %v24266_v0  ;;  %v3588_v33 = vsub.f32 %v3586_v23, %v3587_v27 }
  0x57   : > { %22911 = vmatmul.mubr.f32.vlgmr.msra.gmra.mxu0 %v2691_v5  ;;  %22924 = vmatpush3.msra.mxu1 %v24564_v34  ;;  %v24782_v5 = vand.u32 4294901760, %v350_v47 }
  0x58   : > { %22919 = vmatpush3.msra.mxu0 %v24587_v43  ;;  %22920 = vmatprep.mubr.msk.f32.mxu0 %vm24267_vm0, %v24266_v0  ;;  %v3589_v39 = vand.u32 4294901760, %v3588_v33  ;;  %v349_v43 = vld [vmem:[%s24318_s24 + $0x48] sm:$0xff]  ;;  %v5762_v33 = vsel %vm372_vm1, %v24542_v26, 0 }
  0x59   : > { %22925 = vmatprep.mubr.msk.f32.mxu1 %vm24267_vm0, %v24266_v0  ;;  %22928 = vmatprep.subr.mxu0 %v24266_v0  ;;  %v24794_v10 = vsub.f32 %v350_v47, %v24782_v5 }
  0x5a   : > { %22926 = vmatmul.mubr.f32.vlgmr.msra.gmra.mxu1 %v2689_v53  ;;  %22933 = vmatprep.subr.mxu1 %v24266_v0  ;;  %v24749_v53 = vand.u32 4294901760, %v4415_v48 }
  0x5b   : > { %22921 = vmatmul.mubr.f32.vlgmr.msra.gmra.mxu0 %v2688_v49  ;;  %22934 = vmatpush3.msra.mxu1 %v24564_v34  ;;  %v24711_v34 = vand.u32 4294901760, %v3966_v29  ;;  %v4078_v49 = vsub.f32 %v24718_v37, %v4077_v41  ;;  %v4975_v14 = vand.u32 4294901760, %v24794_v10 }
  0x5c   : > { %22929 = vmatpush3.msra.mxu0 %v2730_v51  ;;  %22930 = vmatprep.mubr.msk.f32.mxu0 %vm24267_vm0, %v24266_v0  ;;  %v24744_v51 = vand.u32 4294901760, %v349_v43 }
  0x5d   : > { %22935 = vmatprep.mubr.msk.f32.mxu1 %vm24267_vm0, %v24266_v0  ;;  %22938 = vmatprep.subr.mxu0 %v24266_v0  ;;  %v4079_v4 = vand.u32 4294901760, %v4078_v49 }
  0x5e   : > { %22936 = vmatmul.mubr.f32.vlgmr.msra.gmra.mxu1 %v24578_v40  ;;  %22943 = vmatprep.subr.mxu1 %v24266_v0  ;;  %v24756_v55 = vsub.f32 %v349_v43, %v24744_v51 }
  0x5f   : > { %22931 = vmatmul.mubr.f32.vlgmr.msra.gmra.mxu0 %v24578_v40  ;;  %22944 = vmatpush3.msra.mxu1 %v3181_v54  ;;  %v4035_v40 = vsub.f32 %v3966_v29, %v24711_v34  ;;  %v4976_v54 = vsub.f32 %v24794_v10, %v4975_v14 }
  0x60   : > { %22939 = vmatpush3.msra.mxu0 %v24620_v58  ;;  %22940 = vmatprep.mubr.msk.f32.mxu0 %vm24267_vm0, %v24266_v0  ;;  %v4526_v60 = vand.u32 4294901760, %v24756_v55 }
  0x61   : > { %22945 = vmatprep.mubr.msk.f32.mxu1 %vm24267_vm0, %v24266_v0  ;;  %22948 = vmatprep.subr.mxu0 %v24266_v0  ;;  %v4036_v45 = vand.u32 4294901760, %v4035_v40 }
  0x62   : > { %22946 = vmatmul.mubr.f32.vlgmr.msra.gmra.mxu1 %v24630_v62  ;;  %22953 = vmatprep.subr.mxu1 %v24266_v0 }
  0x63   : > { %22941 = vmatmul.mubr.f32.vlgmr.msra.gmra.mxu0 %v3140_v21  ;;  %22954 = vmatpush3.msra.mxu1 %v24620_v58  ;;  %v4037_v52 = vsub.f32 %v4035_v40, %v4036_v45 }
  0x64   : > { %22949 = vmatpush3.msra.mxu0 %v24642_v3  ;;  %22950 = vmatprep.mubr.msk.f32.mxu0 %vm24267_vm0, %v24266_v0  ;;  %v4527_v3 = vsub.f32 %v24756_v55, %v4526_v60 }
  0x65   : > { %22955 = vmatprep.mubr.msk.f32.mxu1 %vm24267_vm0, %v24266_v0  ;;  %22958 = vmatprep.subr.mxu0 %v24266_v0  ;;  %v4038_v57 = vand.u32 4294901760, %v4037_v52 }
  0x66   : > { %22956 = vmatmul.mubr.f32.vlgmr.msra.gmra.mxu1 %v3138_v11  ;;  %22963 = vmatprep.subr.mxu1 %v24266_v0  ;;  %v4528_v13 = vand.u32 4294901760, %v4527_v3  ;;  %v6660_v3 = vsel %vm372_vm1, %v24590_v44, 0 }
  0x67   : > { %22951 = vmatmul.mubr.f32.vlgmr.msra.gmra.mxu0 %v3137_v6  ;;  %22964 = vmatpush3.msra.mxu1 %v24620_v58  ;;  %v4484_v58 = vsub.f32 %v4415_v48, %v24749_v53  ;;  %v353_v48 = vld [vmem:[%s24318_s24 + $0x68] sm:$0xff] }
  0x68   : > { %22959 = vmatpush3.msra.mxu0 %v3179_v8  ;;  %22960 = vmatprep.mubr.msk.f32.mxu0 %vm24267_vm0, %v24266_v0  ;;  %v24787_v8 = vand.u32 4294901760, %v4864_v2 }
  0x69   : > { %22965 = vmatprep.mubr.msk.f32.mxu1 %vm24267_vm0, %v24266_v0  ;;  %22968 = vmatprep.subr.mxu0 %v24266_v0 }
  0x6a   : > { %22966 = vmatmul.mubr.f32.vlgmr.msra.gmra.mxu1 %v24630_v62  ;;  %22973 = vmatprep.subr.mxu1 %v24266_v0  ;;  %v4933_v12 = vsub.f32 %v4864_v2, %v24787_v8 }
  0x6b   : > { %22961 = vmatmul.mubr.f32.vlgmr.msra.gmra.mxu0 %v24630_v62  ;;  %22974 = vmatpush3.msra.mxu1 %v3630_v61  ;;  %v4485_v62 = vand.u32 4294901760, %v4484_v58  ;;  %v24858_v61 = vand.u32 4294901760, %v352_v31 }
  0x6c   : > { %22969 = vmatpush3.msra.mxu0 %v24668_v16  ;;  %22970 = vmatprep.mubr.msk.f32.mxu0 %vm24267_vm0, %v24266_v0  ;;  %v4934_v17 = vand.u32 4294901760, %v4933_v12 }
  0x6d   : > { %22975 = vmatprep.mubr.msk.f32.mxu1 %vm24267_vm0, %v24266_v0  ;;  %22978 = vmatprep.subr.mxu0 %v24266_v0  ;;  %v4486_v6 = vsub.f32 %v4484_v58, %v4485_v62 }
  0x6e   : > { %22976 = vmatmul.mubr.f32.vlgmr.msra.gmra.mxu1 %v24673_v18  ;;  %22983 = vmatprep.subr.mxu1 %v24266_v0  ;;  %v4935_v21 = vsub.f32 %v4933_v12, %v4934_v17 }
  0x6f   : > { %22971 = vmatmul.mubr.f32.vlgmr.msra.gmra.mxu0 %v3589_v39  ;;  %22984 = vmatpush3.msra.mxu1 %v24668_v16  ;;  %v4487_v11 = vand.u32 4294901760, %v4486_v6  ;;  %v24863_v39 = vand.u32 4294901760, %v5762_v33 }
  0x70   : > { %22979 = vmatpush3.msra.mxu0 %v24680_v19  ;;  %22980 = vmatprep.mubr.msk.f32.mxu0 %vm24267_vm0, %v24266_v0  ;;  %v4936_v25 = vand.u32 4294901760, %v4935_v21 }
  0x71   : > { %22985 = vmatprep.mubr.msk.f32.mxu1 %vm24267_vm0, %v24266_v0  ;;  %22988 = vmatprep.subr.mxu0 %v24266_v0  ;;  %v5831_v43 = vsub.f32 %v5762_v33, %v24863_v39 }
  0x72   : > { %22986 = vmatmul.mubr.f32.vlgmr.msra.gmra.mxu1 %v3587_v27  ;;  %22993 = vmatprep.subr.mxu1 %v24266_v0 }
  0x73   : > { %22981 = vmatmul.mubr.f32.vlgmr.msra.gmra.mxu0 %v3586_v23  ;;  %22994 = vmatpush3.msra.mxu1 %v24668_v16  ;;  %v351_v16 = vld [vmem:[%s24318_s24 + $0x58] sm:$0xff]  ;;  %v5832_v49 = vand.u32 4294901760, %v5831_v43 }
  0x74   : > { %22989 = vmatpush3.msra.mxu0 %v3628_v24  ;;  %22990 = vmatprep.mubr.msk.f32.mxu0 %vm24267_vm0, %v24266_v0  ;;  %v24820_v19 = vand.u32 4294901760, %v351_v16 }
  0x75   : > { %22995 = vmatprep.mubr.msk.f32.mxu1 %vm24267_vm0, %v24266_v0  ;;  %22998 = vmatprep.subr.mxu0 %v24266_v0 }
  0x76   : > { %22996 = vmatmul.mubr.f32.vlgmr.msra.gmra.mxu1 %v24673_v18  ;;  %23003 = vmatprep.subr.mxu1 %v24266_v0  ;;  %v24832_v24 = vsub.f32 %v351_v16, %v24820_v19  ;;  %v355_v16 = vld [vmem:[%s24318_s24 + $0x78] sm:$0xff] }
  0x77   : > { %22991 = vmatmul.mubr.f32.vlgmr.msra.gmra.mxu0 %v24673_v18  ;;  %23004 = vmatpush3.msra.mxu1 %v4079_v4  ;;  %v5313_v18 = vsel %vm372_vm1, %v24522_v20, 0  ;;  %v4977_v20 = vand.u32 4294901760, %v4976_v54  ;;  %v5833_v4 = vsub.f32 %v5831_v43, %v5832_v49 }
  0x78   : > { %22999 = vmatpush3.msra.mxu0 %v24706_v32  ;;  %23000 = vmatprep.mubr.msk.f32.mxu0 %vm24267_vm0, %v24266_v0  ;;  %v24825_v23 = vand.u32 4294901760, %v5313_v18  ;;  %v5424_v29 = vand.u32 4294901760, %v24832_v24 }
  0x79   : > { %23005 = vmatprep.mubr.msk.f32.mxu1 %vm24267_vm0, %v24266_v0  ;;  %23008 = vmatprep.subr.mxu0 %v24266_v0 }
  0x7a   : > { %23006 = vmatmul.mubr.f32.vlgmr.msra.gmra.mxu1 %v24711_v34  ;;  %23013 = vmatprep.subr.mxu1 %v24266_v0  ;;  %v5382_v27 = vsub.f32 %v5313_v18, %v24825_v23  ;;  %v7109_v18 = vsel %vm372_vm1, %v24626_v59, 0 }
  0x7b   : > { %23001 = vmatmul.mubr.f32.vlgmr.msra.gmra.mxu0 %v4038_v57  ;;  %23014 = vmatpush3.msra.mxu1 %v24706_v32 }
  0x7c   : > { %23009 = vmatpush3.msra.mxu0 %v24718_v37  ;;  %23010 = vmatprep.mubr.msk.f32.mxu0 %vm24267_vm0, %v24266_v0 }
  0x7d   : > { %23015 = vmatprep.mubr.msk.f32.mxu1 %vm24267_vm0, %v24266_v0  ;;  %23018 = vmatprep.subr.mxu0 %v24266_v0 }
  0x7e   : > { %23016 = vmatmul.mubr.f32.vlgmr.msra.gmra.mxu1 %v4036_v45  ;;  %23023 = vmatprep.subr.mxu1 %v24266_v0 }
  0x7f   : > { %23011 = vmatmul.mubr.f32.vlgmr.msra.gmra.mxu0 %v4035_v40  ;;  %23024 = vmatpush3.msra.mxu1 %v24706_v32  ;;  %v5383_v32 = vand.u32 4294901760, %v5382_v27  ;;  %v24870_v40 = vsub.f32 %v352_v31, %v24858_v61 }
  0x80   : > { %23019 = vmatpush3.msra.mxu0 %v4077_v41  ;;  %23020 = vmatprep.mubr.msk.f32.mxu0 %vm24267_vm0, %v24266_v0 }
  0x81   : > { %23025 = vmatprep.mubr.msk.f32.mxu1 %vm24267_vm0, %v24266_v0  ;;  %23028 = vmatprep.subr.mxu0 %v24266_v0  ;;  %v5384_v37 = vsub.f32 %v5382_v27, %v5383_v32  ;;  %v5873_v45 = vand.u32 4294901760, %v24870_v40 }
  0x82   : > { %23026 = vmatmul.mubr.f32.vlgmr.msra.gmra.mxu1 %v24711_v34  ;;  %23033 = vmatprep.subr.mxu1 %v24266_v0 }
  0x83   : > { %23021 = vmatmul.mubr.f32.vlgmr.msra.gmra.mxu0 %v24711_v34  ;;  %23034 = vmatpush3.msra.mxu1 %v4528_v13  ;;  %v5425_v34 = vsub.f32 %v24832_v24, %v5424_v29  ;;  %v5385_v41 = vand.u32 4294901760, %v5384_v37  ;;  %v5874_v52 = vsub.f32 %v24870_v40, %v5873_v45  ;;  %v24939_v13 = vand.u32 4294901760, %v6660_v3 }
  0x84   : > { %23029 = vmatpush3.msra.mxu0 %v24744_v51  ;;  %23030 = vmatprep.mubr.msk.f32.mxu0 %vm24267_vm0, %v24266_v0 }
  0x85   : > { %23035 = vmatprep.mubr.msk.f32.mxu1 %vm24267_vm0, %v24266_v0  ;;  %23038 = vmatprep.subr.mxu0 %v24266_v0  ;;  %v5426_v26 = vand.u32 4294901760, %v5425_v34 }
  0x86   : > { %23036 = vmatmul.mubr.f32.vlgmr.msra.gmra.mxu1 %v24749_v53  ;;  %23043 = vmatprep.subr.mxu1 %v24266_v0 }
  0x87   : > { %23031 = vmatmul.mubr.f32.vlgmr.msra.gmra.mxu0 %v4487_v11  ;;  %23044 = vmatpush3.msra.mxu1 %v24744_v51 }
  0x88   : > { %23039 = vmatpush3.msra.mxu0 %v24756_v55  ;;  %23040 = vmatprep.mubr.msk.f32.mxu0 %vm24267_vm0, %v24266_v0 }
  0x89   : > { %23045 = vmatprep.mubr.msk.f32.mxu1 %vm24267_vm0, %v24266_v0  ;;  %23048 = vmatprep.subr.mxu0 %v24266_v0 }
  0x8a   : > { %23046 = vmatmul.mubr.f32.vlgmr.msra.gmra.mxu1 %v4485_v62  ;;  %23053 = vmatprep.subr.mxu1 %v24266_v0  ;;  %v354_v62 = vld [vmem:[%s24318_s24 + $0x70] sm:$0xff] }
  0x8b   : > { %23041 = vmatmul.mubr.f32.vlgmr.msra.gmra.mxu0 %v4484_v58  ;;  %23054 = vmatpush3.msra.mxu1 %v24744_v51  ;;  %v6211_v51 = vsel %vm372_vm1, %v24567_v36, 0  ;;  %v5875_v36 = vand.u32 4294901760, %v5874_v52  ;;  %v5834_v58 = vand.u32 4294901760, %v5833_v4  ;;  %v24934_v6 = vand.u32 4294901760, %v354_v62 }
  0x8c   : > { %23049 = vmatpush3.msra.mxu0 %v4526_v60  ;;  %23050 = vmatprep.mubr.msk.f32.mxu0 %vm24267_vm0, %v24266_v0  ;;  %v24901_v55 = vand.u32 4294901760, %v6211_v51 }
  0x8d   : > { %23055 = vmatprep.mubr.msk.f32.mxu1 %vm24267_vm0, %v24266_v0  ;;  %23058 = vmatprep.subr.mxu0 %v24266_v0 }
  0x8e   : > { %23056 = vmatmul.mubr.f32.vlgmr.msra.gmra.mxu1 %v24749_v53  ;;  %23063 = vmatprep.subr.mxu1 %v24266_v0  ;;  %v6280_v60 = vsub.f32 %v6211_v51, %v24901_v55 }
  0x8f   : > { %23051 = vmatmul.mubr.f32.vlgmr.msra.gmra.mxu0 %v24749_v53  ;;  %23064 = vmatpush3.msra.mxu1 %v4977_v20  ;;  %v24896_v53 = vand.u32 4294901760, %v353_v48 }
  0x90   : > { %23059 = vmatpush3.msra.mxu0 %v24782_v5  ;;  %23060 = vmatprep.mubr.msk.f32.mxu0 %vm24267_vm0, %v24266_v0  ;;  %v6281_v2 = vand.u32 4294901760, %v6280_v60 }
  0x91   : > { %23065 = vmatprep.mubr.msk.f32.mxu1 %vm24267_vm0, %v24266_v0  ;;  %23068 = vmatprep.subr.mxu0 %v24266_v0  ;;  %v24908_v57 = vsub.f32 %v353_v48, %v24896_v53  ;;  %v325_v48 = vld [vmem:[%s24331_s30 + $0x8] sm:$0xff] }
  0x92   : > { %23066 = vmatmul.mubr.f32.vlgmr.msra.gmra.mxu1 %v24787_v8  ;;  %23073 = vmatprep.subr.mxu1 %v24266_v0  ;;  %v8007_v52 = vsel %vm372_vm1, %v325_v48, 0 }
  0x93   : > { %23061 = vmatmul.mubr.f32.vlgmr.msra.gmra.mxu0 %v4936_v25  ;;  %23074 = vmatpush3.msra.mxu1 %v24782_v5  ;;  %v6322_v47 = vand.u32 4294901760, %v24908_v57 }
  0x94   : > { %23069 = vmatpush3.msra.mxu0 %v24794_v10  ;;  %23070 = vmatprep.mubr.msk.f32.mxu0 %vm24267_vm0, %v24266_v0  ;;  %v24946_v10 = vsub.f32 %v354_v62, %v24934_v6 }
  0x95   : > { %23075 = vmatprep.mubr.msk.f32.mxu1 %vm24267_vm0, %v24266_v0  ;;  %23078 = vmatprep.subr.mxu0 %v24266_v0 }
  0x96   : > { %23076 = vmatmul.mubr.f32.vlgmr.msra.gmra.mxu1 %v4934_v17  ;;  %23083 = vmatprep.subr.mxu1 %v24266_v0 }
  0x97   : > { %23071 = vmatmul.mubr.f32.vlgmr.msra.gmra.mxu0 %v4933_v12  ;;  %23084 = vmatpush3.msra.mxu1 %v24782_v5  ;;  %v6323_v5 = vsub.f32 %v24908_v57, %v6322_v47  ;;  %v6729_v12 = vsub.f32 %v6660_v3, %v24939_v13  ;;  %v358_v3 = vld [vmem:[%s24996_s8 + $0x10] sm:$0xff] }
  0x98   : > { %23079 = vmatpush3.msra.mxu0 %v4975_v14  ;;  %23080 = vmatprep.mubr.msk.f32.mxu0 %vm24267_vm0, %v24266_v0  ;;  %v6771_v14 = vand.u32 4294901760, %v24946_v10 }
  0x99   : > { %23085 = vmatprep.mubr.msk.f32.mxu1 %vm24267_vm0, %v24266_v0  ;;  %23088 = vmatprep.subr.mxu0 %v24266_v0  ;;  %v6324_v44 = vand.u32 4294901760, %v6323_v5  ;;  %v6730_v17 = vand.u32 4294901760, %v6729_v12 }
  0x9a   : > { %23086 = vmatmul.mubr.f32.vlgmr.msra.gmra.mxu1 %v24787_v8  ;;  %23093 = vmatprep.subr.mxu1 %v24266_v0  ;;  %v6772_v54 = vsub.f32 %v24946_v10, %v6771_v14 }
  0x9b   : > { %23081 = vmatmul.mubr.f32.vlgmr.msra.gmra.mxu0 %v24787_v8  ;;  %23094 = vmatpush3.msra.mxu1 %v5426_v26  ;;  %v6282_v8 = vsub.f32 %v6280_v60, %v6281_v2  ;;  %v6731_v21 = vsub.f32 %v6729_v12, %v6730_v17 }
  0x9c   : > { %23089 = vmatpush3.msra.mxu0 %v24820_v19  ;;  %23090 = vmatprep.mubr.msk.f32.mxu0 %vm24267_vm0, %v24266_v0  ;;  %v6773_v59 = vand.u32 4294901760, %v6772_v54 }
  0x9d   : > { %23095 = vmatprep.mubr.msk.f32.mxu1 %vm24267_vm0, %v24266_v0  ;;  %23098 = vmatprep.subr.mxu0 %v24266_v0  ;;  %v6283_v11 = vand.u32 4294901760, %v6282_v8 }
  0x9e   : > { %23096 = vmatmul.mubr.f32.vlgmr.msra.gmra.mxu1 %v24825_v23  ;;  %23103 = vmatprep.subr.mxu1 %v24266_v0 }
  0x9f   : > { %23091 = vmatmul.mubr.f32.vlgmr.msra.gmra.mxu0 %v5385_v41  ;;  %23104 = vmatpush3.msra.mxu1 %v24820_v19 }
  0xa0   : > { %23099 = vmatpush3.msra.mxu0 %v24832_v24  ;;  %23100 = vmatprep.mubr.msk.f32.mxu0 %vm24267_vm0, %v24266_v0  ;;  %v6732_v24 = vand.u32 4294901760, %v6731_v21 }
  0xa1   : > { %23105 = vmatprep.mubr.msk.f32.mxu1 %vm24267_vm0, %v24266_v0  ;;  %23108 = vmatprep.subr.mxu0 %v24266_v0 }
  0xa2   : > { %23106 = vmatmul.mubr.f32.vlgmr.msra.gmra.mxu1 %v5383_v32  ;;  %23113 = vmatprep.subr.mxu1 %v24266_v0  ;;  %v24208_v32 = vld [vmem:[%s24331_s30] sm:$0xff] }
  0xa3   : > { %23101 = vmatmul.mubr.f32.vlgmr.msra.gmra.mxu0 %v5382_v27  ;;  %23114 = vmatpush3.msra.mxu1 %v24820_v19  ;;  %v24972_v19 = vand.u32 4294901760, %v355_v16  ;;  %v7558_v33 = vsel %vm372_vm1, %v24208_v32, 0 }
  0xa4   : > { %23109 = vmatpush3.msra.mxu0 %v5424_v29  ;;  %23110 = vmatprep.mubr.msk.f32.mxu0 %vm24267_vm0, %v24266_v0  ;;  %v356_v29 = vld [vmem:[%s24996_s8] sm:$0xff] }
  0xa5   : > { %23115 = vmatprep.mubr.msk.f32.mxu1 %vm24267_vm0, %v24266_v0  ;;  %23118 = vmatprep.subr.mxu0 %v24266_v0  ;;  %v24984_v20 = vsub.f32 %v355_v16, %v24972_v19 }
  0xa6   : > { %23116 = vmatmul.mubr.f32.vlgmr.msra.gmra.mxu1 %v24825_v23  ;;  %23123 = vmatprep.subr.mxu1 %v24266_v0 }
  0xa7   : > { %23111 = vmatmul.mubr.f32.vlgmr.msra.gmra.mxu0 %v24825_v23  ;;  %23124 = vmatpush3.msra.mxu1 %v5875_v36  ;;  %v24977_v23 = vand.u32 4294901760, %v7109_v18  ;;  %v7220_v27 = vand.u32 4294901760, %v24984_v20  ;;  %v25065_v36 = vand.u32 4294901760, %v8007_v52 }
  0xa8   : > { %23119 = vmatpush3.msra.mxu0 %v24858_v61  ;;  %23120 = vmatprep.mubr.msk.f32.mxu0 %vm24267_vm0, %v24266_v0 }
  0xa9   : > { %23125 = vmatprep.mubr.msk.f32.mxu1 %vm24267_vm0, %v24266_v0  ;;  %23128 = vmatprep.subr.mxu0 %v24266_v0  ;;  %v7178_v25 = vsub.f32 %v7109_v18, %v24977_v23  ;;  %v7221_v34 = vsub.f32 %v24984_v20, %v7220_v27 }
  0xaa   : > { %23126 = vmatmul.mubr.f32.vlgmr.msra.gmra.mxu1 %v24863_v39  ;;  %23133 = vmatprep.subr.mxu1 %v24266_v0 }
  0xab   : > { %23121 = vmatmul.mubr.f32.vlgmr.msra.gmra.mxu0 %v5834_v58  ;;  %23134 = vmatpush3.msra.mxu1 %v24858_v61  ;;  %v7179_v31 = vand.u32 4294901760, %v7178_v25  ;;  %v7222_v26 = vand.u32 4294901760, %v7221_v34 }
  0xac   : > { %23129 = vmatpush3.msra.mxu0 %v24870_v40  ;;  %23130 = vmatprep.mubr.msk.f32.mxu0 %vm24267_vm0, %v24266_v0 }
  0xad   : > { %23135 = vmatprep.mubr.msk.f32.mxu1 %vm24267_vm0, %v24266_v0  ;;  %23138 = vmatprep.subr.mxu0 %v24266_v0  ;;  %v7180_v37 = vsub.f32 %v7178_v25, %v7179_v31 }
  0xae   : > { %23136 = vmatmul.mubr.f32.vlgmr.msra.gmra.mxu1 %v5832_v49  ;;  %23143 = vmatprep.subr.mxu1 %v24266_v0  ;;  %v357_v49 = vld [vmem:[%s24996_s8 + $0x8] sm:$0xff] }
  0xaf   : > { %23131 = vmatmul.mubr.f32.vlgmr.msra.gmra.mxu0 %v5831_v43  ;;  %23144 = vmatpush3.msra.mxu1 %v24858_v61  ;;  %v25016_v61 = vand.u32 4294901760, %v356_v29  ;;  %v7181_v41 = vand.u32 4294901760, %v7180_v37  ;;  %v25059_v4 = vand.u32 4294901760, %v357_v49 }
  0xb0   : > { %23139 = vmatpush3.msra.mxu0 %v5873_v45  ;;  %23140 = vmatprep.mubr.msk.f32.mxu0 %vm24267_vm0, %v24266_v0 }
  0xb1   : > { %23145 = vmatprep.mubr.msk.f32.mxu1 %vm24267_vm0, %v24266_v0  ;;  %23148 = vmatprep.subr.mxu0 %v24266_v0  ;;  %v25028_v40 = vsub.f32 %v356_v29, %v25016_v61  ;;  %v25072_v58 = vsub.f32 %v357_v49, %v25059_v4 }
  0xb2   : > { %23146 = vmatmul.mubr.f32.vlgmr.msra.gmra.mxu1 %v24863_v39  ;;  %23153 = vmatprep.subr.mxu1 %v24266_v0 }
  0xb3   : > { %23141 = vmatmul.mubr.f32.vlgmr.msra.gmra.mxu0 %v24863_v39  ;;  %23154 = vmatpush3.msra.mxu1 %v6324_v44  ;;  %v25021_v39 = vand.u32 4294901760, %v7558_v33  ;;  %v7669_v45 = vand.u32 4294901760, %v25028_v40  ;;  %v8118_v62 = vand.u32 4294901760, %v25072_v58 }
  0xb4   : > { %23149 = vmatpush3.msra.mxu0 %v24896_v53  ;;  %23150 = vmatprep.mubr.msk.f32.mxu0 %vm24267_vm0, %v24266_v0 }
  0xb5   : > { %23155 = vmatprep.mubr.msk.f32.mxu1 %vm24267_vm0, %v24266_v0  ;;  %23158 = vmatprep.subr.mxu0 %v24266_v0  ;;  %v25036_v43 = vsub.f32 %v7558_v33, %v25021_v39 }
  0xb6   : > { %23156 = vmatmul.mubr.f32.vlgmr.msra.gmra.mxu1 %v24901_v55  ;;  %23163 = vmatprep.subr.mxu1 %v24266_v0 }
  0xb7   : > { %23151 = vmatmul.mubr.f32.vlgmr.msra.gmra.mxu0 %v6283_v11  ;;  %23164 = vmatpush3.msra.mxu1 %v24896_v53  ;;  %v7628_v51 = vand.u32 4294901760, %v25036_v43 }
  0xb8   : > { %23159 = vmatpush3.msra.mxu0 %v24908_v57  ;;  %23160 = vmatprep.mubr.msk.f32.mxu0 %vm24267_vm0, %v24266_v0 }
  0xb9   : > { %23165 = vmatprep.mubr.msk.f32.mxu1 %vm24267_vm0, %v24266_v0  ;;  %23168 = vmatprep.subr.mxu0 %v24266_v0 }
  0xba   : > { %23166 = vmatmul.mubr.f32.vlgmr.msra.gmra.mxu1 %v6281_v2  ;;  %23173 = vmatprep.subr.mxu1 %v24266_v0  ;;  %v326_v2 = vld [vmem:[%s24331_s30 + $0x10] sm:$0xff] }
  0xbb   : > { %23161 = vmatmul.mubr.f32.vlgmr.msra.gmra.mxu0 %v6280_v60  ;;  %23174 = vmatpush3.msra.mxu1 %v24896_v53  ;;  %v7670_v53 = vsub.f32 %v25028_v40, %v7669_v45  ;;  %v8456_v44 = vsel %vm372_vm1, %v326_v2, 0 }
  0xbc   : > { %23169 = vmatpush3.msra.mxu0 %v6322_v47  ;;  %23170 = vmatprep.mubr.msk.f32.mxu0 %vm24267_vm0, %v24266_v0  ;;  %v25080_v47 = vsub.f32 %v8007_v52, %v25065_v36  ;;  %v25112_v54 = vand.u32 4294901760, %v8456_v44 }
  0xbd   : > { %23175 = vmatprep.mubr.msk.f32.mxu1 %vm24267_vm0, %v24266_v0  ;;  %23178 = vmatprep.subr.mxu0 %v24266_v0  ;;  %v7671_v57 = vand.u32 4294901760, %v7670_v53 }
  0xbe   : > { %23176 = vmatmul.mubr.f32.vlgmr.msra.gmra.mxu1 %v24901_v55  ;;  %23183 = vmatprep.subr.mxu1 %v24266_v0  ;;  %v8077_v8 = vand.u32 4294901760, %v25080_v47 }
  0xbf   : > { %23171 = vmatmul.mubr.f32.vlgmr.msra.gmra.mxu0 %v24901_v55  ;;  %23184 = vmatpush3.msra.mxu1 %v6773_v59  ;;  %v7629_v55 = vsub.f32 %v25036_v43, %v7628_v51 }
  0xc0   : > { %23179 = vmatpush3.msra.mxu0 %v24934_v6  ;;  %23180 = vmatprep.mubr.msk.f32.mxu0 %vm24267_vm0, %v24266_v0  ;;  %v8078_v18 = vsub.f32 %v25080_v47, %v8077_v8 }
  0xc1   : > { %23185 = vmatprep.mubr.msk.f32.mxu1 %vm24267_vm0, %v24266_v0  ;;  %23188 = vmatprep.subr.mxu0 %v24266_v0  ;;  %v7630_v60 = vand.u32 4294901760, %v7629_v55 }
  0xc2   : > { %23186 = vmatmul.mubr.f32.vlgmr.msra.gmra.mxu1 %v24939_v13  ;;  %23193 = vmatprep.subr.mxu1 %v24266_v0  ;;  %v8079_v29 = vand.u32 4294901760, %v8078_v18 }
  0xc3   : > { %23181 = vmatmul.mubr.f32.vlgmr.msra.gmra.mxu0 %v6732_v24  ;;  %23194 = vmatpush3.msra.mxu1 %v24934_v6 }
  0xc4   : > { %23189 = vmatpush3.msra.mxu0 %v24946_v10  ;;  %23190 = vmatprep.mubr.msk.f32.mxu0 %vm24267_vm0, %v24266_v0 }
  0xc5   : > { %23195 = vmatprep.mubr.msk.f32.mxu1 %vm24267_vm0, %v24266_v0  ;;  %23198 = vmatprep.subr.mxu0 %v24266_v0 }
  0xc6   : > { %23196 = vmatmul.mubr.f32.vlgmr.msra.gmra.mxu1 %v6730_v17  ;;  %23203 = vmatprep.subr.mxu1 %v24266_v0 }
  0xc7   : > { %23191 = vmatmul.mubr.f32.vlgmr.msra.gmra.mxu0 %v6729_v12  ;;  %23204 = vmatpush3.msra.mxu1 %v24934_v6  ;;  %v8119_v12 = vsub.f32 %v25072_v58, %v8118_v62 }
  0xc8   : > { %23199 = vmatpush3.msra.mxu0 %v6771_v14  ;;  %23200 = vmatprep.mubr.msk.f32.mxu0 %vm24267_vm0, %v24266_v0  ;;  %v25103_v14 = vand.u32 4294901760, %v358_v3 }
  0xc9   : > { %23205 = vmatprep.mubr.msk.f32.mxu1 %vm24267_vm0, %v24266_v0  ;;  %23208 = vmatprep.subr.mxu0 %v24266_v0  ;;  %v8120_v59 = vand.u32 4294901760, %v8119_v12 }
  0xca   : > { %23206 = vmatmul.mubr.f32.vlgmr.msra.gmra.mxu1 %v24939_v13  ;;  %23213 = vmatprep.subr.mxu1 %v24266_v0 }
  0xcb   : > { %23201 = vmatmul.mubr.f32.vlgmr.msra.gmra.mxu0 %v24939_v13  ;;  %23214 = vmatpush3.msra.mxu1 %v7222_v26 }
  0xcc   : > { %23209 = vmatpush3.msra.mxu0 %v24972_v19  ;;  %23210 = vmatprep.mubr.msk.f32.mxu0 %vm24267_vm0, %v24266_v0 }
  0xcd   : > { %23215 = vmatprep.mubr.msk.f32.mxu1 %vm24267_vm0, %v24266_v0  ;;  %23218 = vmatprep.subr.mxu0 %v24266_v0 }
  0xce   : > { %23216 = vmatmul.mubr.f32.vlgmr.msra.gmra.mxu1 %v24977_v23  ;;  %23223 = vmatprep.subr.mxu1 %v24266_v0 }
  0xcf   : > { %23211 = vmatmul.mubr.f32.vlgmr.msra.gmra.mxu0 %v7181_v41  ;;  %23224 = vmatpush3.msra.mxu1 %v24972_v19 }
  0xd0   : > { %23219 = vmatpush3.msra.mxu0 %v24984_v20  ;;  %23220 = vmatprep.mubr.msk.f32.mxu0 %vm24267_vm0, %v24266_v0  ;;  %v25121_v20 = vsub.f32 %v358_v3, %v25103_v14 }
  0xd1   : > { %23225 = vmatprep.mubr.msk.f32.mxu1 %vm24267_vm0, %v24266_v0  ;;  %23228 = vmatprep.subr.mxu0 %v24266_v0 }
  0xd2   : > { %23226 = vmatmul.mubr.f32.vlgmr.msra.gmra.mxu1 %v7179_v31  ;;  %23233 = vmatprep.subr.mxu1 %v24266_v0  ;;  %v25129_v31 = vsub.f32 %v8456_v44, %v25112_v54 }
  0xd3   : > { %23221 = vmatmul.mubr.f32.vlgmr.msra.gmra.mxu0 %v7178_v25  ;;  %23234 = vmatpush3.msra.mxu1 %v24972_v19 }
  0xd4   : > { %23229 = vmatpush3.msra.mxu0 %v7220_v27  ;;  %23230 = vmatprep.mubr.msk.f32.mxu0 %vm24267_vm0, %v24266_v0  ;;  %v8526_v41 = vand.u32 4294901760, %v25129_v31 }
  0xd5   : > { %23235 = vmatprep.mubr.msk.f32.mxu1 %vm24267_vm0, %v24266_v0  ;;  %23238 = vmatprep.subr.mxu0 %v24266_v0 }
  0xd6   : > { %23236 = vmatmul.mubr.f32.vlgmr.msra.gmra.mxu1 %v24977_v23  ;;  %23243 = vmatprep.subr.mxu1 %v24266_v0  ;;  %v8527_v2 = vsub.f32 %v25129_v31, %v8526_v41 }
  0xd7   : > { %23231 = vmatmul.mubr.f32.vlgmr.msra.gmra.mxu0 %v24977_v23  ;;  %23244 = vmatpush3.msra.mxu1 %v7671_v57 }
  0xd8   : > { %23239 = vmatpush3.msra.mxu0 %v25016_v61  ;;  %23240 = vmatprep.mubr.msk.f32.mxu0 %vm24267_vm0, %v24266_v0 }
  0xd9   : > { %23245 = vmatprep.mubr.msk.f32.mxu1 %vm24267_vm0, %v24266_v0  ;;  %23248 = vmatprep.subr.mxu0 %v24266_v0 }
  0xda   : > { %v524_v6 = vpop.f32.mrf.mxu1  ;;  %23246 = vmatmul.mubr.f32.vlgmr.msra.gmra.mxu1 %v25021_v39  ;;  %23253 = vmatprep.subr.mxu1 %v24266_v0 }
  0xdb   : > { %v448_v5 = vpop.f32.mrf.mxu0  ;;  %23241 = vmatmul.mubr.f32.vlgmr.msra.gmra.mxu0 %v7630_v60  ;;  %23254 = vmatpush3.msra.mxu1 %v25016_v61 }
  0xdc   : > { %v525_v13 = vadd.f32 %v524_v6, %v448_v5  ;;  %23249 = vmatpush3.msra.mxu0 %v25028_v40  ;;  %v22767_v11 = vpop.f32.mrf.mxu1  ;;  %23250 = vmatprep.mubr.msk.f32.mxu0 %vm24267_vm0, %v24266_v0 }
  0xdd   : > { %v22762_v10 = vpop.f32.mrf.mxu0  ;;  %23255 = vmatprep.mubr.msk.f32.mxu1 %vm24267_vm0, %v24266_v0  ;;  %23258 = vmatprep.subr.mxu0 %v24266_v0 }
  0xde   : > { %v672_v17 = vpop.f32.mrf.mxu1  ;;  %23256 = vmatmul.mubr.f32.vlgmr.msra.gmra.mxu1 %v7628_v51  ;;  %23263 = vmatprep.subr.mxu1 %v24266_v0 }
  0xdf   : > { %v598_v16 = vpop.f32.mrf.mxu0  ;;  %23251 = vmatmul.mubr.f32.vlgmr.msra.gmra.mxu0 %v25036_v43  ;;  %23264 = vmatpush3.msra.mxu1 %v25016_v61  ;;  %v8567_v61 = vand.u32 4294901760, %v25121_v20  ;;  %v24209_v43 = vld [vmem:[%s24331_s30 + $0x18] sm:$0xff] }
  0xe0   : > { %v599_v19 = vadd.f32 %v598_v16, %v525_v13  ;;  %23259 = vmatpush3.msra.mxu0 %v7669_v45  ;;  %v22777_v23 = vpop.f32.mrf.mxu1  ;;  %23260 = vmatprep.mubr.msk.f32.mxu0 %vm24267_vm0, %v24266_v0  ;;  %v8905_v45 = vsel %vm372_vm1, %v24209_v43, 0 }
  0xe1   : > { %v22772_v21 = vpop.f32.mrf.mxu0  ;;  %23265 = vmatprep.mubr.msk.f32.mxu1 %vm24267_vm0, %v24266_v0  ;;  %23268 = vmatprep.subr.mxu0 %v24266_v0  ;;  %v8568_v52 = vsub.f32 %v25121_v20, %v8567_v61  ;;  %v25159_v55 = vand.u32 4294901760, %v8905_v45  ;;  %v24210_v23 = vld [vmem:[%s24331_s30 + $0x20] sm:$0xff] }
  0xe2   : > { %v673_v24 = vadd.f32 %v672_v17, %v599_v19  ;;  %v818_v27 = vpop.f32.mrf.mxu1  ;;  %23266 = vmatmul.mubr.f32.vlgmr.msra.gmra.mxu1 %v25021_v39  ;;  %23273 = vmatprep.subr.mxu1 %v24266_v0 }
  0xe3   : > { %v746_v25 = vpop.f32.mrf.mxu0  ;;  %23261 = vmatmul.mubr.f32.vlgmr.msra.gmra.mxu0 %v25021_v39  ;;  %23274 = vmatpush3.msra.mxu1 %v8120_v59  ;;  %v359_v39 = vld [vmem:[%s24996_s8 + $0x18] sm:$0xff]  ;;  %v8569_v13 = vand.u32 4294901760, %v8568_v52  ;;  %v25182_v44 = vsub.f32 %v8905_v45, %v25159_v55  ;;  %v9354_v59 = vsel %vm372_vm1, %v24210_v23, 0 }
  0xe4   : > { %v747_v32 = vadd.f32 %v746_v25, %v673_v24  ;;  %23269 = vmatpush3.msra.mxu0 %v25059_v4  ;;  %v22787_v34 = vpop.f32.mrf.mxu1  ;;  %23270 = vmatprep.mubr.msk.f32.mxu0 %vm24267_vm0, %v24266_v0  ;;  %v25154_v53 = vand.u32 4294901760, %v359_v39 }
  0xe5   : > { %v22782_v33 = vpop.f32.mrf.mxu0  ;;  %23275 = vmatprep.mubr.msk.f32.mxu1 %vm24267_vm0, %v24266_v0  ;;  %23278 = vmatprep.subr.mxu0 %v24266_v0  ;;  %v8975_v21 = vand.u32 4294901760, %v25182_v44 }
  0xe6   : > { %v25136_v37 = vadd.f32 %v818_v27, %v747_v32  ;;  %v973_v40 = vpop.f32.mrf.mxu1  ;;  %23276 = vmatmul.mubr.f32.vlgmr.msra.gmra.mxu1 %v25065_v36  ;;  %23283 = vmatprep.subr.mxu1 %v24266_v0  ;;  %v25212_v33 = vand.u32 4294901760, %v9354_v59 }
  0xe7   : > { %v897_v26 = vpop.f32.mrf.mxu0  ;;  %23271 = vmatmul.mubr.f32.vlgmr.msra.gmra.mxu0 %v8079_v29  ;;  %23284 = vmatpush3.msra.mxu1 %v25059_v4 }
  0xe8   : > { %v974_v48 = vadd.f32 %v973_v40, %v897_v26  ;;  %23279 = vmatpush3.msra.mxu0 %v25072_v58  ;;  %v22797_v51 = vpop.f32.mrf.mxu1  ;;  %23280 = vmatprep.mubr.msk.f32.mxu0 %vm24267_vm0, %v24266_v0  ;;  %v8976_v26 = vsub.f32 %v25182_v44, %v8975_v21 }
  0xe9   : > { %v22792_v49 = vpop.f32.mrf.mxu0  ;;  %23285 = vmatprep.mubr.msk.f32.mxu1 %vm24267_vm0, %v24266_v0  ;;  %23288 = vmatprep.subr.mxu0 %v24266_v0 }
  0xea   : > { %v1121_v60 = vpop.f32.mrf.mxu1  ;;  %23286 = vmatmul.mubr.f32.vlgmr.msra.gmra.mxu1 %v8077_v8  ;;  %23293 = vmatprep.subr.mxu1 %v24266_v0  ;;  %v25235_v49 = vsub.f32 %v9354_v59, %v25212_v33 }
  0xeb   : > { %v1047_v57 = vpop.f32.mrf.mxu0  ;;  %23281 = vmatmul.mubr.f32.vlgmr.msra.gmra.mxu0 %v25080_v47  ;;  %23294 = vmatpush3.msra.mxu1 %v25059_v4  ;;  %v25174_v47 = vsub.f32 %v359_v39, %v25154_v53  ;;  %v8528_v4 = vand.u32 4294901760, %v8527_v2 }
  0xec   : > { %v1048_v3 = vadd.f32 %v1047_v57, %v974_v48  ;;  %23289 = vmatpush3.msra.mxu0 %v8118_v62  ;;  %v22807_v6 = vpop.f32.mrf.mxu1  ;;  %23290 = vmatprep.mubr.msk.f32.mxu0 %vm24267_vm0, %v24266_v0 }
  0xed   : > { %v22802_v5 = vpop.f32.mrf.mxu0  ;;  %23295 = vmatprep.mubr.msk.f32.mxu1 %vm24267_vm0, %v24266_v0  ;;  %23298 = vmatprep.subr.mxu0 %v24266_v0  ;;  %v9016_v16 = vand.u32 4294901760, %v25174_v47  ;;  %v9424_v6 = vand.u32 4294901760, %v25235_v49 }
  0xee   : > { %v1122_v8 = vadd.f32 %v1121_v60, %v1048_v3  ;;  %v1267_v62 = vpop.f32.mrf.mxu1  ;;  %23296 = vmatmul.mubr.f32.vlgmr.msra.gmra.mxu1 %v25065_v36  ;;  %23303 = vmatprep.subr.mxu1 %v24266_v0 }
  0xef   : > { %v1195_v58 = vpop.f32.mrf.mxu0  ;;  %23291 = vmatmul.mubr.f32.vlgmr.msra.gmra.mxu0 %v25065_v36  ;;  %23304 = vmatpush3.msra.mxu1 %v8569_v13  ;;  %v360_v36 = vld [vmem:[%s24996_s8 + $0x20] sm:$0xff]  ;;  %v9017_v29 = vsub.f32 %v25174_v47, %v9016_v16  ;;  %v24211_v13 = vld [vmem:[%s24331_s30 + $0x28] sm:$0xff] }
  0xf0   : > { %v1196_v10 = vadd.f32 %v1195_v58, %v1122_v8  ;;  %23299 = vmatpush3.msra.mxu0 %v25103_v14  ;;  %v22817_v12 = vpop.f32.mrf.mxu1  ;;  %23300 = vmatprep.mubr.msk.f32.mxu0 %vm24267_vm0, %v24266_v0  ;;  %v25207_v32 = vand.u32 4294901760, %v360_v36  ;;  %v9803_v8 = vsel %vm372_vm1, %v24211_v13, 0 }
  0xf1   : > { %v22812_v11 = vpop.f32.mrf.mxu0  ;;  %23305 = vmatprep.mubr.msk.f32.mxu1 %vm24267_vm0, %v24266_v0  ;;  %23308 = vmatprep.subr.mxu0 %v24266_v0  ;;  %v9018_v48 = vand.u32 4294901760, %v9017_v29  ;;  %v25265_v12 = vand.u32 4294901760, %v9803_v8 }
  0xf2   : > { %v25189_v17 = vadd.f32 %v1267_v62, %v1196_v10  ;;  %v1422_v19 = vpop.f32.mrf.mxu1  ;;  %23306 = vmatmul.mubr.f32.vlgmr.msra.gmra.mxu1 %v25112_v54  ;;  %23313 = vmatprep.subr.mxu1 %v24266_v0 }
  0xf3   : > { %v1346_v18 = vpop.f32.mrf.mxu0  ;;  %23301 = vmatmul.mubr.f32.vlgmr.msra.gmra.mxu0 %v8528_v4  ;;  %23314 = vmatpush3.msra.mxu1 %v25103_v14 }
  0xf4   : > { %v1423_v24 = vadd.f32 %v1422_v19, %v1346_v18  ;;  %23309 = vmatpush3.msra.mxu0 %v25121_v20  ;;  %v22827_v27 = vpop.f32.mrf.mxu1  ;;  %23310 = vmatprep.mubr.msk.f32.mxu0 %vm24267_vm0, %v24266_v0  ;;  %v9425_v19 = vsub.f32 %v25235_v49, %v9424_v6 }
  0xf5   : > { %v22822_v25 = vpop.f32.mrf.mxu0  ;;  %23315 = vmatprep.mubr.msk.f32.mxu1 %vm24267_vm0, %v24266_v0  ;;  %23318 = vmatprep.subr.mxu0 %v24266_v0  ;;  %v25288_v27 = vsub.f32 %v9803_v8, %v25265_v12 }
  0xf6   : > { %v1570_v39 = vpop.f32.mrf.mxu1  ;;  %23316 = vmatmul.mubr.f32.vlgmr.msra.gmra.mxu1 %v8526_v41  ;;  %23323 = vmatprep.subr.mxu1 %v24266_v0 }
  0xf7   : > { %v1496_v34 = vpop.f32.mrf.mxu0  ;;  %23311 = vmatmul.mubr.f32.vlgmr.msra.gmra.mxu0 %v25129_v31  ;;  %23324 = vmatpush3.msra.mxu1 %v25103_v14  ;;  %v25227_v31 = vsub.f32 %v360_v36, %v25207_v32  ;;  %v8977_v14 = vand.u32 4294901760, %v8976_v26 }
  0xf8   : > { %v1497_v40 = vadd.f32 %v1496_v34, %v1423_v24  ;;  %23319 = vmatpush3.msra.mxu0 %v8567_v61  ;;  %v22837_v45 = vpop.f32.mrf.mxu1  ;;  %23320 = vmatprep.mubr.msk.f32.mxu0 %vm24267_vm0, %v24266_v0 }
  0xf9   : > { %v22832_v43 = vpop.f32.mrf.mxu0  ;;  %23325 = vmatprep.mubr.msk.f32.mxu1 %vm24267_vm0, %v24266_v0  ;;  %23328 = vmatprep.subr.mxu0 %v24266_v0  ;;  %v9465_v60 = vand.u32 4294901760, %v25227_v31 }
  0xfa   : > { %v1571_v41 = vadd.f32 %v1570_v39, %v1497_v40  ;;  %v1716_v61 = vpop.f32.mrf.mxu1  ;;  %23326 = vmatmul.mubr.f32.vlgmr.msra.gmra.mxu1 %v25112_v54  ;;  %23333 = vmatprep.subr.mxu1 %v24266_v0 }
  0xfb   : > { %v1644_v20 = vpop.f32.mrf.mxu0  ;;  %23321 = vmatmul.mubr.f32.vlgmr.msra.gmra.mxu0 %v25112_v54  ;;  %23334 = vmatpush3.msra.mxu1 %v9018_v48  ;;  %v361_v54 = vld [vmem:[%s24996_s8 + $0x28] sm:$0xff]  ;;  %v9466_v10 = vsub.f32 %v25227_v31, %v9465_v60  ;;  %v9873_v48 = vand.u32 4294901760, %v25288_v27 }
  0xfc   : > { %v1645_v51 = vadd.f32 %v1644_v20, %v1571_v41  ;;  %23329 = vmatpush3.msra.mxu0 %v25154_v53  ;;  %v22847_v57 = vpop.f32.mrf.mxu1  ;;  %23330 = vmatprep.mubr.msk.f32.mxu0 %vm24267_vm0, %v24266_v0  ;;  %v25260_v11 = vand.u32 4294901760, %v361_v54  ;;  %v24212_v41 = vld [vmem:[%s24331_s30 + $0x30] sm:$0xff] }
  0xfd   : > { %v22842_v52 = vpop.f32.mrf.mxu0  ;;  %23335 = vmatprep.mubr.msk.f32.mxu1 %vm24267_vm0, %v24266_v0  ;;  %23338 = vmatprep.subr.mxu0 %v24266_v0  ;;  %v9467_v25 = vand.u32 4294901760, %v9466_v10  ;;  %v10252_v20 = vsel %vm372_vm1, %v24212_v41, 0  ;;  %v9874_v13 = vsub.f32 %v25288_v27, %v9873_v48 }
  0xfe   : > { %v25242_v2 = vadd.f32 %v1716_v61, %v1645_v51  ;;  %v1871_v5 = vpop.f32.mrf.mxu1  ;;  %23336 = vmatmul.mubr.f32.vlgmr.msra.gmra.mxu1 %v25159_v55  ;;  %23343 = vmatprep.subr.mxu1 %v24266_v0 }
  0xff   : > { %v1795_v3 = vpop.f32.mrf.mxu0  ;;  %23331 = vmatmul.mubr.f32.vlgmr.msra.gmra.mxu0 %v8977_v14  ;;  %23344 = vmatpush3.msra.mxu1 %v25154_v53 }
 0x100   : > { %v1872_v58 = vadd.f32 %v1871_v5, %v1795_v3  ;;  %23339 = vmatpush3.msra.mxu0 %v25174_v47  ;;  %v22857_v4 = vpop.f32.mrf.mxu1  ;;  %23340 = vmatprep.mubr.msk.f32.mxu0 %vm24267_vm0, %v24266_v0 }
 0x101   : > { %v22852_v62 = vpop.f32.mrf.mxu0  ;;  %23345 = vmatprep.mubr.msk.f32.mxu1 %vm24267_vm0, %v24266_v0  ;;  %23348 = vmatprep.subr.mxu0 %v24266_v0 }
 0x102   : > { %v2019_v18 = vpop.f32.mrf.mxu1  ;;  %23346 = vmatmul.mubr.f32.vlgmr.msra.gmra.mxu1 %v8975_v21  ;;  %23353 = vmatprep.subr.mxu1 %v24266_v0 }
 0x103   : > { %v1945_v36 = vpop.f32.mrf.mxu0  ;;  %23341 = vmatmul.mubr.f32.vlgmr.msra.gmra.mxu0 %v25182_v44  ;;  %23354 = vmatpush3.msra.mxu1 %v25154_v53  ;;  %v25280_v44 = vsub.f32 %v361_v54, %v25260_v11  ;;  %v9426_v53 = vand.u32 4294901760, %v9425_v19  ;;  %v25318_v54 = vand.u32 4294901760, %v10252_v20 }
 0x104   : > { %v1946_v23 = vadd.f32 %v1945_v36, %v1872_v58  ;;  %23349 = vmatpush3.msra.mxu0 %v9016_v16  ;;  %v22867_v24 = vpop.f32.mrf.mxu1  ;;  %23350 = vmatprep.mubr.msk.f32.mxu0 %vm24267_vm0, %v24266_v0 }
 0x105   : > { %v22862_v59 = vpop.f32.mrf.mxu0  ;;  %23355 = vmatprep.mubr.msk.f32.mxu1 %vm24267_vm0, %v24266_v0  ;;  %23358 = vmatprep.subr.mxu0 %v24266_v0  ;;  %v9914_v26 = vand.u32 4294901760, %v25280_v44  ;;  %v25341_v10 = vsub.f32 %v10252_v20, %v25318_v54 }
 0x106   : > { %v2020_v21 = vadd.f32 %v2019_v18, %v1946_v23  ;;  %v2165_v16 = vpop.f32.mrf.mxu1  ;;  %23356 = vmatmul.mubr.f32.vlgmr.msra.gmra.mxu1 %v25159_v55  ;;  %23363 = vmatprep.subr.mxu1 %v24266_v0 }
 0x107   : > { %v2093_v47 = vpop.f32.mrf.mxu0  ;;  %23351 = vmatmul.mubr.f32.vlgmr.msra.gmra.mxu0 %v25159_v55  ;;  %23364 = vmatpush3.msra.mxu1 %v9467_v25  ;;  %v362_v55 = vld [vmem:[%s24996_s8 + $0x30] sm:$0xff]  ;;  %v9915_v52 = vsub.f32 %v25280_v44, %v9914_v26 }
 0x108   : > { %v2094_v29 = vadd.f32 %v2093_v47, %v2020_v21  ;;  %23359 = vmatpush3.msra.mxu0 %v25207_v32  ;;  %v22877_v39 = vpop.f32.mrf.mxu1  ;;  %23360 = vmatprep.mubr.msk.f32.mxu0 %vm24267_vm0, %v24266_v0  ;;  %v25313_v57 = vand.u32 4294901760, %v362_v55  ;;  %v10322_v21 = vand.u32 4294901760, %v25341_v10  ;;  %v24213_v47 = vld [vmem:[%s24331_s30 + $0x38] sm:$0xff] }
 0x109   : > { %v22872_v34 = vpop.f32.mrf.mxu0  ;;  %23365 = vmatprep.mubr.msk.f32.mxu1 %vm24267_vm0, %v24266_v0  ;;  %23368 = vmatprep.subr.mxu0 %v24266_v0  ;;  %v9916_v4 = vand.u32 4294901760, %v9915_v52 }
 0x10a   : > { %v25295_v40 = vadd.f32 %v2165_v16, %v2094_v29  ;;  %v2320_v45 = vpop.f32.mrf.mxu1  ;;  %23366 = vmatmul.mubr.f32.vlgmr.msra.gmra.mxu1 %v25212_v33  ;;  %23373 = vmatprep.subr.mxu1 %v24266_v0  ;;  %v10701_v16 = vsel %vm372_vm1, %v24213_v47, 0  ;;  %v10323_v20 = vsub.f32 %v25341_v10, %v10322_v21 }
 0x10b   : > { %v2244_v43 = vpop.f32.mrf.mxu0  ;;  %23361 = vmatmul.mubr.f32.vlgmr.msra.gmra.mxu0 %v9426_v53  ;;  %23374 = vmatpush3.msra.mxu1 %v25207_v32 }
 0x10c   : > { %v2321_v61 = vadd.f32 %v2320_v45, %v2244_v43  ;;  %23369 = vmatpush3.msra.mxu0 %v25227_v31  ;;  %v22887_v51 = vpop.f32.mrf.mxu1  ;;  %23370 = vmatprep.mubr.msk.f32.mxu0 %vm24267_vm0, %v24266_v0  ;;  %v25371_v43 = vand.u32 4294901760, %v10701_v16 }
 0x10d   : > { %v22882_v14 = vpop.f32.mrf.mxu0  ;;  %23375 = vmatprep.mubr.msk.f32.mxu1 %vm24267_vm0, %v24266_v0  ;;  %23378 = vmatprep.subr.mxu0 %v24266_v0 }
 0x10e   : > { %v2468_v5 = vpop.f32.mrf.mxu1  ;;  %23376 = vmatmul.mubr.f32.vlgmr.msra.gmra.mxu1 %v9424_v6  ;;  %23383 = vmatprep.subr.mxu1 %v24266_v0 }
 0x10f   : > { %v2394_v3 = vpop.f32.mrf.mxu0  ;;  %23371 = vmatmul.mubr.f32.vlgmr.msra.gmra.mxu0 %v25235_v49  ;;  %23384 = vmatpush3.msra.mxu1 %v25207_v32  ;;  %v25333_v49 = vsub.f32 %v362_v55, %v25313_v57  ;;  %v9875_v32 = vand.u32 4294901760, %v9874_v13 }
 0x110   : > { %v2395_v8 = vadd.f32 %v2394_v3, %v2321_v61  ;;  %23379 = vmatpush3.msra.mxu0 %v9465_v60  ;;  %v22897_v62 = vpop.f32.mrf.mxu1  ;;  %23380 = vmatprep.mubr.msk.f32.mxu0 %vm24267_vm0, %v24266_v0  ;;  %v25394_v3 = vsub.f32 %v10701_v16, %v25371_v43 }
 0x111   : > { %v22892_v58 = vpop.f32.mrf.mxu0  ;;  %23385 = vmatprep.mubr.msk.f32.mxu1 %vm24267_vm0, %v24266_v0  ;;  %23388 = vmatprep.subr.mxu0 %v24266_v0  ;;  %v10363_v23 = vand.u32 4294901760, %v25333_v49 }
 0x112   : > { %v2469_v6 = vadd.f32 %v2468_v5, %v2395_v8  ;;  %v2614_v60 = vpop.f32.mrf.mxu1  ;;  %23386 = vmatmul.mubr.f32.vlgmr.msra.gmra.mxu1 %v25212_v33  ;;  %23393 = vmatprep.subr.mxu1 %v24266_v0 }
 0x113   : > { %v2542_v31 = vpop.f32.mrf.mxu0  ;;  %23381 = vmatmul.mubr.f32.vlgmr.msra.gmra.mxu0 %v25212_v33  ;;  %23394 = vmatpush3.msra.mxu1 %v9916_v4  ;;  %v363_v33 = vld [vmem:[%s24996_s8 + $0x38] sm:$0xff]  ;;  %v10364_v39 = vsub.f32 %v25333_v49, %v10363_v23 }
 0x114   : > { %v2543_v36 = vadd.f32 %v2542_v31, %v2469_v6  ;;  %23389 = vmatpush3.msra.mxu0 %v25260_v11  ;;  %v22907_v19 = vpop.f32.mrf.mxu1  ;;  %23390 = vmatprep.mubr.msk.f32.mxu0 %vm24267_vm0, %v24266_v0  ;;  %v25366_v55 = vand.u32 4294901760, %v363_v33  ;;  %v10771_v31 = vand.u32 4294901760, %v25394_v3 }
 0x115   : > { %v22902_v18 = vpop.f32.mrf.mxu0  ;;  %23395 = vmatprep.mubr.msk.f32.mxu1 %vm24267_vm0, %v24266_v0  ;;  %23398 = vmatprep.subr.mxu0 %v24266_v0  ;;  %v10365_v52 = vand.u32 4294901760, %v10364_v39 }
 0x116   : > { %v25348_v59 = vadd.f32 %v2614_v60, %v2543_v36  ;;  %v2769_v25 = vpop.f32.mrf.mxu1  ;;  %23396 = vmatmul.mubr.f32.vlgmr.msra.gmra.mxu1 %v25265_v12  ;;  %23403 = vmatprep.subr.mxu1 %v24266_v0  ;;  %v24214_v60 = vld [vmem:[%s24331_s30 + $0x40] sm:$0xff] }
 0x117   : > { %v2693_v24 = vpop.f32.mrf.mxu0  ;;  %23391 = vmatmul.mubr.f32.vlgmr.msra.gmra.mxu0 %v9875_v32  ;;  %23404 = vmatpush3.msra.mxu1 %v25260_v11  ;;  %v11150_v32 = vsel %vm372_vm1, %v24214_v60, 0 }
 0x118   : > { %v2770_v53 = vadd.f32 %v2769_v25, %v2693_v24  ;;  %23399 = vmatpush3.msra.mxu0 %v25280_v44  ;;  %v22917_v34 = vpop.f32.mrf.mxu1  ;;  %23400 = vmatprep.mubr.msk.f32.mxu0 %vm24267_vm0, %v24266_v0  ;;  %v25424_v25 = vand.u32 4294901760, %v11150_v32 }
 0x119   : > { %v22912_v29 = vpop.f32.mrf.mxu0  ;;  %23405 = vmatprep.mubr.msk.f32.mxu1 %vm24267_vm0, %v24266_v0  ;;  %23408 = vmatprep.subr.mxu0 %v24266_v0 }
 0x11a   : > { %v2917_v41 = vpop.f32.mrf.mxu1  ;;  %23406 = vmatmul.mubr.f32.vlgmr.msra.gmra.mxu1 %v9873_v48  ;;  %23413 = vmatprep.subr.mxu1 %v24266_v0 }
 0x11b   : > { %v2843_v45 = vpop.f32.mrf.mxu0  ;;  %23401 = vmatmul.mubr.f32.vlgmr.msra.gmra.mxu0 %v25288_v27  ;;  %23414 = vmatpush3.msra.mxu1 %v25260_v11  ;;  %v25386_v27 = vsub.f32 %v363_v33, %v25366_v55  ;;  %v10324_v11 = vand.u32 4294901760, %v10323_v20 }
 0x11c   : > { %v2844_v61 = vadd.f32 %v2843_v45, %v2770_v53  ;;  %23409 = vmatpush3.msra.mxu0 %v9914_v26  ;;  %v22927_v51 = vpop.f32.mrf.mxu1  ;;  %23410 = vmatprep.mubr.msk.f32.mxu0 %vm24267_vm0, %v24266_v0  ;;  %v10772_v53 = vsub.f32 %v25394_v3, %v10771_v31 }
 0x11d   : > { %v22922_v14 = vpop.f32.mrf.mxu0  ;;  %23415 = vmatprep.mubr.msk.f32.mxu1 %vm24267_vm0, %v24266_v0  ;;  %23418 = vmatprep.subr.mxu0 %v24266_v0  ;;  %v10812_v58 = vand.u32 4294901760, %v25386_v27 }
 0x11e   : > { %v2918_v48 = vadd.f32 %v2917_v41, %v2844_v61  ;;  %v3063_v26 = vpop.f32.mrf.mxu1  ;;  %23416 = vmatmul.mubr.f32.vlgmr.msra.gmra.mxu1 %v25265_v12  ;;  %23423 = vmatprep.subr.mxu1 %v24266_v0  ;;  %v25447_v41 = vsub.f32 %v11150_v32, %v25424_v25 }
 0x11f   : > { %v2991_v44 = vpop.f32.mrf.mxu0  ;;  %23411 = vmatmul.mubr.f32.vlgmr.msra.gmra.mxu0 %v25265_v12  ;;  %23424 = vmatpush3.msra.mxu1 %v10365_v52  ;;  %v364_v12 = vld [vmem:[%s24996_s8 + $0x40] sm:$0xff]  ;;  %v10813_v33 = vsub.f32 %v25386_v27, %v10812_v58 }
 0x120   : > { %v2992_v5 = vadd.f32 %v2991_v44, %v2918_v48  ;;  %23419 = vmatpush3.msra.mxu0 %v25313_v57  ;;  %v22937_v8 = vpop.f32.mrf.mxu1  ;;  %23420 = vmatprep.mubr.msk.f32.mxu0 %vm24267_vm0, %v24266_v0  ;;  %v25419_v24 = vand.u32 4294901760, %v364_v12 }
 0x121   : > { %v22932_v13 = vpop.f32.mrf.mxu0  ;;  %23425 = vmatprep.mubr.msk.f32.mxu1 %vm24267_vm0, %v24266_v0  ;;  %23428 = vmatprep.subr.mxu0 %v24266_v0  ;;  %v10814_v45 = vand.u32 4294901760, %v10813_v33 }
 0x122   : > { %v25401_v62 = vadd.f32 %v3063_v26, %v2992_v5  ;;  %v3218_v6 = vpop.f32.mrf.mxu1  ;;  %23426 = vmatmul.mubr.f32.vlgmr.msra.gmra.mxu1 %v25318_v54  ;;  %23433 = vmatprep.subr.mxu1 %v24266_v0  ;;  %v11220_v26 = vand.u32 4294901760, %v25447_v41 }
 0x123   : > { %v3142_v4 = vpop.f32.mrf.mxu0  ;;  %23421 = vmatmul.mubr.f32.vlgmr.msra.gmra.mxu0 %v10324_v11  ;;  %23434 = vmatpush3.msra.mxu1 %v25313_v57  ;;  %v24215_v11 = vld [vmem:[%s24331_s30 + $0x48] sm:$0xff] }
 0x124   : > { %v3219_v36 = vadd.f32 %v3218_v6, %v3142_v4  ;;  %23429 = vmatpush3.msra.mxu0 %v25333_v49  ;;  %v22947_v19 = vpop.f32.mrf.mxu1  ;;  %23430 = vmatprep.mubr.msk.f32.mxu0 %vm24267_vm0, %v24266_v0  ;;  %v11599_v5 = vsel %vm372_vm1, %v24215_v11, 0 }
 0x125   : > { %v22942_v18 = vpop.f32.mrf.mxu0  ;;  %23435 = vmatprep.mubr.msk.f32.mxu1 %vm24267_vm0, %v24266_v0  ;;  %23438 = vmatprep.subr.mxu0 %v24266_v0  ;;  %v25477_v60 = vand.u32 4294901760, %v11599_v5 }
 0x126   : > { %v3366_v16 = vpop.f32.mrf.mxu1  ;;  %23436 = vmatmul.mubr.f32.vlgmr.msra.gmra.mxu1 %v10322_v21  ;;  %23443 = vmatprep.subr.mxu1 %v24266_v0  ;;  %v11221_v18 = vsub.f32 %v25447_v41, %v11220_v26 }
 0x127   : > { %v3292_v47 = vpop.f32.mrf.mxu0  ;;  %23431 = vmatmul.mubr.f32.vlgmr.msra.gmra.mxu0 %v25341_v10  ;;  %23444 = vmatpush3.msra.mxu1 %v25313_v57  ;;  %v25439_v10 = vsub.f32 %v364_v12, %v25419_v24  ;;  %v10773_v57 = vand.u32 4294901760, %v10772_v53  ;;  %v25500_v53 = vsub.f32 %v11599_v5, %v25477_v60 }
 0x128   : > { %v3293_v29 = vadd.f32 %v3292_v47, %v3219_v36  ;;  %23439 = vmatpush3.msra.mxu0 %v10363_v23  ;;  %v22957_v39 = vpop.f32.mrf.mxu1  ;;  %23440 = vmatprep.mubr.msk.f32.mxu0 %vm24267_vm0, %v24266_v0 }
 0x129   : > { %v22952_v34 = vpop.f32.mrf.mxu0  ;;  %23445 = vmatprep.mubr.msk.f32.mxu1 %vm24267_vm0, %v24266_v0  ;;  %23448 = vmatprep.subr.mxu0 %v24266_v0  ;;  %v11261_v51 = vand.u32 4294901760, %v25439_v10 }
 0x12a   : > { %v3367_v21 = vadd.f32 %v3366_v16, %v3293_v29  ;;  %v3512_v23 = vpop.f32.mrf.mxu1  ;;  %23446 = vmatmul.mubr.f32.vlgmr.msra.gmra.mxu1 %v25318_v54  ;;  %23453 = vmatprep.subr.mxu1 %v24266_v0 }
 0x12b   : > { %v3440_v49 = vpop.f32.mrf.mxu0  ;;  %23441 = vmatmul.mubr.f32.vlgmr.msra.gmra.mxu0 %v25318_v54  ;;  %23454 = vmatpush3.msra.mxu1 %v10814_v45  ;;  %v365_v54 = vld [vmem:[%s24996_s8 + $0x48] sm:$0xff]  ;;  %v11262_v4 = vsub.f32 %v25439_v10, %v11261_v51 }
 0x12c   : > { %v3441_v20 = vadd.f32 %v3440_v49, %v3367_v21  ;;  %23449 = vmatpush3.msra.mxu0 %v25366_v55  ;;  %v22967_v14 = vpop.f32.mrf.mxu1  ;;  %23450 = vmatprep.mubr.msk.f32.mxu0 %vm24267_vm0, %v24266_v0  ;;  %v25472_v6 = vand.u32 4294901760, %v365_v54 }
 0x12d   : > { %v22962_v61 = vpop.f32.mrf.mxu0  ;;  %23455 = vmatprep.mubr.msk.f32.mxu1 %vm24267_vm0, %v24266_v0  ;;  %23458 = vmatprep.subr.mxu0 %v24266_v0  ;;  %v11263_v16 = vand.u32 4294901760, %v11262_v4 }
 0x12e   : > { %v25454_v52 = vadd.f32 %v3512_v23, %v3441_v20  ;;  %v3667_v44 = vpop.f32.mrf.mxu1  ;;  %23456 = vmatmul.mubr.f32.vlgmr.msra.gmra.mxu1 %v25371_v43  ;;  %23463 = vmatprep.subr.mxu1 %v24266_v0  ;;  %v24216_v20 = vld [vmem:[%s24331_s30 + $0x50] sm:$0xff] }
 0x12f   : > { %v3591_v48 = vpop.f32.mrf.mxu0  ;;  %23451 = vmatmul.mubr.f32.vlgmr.msra.gmra.mxu0 %v10773_v57  ;;  %23464 = vmatpush3.msra.mxu1 %v25366_v55  ;;  %v11669_v57 = vand.u32 4294901760, %v25500_v53  ;;  %v12048_v61 = vsel %vm372_vm1, %v24216_v20, 0 }
 0x130   : > { %v3668_v13 = vadd.f32 %v3667_v44, %v3591_v48  ;;  %23459 = vmatpush3.msra.mxu0 %v25386_v27  ;;  %v22977_v12 = vpop.f32.mrf.mxu1  ;;  %23460 = vmatprep.mubr.msk.f32.mxu0 %vm24267_vm0, %v24266_v0  ;;  %v25530_v5 = vand.u32 4294901760, %v12048_v61 }
 0x131   : > { %v22972_v8 = vpop.f32.mrf.mxu0  ;;  %23465 = vmatprep.mubr.msk.f32.mxu1 %vm24267_vm0, %v24266_v0  ;;  %23468 = vmatprep.subr.mxu0 %v24266_v0  ;;  %v11670_v12 = vsub.f32 %v25500_v53, %v11669_v57 }
 0x132   : > { %v3815_v36 = vpop.f32.mrf.mxu1  ;;  %23466 = vmatmul.mubr.f32.vlgmr.msra.gmra.mxu1 %v10771_v31  ;;  %23473 = vmatprep.subr.mxu1 %v24266_v0 }
 0x133   : > { %v3741_v32 = vpop.f32.mrf.mxu0  ;;  %23461 = vmatmul.mubr.f32.vlgmr.msra.gmra.mxu0 %v25394_v3  ;;  %23474 = vmatpush3.msra.mxu1 %v25366_v55  ;;  %v25492_v3 = vsub.f32 %v365_v54, %v25472_v6  ;;  %v11222_v55 = vand.u32 4294901760, %v11221_v18 }
 0x134   : > { %v3742_v19 = vadd.f32 %v3741_v32, %v3668_v13  ;;  %23469 = vmatpush3.msra.mxu0 %v10812_v58  ;;  %v22987_v47 = vpop.f32.mrf.mxu1  ;;  %23470 = vmatprep.mubr.msk.f32.mxu0 %vm24267_vm0, %v24266_v0 }
 0x135   : > { %v22982_v33 = vpop.f32.mrf.mxu0  ;;  %23475 = vmatprep.mubr.msk.f32.mxu1 %vm24267_vm0, %v24266_v0  ;;  %23478 = vmatprep.subr.mxu0 %v24266_v0  ;;  %v11710_v45 = vand.u32 4294901760, %v25492_v3 }
 0x136   : > { %v3816_v31 = vadd.f32 %v3815_v36, %v3742_v19  ;;  %v3961_v58 = vpop.f32.mrf.mxu1  ;;  %23476 = vmatmul.mubr.f32.vlgmr.msra.gmra.mxu1 %v25371_v43  ;;  %23483 = vmatprep.subr.mxu1 %v24266_v0  ;;  %v25553_v19 = vsub.f32 %v12048_v61, %v25530_v5 }
 0x137   : > { %v3889_v27 = vpop.f32.mrf.mxu0  ;;  %23471 = vmatmul.mubr.f32.vlgmr.msra.gmra.mxu0 %v25371_v43  ;;  %23484 = vmatpush3.msra.mxu1 %v11263_v16  ;;  %v366_v43 = vld [vmem:[%s24996_s8 + $0x50] sm:$0xff]  ;;  %v11711_v44 = vsub.f32 %v25492_v3, %v11710_v45 }
 0x138   : > { %v3890_v29 = vadd.f32 %v3889_v27, %v3816_v31  ;;  %23479 = vmatpush3.msra.mxu0 %v25419_v24  ;;  %v22997_v39 = vpop.f32.mrf.mxu1  ;;  %23480 = vmatprep.mubr.msk.f32.mxu0 %vm24267_vm0, %v24266_v0  ;;  %v25525_v11 = vand.u32 4294901760, %v366_v43 }
 0x139   : > { %v22992_v34 = vpop.f32.mrf.mxu0  ;;  %23485 = vmatprep.mubr.msk.f32.mxu1 %vm24267_vm0, %v24266_v0  ;;  %23488 = vmatprep.subr.mxu0 %v24266_v0  ;;  %v11712_v18 = vand.u32 4294901760, %v11711_v44 }
 0x13a   : > { %v25507_v21 = vadd.f32 %v3961_v58, %v3890_v29  ;;  %v4116_v23 = vpop.f32.mrf.mxu1  ;;  %23486 = vmatmul.mubr.f32.vlgmr.msra.gmra.mxu1 %v25424_v25  ;;  %23493 = vmatprep.subr.mxu1 %v24266_v0  ;;  %v12118_v29 = vand.u32 4294901760, %v25553_v19  ;;  %v24217_v34 = vld [vmem:[%s24331_s30 + $0x58] sm:$0xff] }
 0x13b   : > { %v4040_v49 = vpop.f32.mrf.mxu0  ;;  %23481 = vmatmul.mubr.f32.vlgmr.msra.gmra.mxu0 %v11222_v55  ;;  %23494 = vmatpush3.msra.mxu1 %v25419_v24  ;;  %v12497_v39 = vsel %vm372_vm1, %v24217_v34, 0 }
 0x13c   : > { %v4117_v14 = vadd.f32 %v4116_v23, %v4040_v49  ;;  %23489 = vmatpush3.msra.mxu0 %v25439_v10  ;;  %v23007_v48 = vpop.f32.mrf.mxu1  ;;  %23490 = vmatprep.mubr.msk.f32.mxu0 %vm24267_vm0, %v24266_v0  ;;  %v12119_v44 = vsub.f32 %v25553_v19, %v12118_v29 }
 0x13d   : > { %v23002_v54 = vpop.f32.mrf.mxu0  ;;  %23495 = vmatprep.mubr.msk.f32.mxu1 %vm24267_vm0, %v24266_v0  ;;  %23498 = vmatprep.subr.mxu0 %v24266_v0 }
 0x13e   : > { %v4264_v8 = vpop.f32.mrf.mxu1  ;;  %23496 = vmatmul.mubr.f32.vlgmr.msra.gmra.mxu1 %v11220_v26  ;;  %23503 = vmatprep.subr.mxu1 %v24266_v0 }
 0x13f   : > { %v4190_v13 = vpop.f32.mrf.mxu0  ;;  %23491 = vmatmul.mubr.f32.vlgmr.msra.gmra.mxu0 %v25447_v41  ;;  %23504 = vmatpush3.msra.mxu1 %v25419_v24  ;;  %v25545_v41 = vsub.f32 %v366_v43, %v25525_v11  ;;  %v11671_v24 = vand.u32 4294901760, %v11670_v12 }
 0x140   : > { %v4191_v4 = vadd.f32 %v4190_v13, %v4117_v14  ;;  %23499 = vmatpush3.msra.mxu0 %v11261_v51  ;;  %v23017_v36 = vpop.f32.mrf.mxu1  ;;  %23500 = vmatprep.mubr.msk.f32.mxu0 %vm24267_vm0, %v24266_v0  ;;  %v25583_v14 = vand.u32 4294901760, %v12497_v39 }
 0x141   : > { %v23012_v32 = vpop.f32.mrf.mxu0  ;;  %23505 = vmatprep.mubr.msk.f32.mxu1 %vm24267_vm0, %v24266_v0  ;;  %23508 = vmatprep.subr.mxu0 %v24266_v0  ;;  %v12159_v31 = vand.u32 4294901760, %v25545_v41 }
 0x142   : > { %v4265_v26 = vadd.f32 %v4264_v8, %v4191_v4  ;;  %v4410_v51 = vpop.f32.mrf.mxu1  ;;  %23506 = vmatmul.mubr.f32.vlgmr.msra.gmra.mxu1 %v25424_v25  ;;  %23513 = vmatprep.subr.mxu1 %v24266_v0  ;;  %v25606_v32 = vsub.f32 %v12497_v39, %v25583_v14 }
 0x143   : > { %v4338_v10 = vpop.f32.mrf.mxu0  ;;  %23501 = vmatmul.mubr.f32.vlgmr.msra.gmra.mxu0 %v25424_v25  ;;  %23514 = vmatpush3.msra.mxu1 %v11712_v18  ;;  %v367_v25 = vld [vmem:[%s24996_s8 + $0x58] sm:$0xff]  ;;  %v12160_v20 = vsub.f32 %v25545_v41, %v12159_v31 }
 0x144   : > { %v4339_v33 = vadd.f32 %v4338_v10, %v4265_v26  ;;  %23509 = vmatpush3.msra.mxu0 %v25472_v6  ;;  %v23027_v16 = vpop.f32.mrf.mxu1  ;;  %23510 = vmatprep.mubr.msk.f32.mxu0 %vm24267_vm0, %v24266_v0  ;;  %v25578_v61 = vand.u32 4294901760, %v367_v25 }
 0x145   : > { %v23022_v47 = vpop.f32.mrf.mxu0  ;;  %23515 = vmatprep.mubr.msk.f32.mxu1 %vm24267_vm0, %v24266_v0  ;;  %23518 = vmatprep.subr.mxu0 %v24266_v0  ;;  %v12161_v4 = vand.u32 4294901760, %v12160_v20  ;;  %v24218_v16 = vld [vmem:[%s24331_s30 + $0x60] sm:$0xff] }
 0x146   : > { %v25560_v27 = vadd.f32 %v4410_v51, %v4339_v33  ;;  %v4565_v55 = vpop.f32.mrf.mxu1  ;;  %23516 = vmatmul.mubr.f32.vlgmr.msra.gmra.mxu1 %v25477_v60  ;;  %23523 = vmatprep.subr.mxu1 %v24266_v0  ;;  %v12567_v47 = vand.u32 4294901760, %v25606_v32 }
 0x147   : > { %v4489_v58 = vpop.f32.mrf.mxu0  ;;  %23511 = vmatmul.mubr.f32.vlgmr.msra.gmra.mxu0 %v11671_v24  ;;  %23524 = vmatpush3.msra.mxu1 %v25472_v6 }
 0x148   : > { %v4566_v43 = vadd.f32 %v4565_v55, %v4489_v58  ;;  %23519 = vmatpush3.msra.mxu0 %v25492_v3  ;;  %v23037_v23 = vpop.f32.mrf.mxu1  ;;  %23520 = vmatprep.mubr.msk.f32.mxu0 %vm24267_vm0, %v24266_v0 }
 0x149   : > { %v23032_v49 = vpop.f32.mrf.mxu0  ;;  %23525 = vmatprep.mubr.msk.f32.mxu1 %vm24267_vm0, %v24266_v0  ;;  %23528 = vmatprep.subr.mxu0 %v24266_v0 }
 0x14a   : > { %v4713_v48 = vpop.f32.mrf.mxu1  ;;  %23526 = vmatmul.mubr.f32.vlgmr.msra.gmra.mxu1 %v11669_v57  ;;  %23533 = vmatprep.subr.mxu1 %v24266_v0 }
 0x14b   : > { %v4639_v54 = vpop.f32.mrf.mxu0  ;;  %23521 = vmatmul.mubr.f32.vlgmr.msra.gmra.mxu0 %v25500_v53  ;;  %23534 = vmatpush3.msra.mxu1 %v25472_v6  ;;  %v25598_v53 = vsub.f32 %v367_v25, %v25578_v61  ;;  %v12120_v6 = vand.u32 4294901760, %v12119_v44  ;;  %v12946_v25 = vsel %vm372_vm1, %v24218_v16, 0 }
 0x14c   : > { %v4640_v13 = vadd.f32 %v4639_v54, %v4566_v43  ;;  %23529 = vmatpush3.msra.mxu0 %v11710_v45  ;;  %v23047_v12 = vpop.f32.mrf.mxu1  ;;  %23530 = vmatprep.mubr.msk.f32.mxu0 %vm24267_vm0, %v24266_v0  ;;  %v25636_v49 = vand.u32 4294901760, %v12946_v25  ;;  %v12568_v54 = vsub.f32 %v25606_v32, %v12567_v47 }
 0x14d   : > { %v23042_v8 = vpop.f32.mrf.mxu0  ;;  %23535 = vmatprep.mubr.msk.f32.mxu1 %vm24267_vm0, %v24266_v0  ;;  %23538 = vmatprep.subr.mxu0 %v24266_v0  ;;  %v12608_v10 = vand.u32 4294901760, %v25598_v53 }
 0x14e   : > { %v4714_v57 = vadd.f32 %v4713_v48, %v4640_v13  ;;  %v4859_v45 = vpop.f32.mrf.mxu1  ;;  %23536 = vmatmul.mubr.f32.vlgmr.msra.gmra.mxu1 %v25477_v60  ;;  %23543 = vmatprep.subr.mxu1 %v24266_v0  ;;  %v25659_v12 = vsub.f32 %v12946_v25, %v25636_v49 }
 0x14f   : > { %v4787_v3 = vpop.f32.mrf.mxu0  ;;  %23531 = vmatmul.mubr.f32.vlgmr.msra.gmra.mxu0 %v25477_v60  ;;  %23544 = vmatpush3.msra.mxu1 %v12161_v4  ;;  %v368_v60 = vld [vmem:[%s24996_s8 + $0x60] sm:$0xff]  ;;  %v12609_v39 = vsub.f32 %v25598_v53, %v12608_v10 }
 0x150   : > { %v4788_v36 = vadd.f32 %v4787_v3, %v4714_v57  ;;  %23539 = vmatpush3.msra.mxu0 %v25525_v11  ;;  %v23057_v26 = vpop.f32.mrf.mxu1  ;;  %23540 = vmatprep.mubr.msk.f32.mxu0 %vm24267_vm0, %v24266_v0  ;;  %v25631_v43 = vand.u32 4294901760, %v368_v60 }
 0x151   : > { %v23052_v18 = vpop.f32.mrf.mxu0  ;;  %23545 = vmatprep.mubr.msk.f32.mxu1 %vm24267_vm0, %v24266_v0  ;;  %23548 = vmatprep.subr.mxu0 %v24266_v0  ;;  %v12610_v8 = vand.u32 4294901760, %v12609_v39  ;;  %v13016_v26 = vand.u32 4294901760, %v25659_v12 }
 0x152   : > { %v25613_v51 = vadd.f32 %v4859_v45, %v4788_v36  ;;  %v5014_v33 = vpop.f32.mrf.mxu1  ;;  %23546 = vmatmul.mubr.f32.vlgmr.msra.gmra.mxu1 %v25530_v5  ;;  %23553 = vmatprep.subr.mxu1 %v24266_v0 }
 0x153   : > { %v4938_v24 = vpop.f32.mrf.mxu0  ;;  %23541 = vmatmul.mubr.f32.vlgmr.msra.gmra.mxu0 %v12120_v6  ;;  %23554 = vmatpush3.msra.mxu1 %v25525_v11 }
 0x154   : > { %v5015_v58 = vadd.f32 %v5014_v33, %v4938_v24  ;;  %23549 = vmatpush3.msra.mxu0 %v25545_v41  ;;  %v23067_v34 = vpop.f32.mrf.mxu1  ;;  %23550 = vmatprep.mubr.msk.f32.mxu0 %vm24267_vm0, %v24266_v0 }
 0x155   : > { %v23062_v55 = vpop.f32.mrf.mxu0  ;;  %23555 = vmatprep.mubr.msk.f32.mxu1 %vm24267_vm0, %v24266_v0  ;;  %23558 = vmatprep.subr.mxu0 %v24266_v0 }
 0x156   : > { %v5162_v20 = vpop.f32.mrf.mxu1  ;;  %23556 = vmatmul.mubr.f32.vlgmr.msra.gmra.mxu1 %v12118_v29  ;;  %23563 = vmatprep.subr.mxu1 %v24266_v0 }
 0x157   : > { %v5088_v23 = vpop.f32.mrf.mxu0  ;;  %23551 = vmatmul.mubr.f32.vlgmr.msra.gmra.mxu0 %v25553_v19  ;;  %23564 = vmatpush3.msra.mxu1 %v25525_v11  ;;  %v25651_v19 = vsub.f32 %v368_v60, %v25631_v43  ;;  %v12569_v11 = vand.u32 4294901760, %v12568_v54  ;;  %v24219_v60 = vld [vmem:[%s24331_s30 + $0x68] sm:$0xff] }
 0x158   : > { %v5089_v48 = vadd.f32 %v5088_v23, %v5015_v58  ;;  %23559 = vmatpush3.msra.mxu0 %v12159_v31  ;;  %v23077_v13 = vpop.f32.mrf.mxu1  ;;  %23560 = vmatprep.mubr.msk.f32.mxu0 %vm24267_vm0, %v24266_v0  ;;  %v13395_v24 = vsel %vm372_vm1, %v24219_v60, 0 }
 0x159   : > { %v23072_v44 = vpop.f32.mrf.mxu0  ;;  %23565 = vmatprep.mubr.msk.f32.mxu1 %vm24267_vm0, %v24266_v0  ;;  %23568 = vmatprep.subr.mxu0 %v24266_v0  ;;  %v13057_v45 = vand.u32 4294901760, %v25651_v19  ;;  %v25689_v34 = vand.u32 4294901760, %v13395_v24 }
 0x15a   : > { %v5163_v29 = vadd.f32 %v5162_v20, %v5089_v48  ;;  %v5308_v31 = vpop.f32.mrf.mxu1  ;;  %23566 = vmatmul.mubr.f32.vlgmr.msra.gmra.mxu1 %v25530_v5  ;;  %23573 = vmatprep.subr.mxu1 %v24266_v0  ;;  %v13017_v20 = vsub.f32 %v25659_v12, %v13016_v26 }
 0x15b   : > { %v5236_v41 = vpop.f32.mrf.mxu0  ;;  %23561 = vmatmul.mubr.f32.vlgmr.msra.gmra.mxu0 %v25530_v5  ;;  %23574 = vmatpush3.msra.mxu1 %v12610_v8  ;;  %v369_v5 = vld [vmem:[%s24996_s8 + $0x68] sm:$0xff]  ;;  %v13058_v58 = vsub.f32 %v25651_v19, %v13057_v45  ;;  %v25712_v8 = vsub.f32 %v13395_v24, %v25689_v34 }
 0x15c   : > { %v5237_v4 = vadd.f32 %v5236_v41, %v5163_v29  ;;  %23569 = vmatpush3.msra.mxu0 %v25578_v61  ;;  %v23087_v3 = vpop.f32.mrf.mxu1  ;;  %23570 = vmatprep.mubr.msk.f32.mxu0 %vm24267_vm0, %v24266_v0  ;;  %v25684_v55 = vand.u32 4294901760, %v369_v5 }
 0x15d   : > { %v23082_v57 = vpop.f32.mrf.mxu0  ;;  %23575 = vmatprep.mubr.msk.f32.mxu1 %vm24267_vm0, %v24266_v0  ;;  %23578 = vmatprep.subr.mxu0 %v24266_v0  ;;  %v13059_v13 = vand.u32 4294901760, %v13058_v58 }
 0x15e   : > { %v25666_v6 = vadd.f32 %v5308_v31, %v5237_v4  ;;  %v5463_v18 = vpop.f32.mrf.mxu1  ;;  %23576 = vmatmul.mubr.f32.vlgmr.msra.gmra.mxu1 %v25583_v14  ;;  %23583 = vmatprep.subr.mxu1 %v24266_v0 }
 0x15f   : > { %v5387_v36 = vpop.f32.mrf.mxu0  ;;  %23571 = vmatmul.mubr.f32.vlgmr.msra.gmra.mxu0 %v12569_v11  ;;  %23584 = vmatpush3.msra.mxu1 %v25578_v61 }
 0x160   : > { %v5464_v33 = vadd.f32 %v5463_v18, %v5387_v36  ;;  %23579 = vmatpush3.msra.mxu0 %v25598_v53  ;;  %v23097_v25 = vpop.f32.mrf.mxu1  ;;  %23580 = vmatprep.mubr.msk.f32.mxu0 %vm24267_vm0, %v24266_v0  ;;  %v24220_v36 = vld [vmem:[%s24331_s30 + $0x70] sm:$0xff] }
 0x161   : > { %v23092_v16 = vpop.f32.mrf.mxu0  ;;  %23585 = vmatprep.mubr.msk.f32.mxu1 %vm24267_vm0, %v24266_v0  ;;  %23588 = vmatprep.subr.mxu0 %v24266_v0  ;;  %v13844_v18 = vsel %vm372_vm1, %v24220_v36, 0 }
 0x162   : > { %v5611_v23 = vpop.f32.mrf.mxu1  ;;  %23586 = vmatmul.mubr.f32.vlgmr.msra.gmra.mxu1 %v12567_v47  ;;  %23593 = vmatprep.subr.mxu1 %v24266_v0  ;;  %v25742_v58 = vand.u32 4294901760, %v13844_v18 }
 0x163   : > { %v5537_v39 = vpop.f32.mrf.mxu0  ;;  %23581 = vmatmul.mubr.f32.vlgmr.msra.gmra.mxu0 %v25606_v32  ;;  %23594 = vmatpush3.msra.mxu1 %v25578_v61  ;;  %v25704_v32 = vsub.f32 %v369_v5, %v25684_v55  ;;  %v13018_v61 = vand.u32 4294901760, %v13017_v20  ;;  %v13465_v5 = vand.u32 4294901760, %v25712_v8 }
 0x164   : > { %v5538_v54 = vadd.f32 %v5537_v39, %v5464_v33  ;;  %23589 = vmatpush3.msra.mxu0 %v12608_v10  ;;  %v23107_v44 = vpop.f32.mrf.mxu1  ;;  %23590 = vmatprep.mubr.msk.f32.mxu0 %vm24267_vm0, %v24266_v0 }
 0x165   : > { %v23102_v48 = vpop.f32.mrf.mxu0  ;;  %23595 = vmatprep.mubr.msk.f32.mxu1 %vm24267_vm0, %v24266_v0  ;;  %23598 = vmatprep.subr.mxu0 %v24266_v0  ;;  %v13506_v11 = vand.u32 4294901760, %v25704_v32  ;;  %v13466_v20 = vsub.f32 %v25712_v8, %v13465_v5 }
 0x166   : > { %v5612_v47 = vadd.f32 %v5611_v23, %v5538_v54  ;;  %v5757_v10 = vpop.f32.mrf.mxu1  ;;  %23596 = vmatmul.mubr.f32.vlgmr.msra.gmra.mxu1 %v25583_v14  ;;  %23603 = vmatprep.subr.mxu1 %v24266_v0 }
 0x167   : > { %v5685_v53 = vpop.f32.mrf.mxu0  ;;  %23591 = vmatmul.mubr.f32.vlgmr.msra.gmra.mxu0 %v25583_v14  ;;  %23604 = vmatpush3.msra.mxu1 %v13059_v13  ;;  %v370_v14 = vld [vmem:[%s24996_s8 + $0x70] sm:$0xff]  ;;  %v13507_v16 = vsub.f32 %v25704_v32, %v13506_v11 }
 0x168   : > { %v5686_v29 = vadd.f32 %v5685_v53, %v5612_v47  ;;  %23599 = vmatpush3.msra.mxu0 %v25631_v43  ;;  %v23117_v31 = vpop.f32.mrf.mxu1  ;;  %23600 = vmatprep.mubr.msk.f32.mxu0 %vm24267_vm0, %v24266_v0  ;;  %v25737_v25 = vand.u32 4294901760, %v370_v14  ;;  %v25765_v47 = vsub.f32 %v13844_v18, %v25742_v58 }
 0x169   : > { %v23112_v41 = vpop.f32.mrf.mxu0  ;;  %23605 = vmatprep.mubr.msk.f32.mxu1 %vm24267_vm0, %v24266_v0  ;;  %23608 = vmatprep.subr.mxu0 %v24266_v0  ;;  %v13508_v13 = vand.u32 4294901760, %v13507_v16 }
 0x16a   : > { %v25719_v4 = vadd.f32 %v5757_v10, %v5686_v29  ;;  %v5912_v3 = vpop.f32.mrf.mxu1  ;;  %23606 = vmatmul.mubr.f32.vlgmr.msra.gmra.mxu1 %v25636_v49  ;;  %23613 = vmatprep.subr.mxu1 %v24266_v0 }
 0x16b   : > { %v5836_v57 = vpop.f32.mrf.mxu0  ;;  %23601 = vmatmul.mubr.f32.vlgmr.msra.gmra.mxu0 %v13018_v61  ;;  %23614 = vmatpush3.msra.mxu1 %v25631_v43 }
 0x16c   : > { %v5913_v60 = vadd.f32 %v5912_v3, %v5836_v57  ;;  %23609 = vmatpush3.msra.mxu0 %v25651_v19  ;;  %v23127_v33 = vpop.f32.mrf.mxu1  ;;  %23610 = vmatprep.mubr.msk.f32.mxu0 %vm24267_vm0, %v24266_v0  ;;  %v13914_v57 = vand.u32 4294901760, %v25765_v47  ;;  %v24221_v3 = vld [vmem:[%s24331_s30 + $0x78] sm:$0xff] }
 0x16d   : > { %v23122_v24 = vpop.f32.mrf.mxu0  ;;  %23615 = vmatprep.mubr.msk.f32.mxu1 %vm24267_vm0, %v24266_v0  ;;  %23618 = vmatprep.subr.mxu0 %v24266_v0  ;;  %v14293_v36 = vsel %vm372_vm1, %v24221_v3, 0 }
 0x16e   : > { %v6060_v23 = vpop.f32.mrf.mxu1  ;;  %23616 = vmatmul.mubr.f32.vlgmr.msra.gmra.mxu1 %v13016_v26  ;;  %23623 = vmatprep.subr.mxu1 %v24266_v0 }
 0x16f   : > { %v5986_v39 = vpop.f32.mrf.mxu0  ;;  %23611 = vmatmul.mubr.f32.vlgmr.msra.gmra.mxu0 %v25659_v12  ;;  %23624 = vmatpush3.msra.mxu1 %v25631_v43  ;;  %v25757_v12 = vsub.f32 %v370_v14, %v25737_v25  ;;  %v13467_v43 = vand.u32 4294901760, %v13466_v20 }
 0x170   : > { %v5987_v54 = vadd.f32 %v5986_v39, %v5913_v60  ;;  %23619 = vmatpush3.msra.mxu0 %v13057_v45  ;;  %v23137_v44 = vpop.f32.mrf.mxu1  ;;  %23620 = vmatprep.mubr.msk.f32.mxu0 %vm24267_vm0, %v24266_v0  ;;  %v25795_v39 = vand.u32 4294901760, %v14293_v36 }
 0x171   : > { %v23132_v48 = vpop.f32.mrf.mxu0  ;;  %23625 = vmatprep.mubr.msk.f32.mxu1 %vm24267_vm0, %v24266_v0  ;;  %23628 = vmatprep.subr.mxu0 %v24266_v0  ;;  %v13955_v29 = vand.u32 4294901760, %v25757_v12 }
 0x172   : > { %v6061_v26 = vadd.f32 %v6060_v23, %v5987_v54  ;;  %v6206_v45 = vpop.f32.mrf.mxu1  ;;  %23626 = vmatmul.mubr.f32.vlgmr.msra.gmra.mxu1 %v25636_v49  ;;  %23633 = vmatprep.subr.mxu1 %v24266_v0  ;;  %v13915_v54 = vsub.f32 %v25765_v47, %v13914_v57 }
 0x173   : > { %v6134_v19 = vpop.f32.mrf.mxu0  ;;  %23621 = vmatmul.mubr.f32.vlgmr.msra.gmra.mxu0 %v25636_v49  ;;  %23634 = vmatpush3.msra.mxu1 %v13508_v13  ;;  %v371_v49 = vld [vmem:[%s24996_s8 + $0x78] sm:$0xff]  ;;  %v13956_v33 = vsub.f32 %v25757_v12, %v13955_v29 }
 0x174   : > { %v6135_v53 = vadd.f32 %v6134_v19, %v6061_v26  ;;  %23629 = vmatpush3.msra.mxu0 %v25684_v55  ;;  %v23147_v61 = vpop.f32.mrf.mxu1  ;;  %23630 = vmatprep.mubr.msk.f32.mxu0 %vm24267_vm0, %v24266_v0  ;;  %v25790_v16 = vand.u32 4294901760, %v371_v49  ;;  %v25818_v19 = vsub.f32 %v14293_v36, %v25795_v39 }
 0x175   : > { %v23142_v10 = vpop.f32.mrf.mxu0  ;;  %23635 = vmatprep.mubr.msk.f32.mxu1 %vm24267_vm0, %v24266_v0  ;;  %23638 = vmatprep.subr.mxu0 %v24266_v0  ;;  %v13957_v26 = vand.u32 4294901760, %v13956_v33  ;;  %v24222_v61 = vld [vmem:[%s24318_s24] sm:$0xff] }
 0x176   : > { %v25772_v41 = vadd.f32 %v6206_v45, %v6135_v53  ;;  %v6361_v14 = vpop.f32.mrf.mxu1  ;;  %23636 = vmatmul.mubr.f32.vlgmr.msra.gmra.mxu1 %v25689_v34  ;;  %23643 = vmatprep.subr.mxu1 %v24266_v0  ;;  %v14363_v36 = vand.u32 4294901760, %v25818_v19 }
 0x177   : > { %v6285_v31 = vpop.f32.mrf.mxu0  ;;  %23631 = vmatmul.mubr.f32.vlgmr.msra.gmra.mxu0 %v13467_v43  ;;  %23644 = vmatpush3.msra.mxu1 %v25684_v55 }
 0x178   : > { %v6362_v18 = vadd.f32 %v6361_v14, %v6285_v31  ;;  %23639 = vmatpush3.msra.mxu0 %v25704_v32  ;;  %v23157_v24 = vpop.f32.mrf.mxu1  ;;  %23640 = vmatprep.mubr.msk.f32.mxu0 %vm24267_vm0, %v24266_v0 }
 0x179   : > { %v23152_v60 = vpop.f32.mrf.mxu0  ;;  %23645 = vmatprep.mubr.msk.f32.mxu1 %vm24267_vm0, %v24266_v0  ;;  %23648 = vmatprep.subr.mxu0 %v24266_v0 }
 0x17a   : > { %v6509_v20 = vpop.f32.mrf.mxu1  ;;  %23646 = vmatmul.mubr.f32.vlgmr.msra.gmra.mxu1 %v13465_v5  ;;  %23653 = vmatprep.subr.mxu1 %v24266_v0 }
 0x17b   : > { %v6435_v23 = vpop.f32.mrf.mxu0  ;;  %23641 = vmatmul.mubr.f32.vlgmr.msra.gmra.mxu0 %v25712_v8  ;;  %23654 = vmatpush3.msra.mxu1 %v25684_v55  ;;  %v25810_v8 = vsub.f32 %v371_v49, %v25790_v16  ;;  %v13916_v55 = vand.u32 4294901760, %v13915_v54  ;;  %v24223_v49 = vld [vmem:[%s24996_s8] sm:$0xff] }
 0x17c   : > { %v6436_v48 = vadd.f32 %v6435_v23, %v6362_v18  ;;  %23649 = vmatpush3.msra.mxu0 %v13506_v11  ;;  %v23167_v13 = vpop.f32.mrf.mxu1  ;;  %23650 = vmatprep.mubr.msk.f32.mxu0 %vm24267_vm0, %v24266_v0  ;;  %v14774_v18 = vsel %vm372_vm1, %v24338_v9, 0 }
 0x17d   : > { %v23162_v44 = vpop.f32.mrf.mxu0  ;;  %23655 = vmatprep.mubr.msk.f32.mxu1 %vm24267_vm0, %v24266_v0  ;;  %23658 = vmatprep.subr.mxu0 %v24266_v0  ;;  %v14404_v10 = vand.u32 4294901760, %v25810_v8  ;;  %v25849_v9 = vand.u32 4294901760, %v14774_v18 }
 0x17e   : > { %v6510_v5 = vadd.f32 %v6509_v20, %v6436_v48  ;;  %v6655_v11 = vpop.f32.mrf.mxu1  ;;  %23656 = vmatmul.mubr.f32.vlgmr.msra.gmra.mxu1 %v25689_v34  ;;  %23663 = vmatprep.subr.mxu1 %v24266_v0  ;;  %v14364_v44 = vsub.f32 %v25818_v19, %v14363_v36 }
 0x17f   : > { %v6583_v32 = vpop.f32.mrf.mxu0  ;;  %23651 = vmatmul.mubr.f32.vlgmr.msra.gmra.mxu0 %v25689_v34  ;;  %23664 = vmatpush3.msra.mxu1 %v13957_v26  ;;  %v14757_v34 = vadd.f32 %v24223_v49, %v24222_v61  ;;  %v14405_v23 = vsub.f32 %v25810_v8, %v14404_v10 }
 0x180   : > { %v6584_v45 = vadd.f32 %v6583_v32, %v6510_v5  ;;  %23659 = vmatpush3.msra.mxu0 %v25737_v25  ;;  %v23177_v53 = vpop.f32.mrf.mxu1  ;;  %23660 = vmatprep.mubr.msk.f32.mxu0 %vm24267_vm0, %v24266_v0 }
 0x181   : > { %v23172_v43 = vpop.f32.mrf.mxu0  ;;  %23665 = vmatprep.mubr.msk.f32.mxu1 %vm24267_vm0, %v24266_v0  ;;  %23668 = vmatprep.subr.mxu0 %v24266_v0  ;;  %v25844_v20 = vand.u32 4294901760, %v14757_v34 }
 0x182   : > { %v25827_v31 = vadd.f32 %v6655_v11, %v6584_v45  ;;  %v6810_v3 = vpop.f32.mrf.mxu1  ;;  %23666 = vmatmul.mubr.f32.vlgmr.msra.gmra.mxu1 %v25742_v58  ;;  %23673 = vmatprep.subr.mxu1 %v24266_v0  ;;  %v24225_v45 = vld [vmem:[%s24331_s30 + $0x8] sm:$0xff] }
 0x183   : > { %v6734_v14 = vpop.f32.mrf.mxu0  ;;  %23661 = vmatmul.mubr.f32.vlgmr.msra.gmra.mxu0 %v13916_v55  ;;  %23674 = vmatpush3.msra.mxu1 %v25737_v25  ;;  %v24224_v55 = vld [vmem:[%s24324_s27 + $0x8] sm:$0xff] }
 0x184   : > { %v6811_v60 = vadd.f32 %v6810_v3, %v6734_v14  ;;  %23669 = vmatpush3.msra.mxu0 %v25757_v12  ;;  %v23187_v33 = vpop.f32.mrf.mxu1  ;;  %23670 = vmatprep.mubr.msk.f32.mxu0 %vm24267_vm0, %v24266_v0  ;;  %v25870_v12 = vsub.f32 %v14774_v18, %v25849_v9  ;;  %v14742_v43 = vadd.f32 %v24225_v45, %v24224_v55  ;;  %v24226_v14 = vld [vmem:[%s24318_s24 + $0x8] sm:$0xff] }
 0x185   : > { %v23182_v24 = vpop.f32.mrf.mxu0  ;;  %23675 = vmatprep.mubr.msk.f32.mxu1 %vm24267_vm0, %v24266_v0  ;;  %23678 = vmatprep.subr.mxu0 %v24266_v0  ;;  %v24227_v3 = vld [vmem:[%s24996_s8 + $0x8] sm:$0xff] }
 0x186   : > { %v6958_v48 = vpop.f32.mrf.mxu1  ;;  %23676 = vmatmul.mubr.f32.vlgmr.msra.gmra.mxu1 %v13914_v57  ;;  %23683 = vmatprep.subr.mxu1 %v24266_v0  ;;  %v25864_v57 = vsub.f32 %v14757_v34, %v25844_v20  ;;  %v14844_v33 = vand.u32 4294901760, %v25870_v12 }
 0x187   : > { %v6884_v54 = vpop.f32.mrf.mxu0  ;;  %23671 = vmatmul.mubr.f32.vlgmr.msra.gmra.mxu0 %v25765_v47  ;;  %23684 = vmatpush3.msra.mxu1 %v25737_v25  ;;  %v14406_v47 = vand.u32 4294901760, %v14405_v23  ;;  %v14365_v25 = vand.u32 4294901760, %v14364_v44  ;;  %v15223_v23 = vsel %vm372_vm1, %v14742_v43, 0 }
 0x188   : > { %v6885_v13 = vadd.f32 %v6884_v54, %v6811_v60  ;;  %23679 = vmatpush3.msra.mxu0 %v13955_v29  ;;  %v23197_v5 = vpop.f32.mrf.mxu1  ;;  %23680 = vmatprep.mubr.msk.f32.mxu0 %vm24267_vm0, %v24266_v0  ;;  %v14885_v34 = vand.u32 4294901760, %v25864_v57 }
 0x189   : > { %v23192_v26 = vpop.f32.mrf.mxu0  ;;  %23685 = vmatprep.mubr.msk.f32.mxu1 %vm24267_vm0, %v24266_v0  ;;  %23688 = vmatprep.subr.mxu0 %v24266_v0  ;;  %v25904_v5 = vand.u32 4294901760, %v15223_v23 }
 0x18a   : > { %v6959_v32 = vadd.f32 %v6958_v48, %v6885_v13  ;;  %v7104_v11 = vpop.f32.mrf.mxu1  ;;  %23686 = vmatmul.mubr.f32.vlgmr.msra.gmra.mxu1 %v25742_v58  ;;  %23693 = vmatprep.subr.mxu1 %v24266_v0  ;;  %v14886_v13 = vsub.f32 %v25864_v57, %v14885_v34 }
 0x18b   : > { %v7032_v29 = vpop.f32.mrf.mxu0  ;;  %23681 = vmatmul.mubr.f32.vlgmr.msra.gmra.mxu0 %v25742_v58  ;;  %23694 = vmatpush3.msra.mxu1 %v14406_v47  ;;  %v14758_v58 = vadd.f32 %v24227_v3, %v24226_v14  ;;  %v25927_v43 = vsub.f32 %v15223_v23, %v25904_v5 }
 0x18c   : > { %v7033_v53 = vadd.f32 %v7032_v29, %v6959_v32  ;;  %23689 = vmatpush3.msra.mxu0 %v25790_v16  ;;  %v23207_v49 = vpop.f32.mrf.mxu1  ;;  %23690 = vmatprep.mubr.msk.f32.mxu0 %vm24267_vm0, %v24266_v0  ;;  %v14845_v29 = vsub.f32 %v25870_v12, %v14844_v33 }
 0x18d   : > { %v23202_v61 = vpop.f32.mrf.mxu0  ;;  %23695 = vmatprep.mubr.msk.f32.mxu1 %vm24267_vm0, %v24266_v0  ;;  %23698 = vmatprep.subr.mxu0 %v24266_v0  ;;  %v25899_v26 = vand.u32 4294901760, %v14758_v58 }
 0x18e   : > { %v25883_v18 = vadd.f32 %v7104_v11, %v7033_v53  ;;  %v7259_v24 = vpop.f32.mrf.mxu1  ;;  %23696 = vmatmul.mubr.f32.vlgmr.msra.gmra.mxu1 %v25795_v39  ;;  %23703 = vmatprep.subr.mxu1 %v24266_v0  ;;  %v24228_v53 = vld [vmem:[%s24324_s27 + $0x10] sm:$0xff] }
 0x18f   : > { %v7183_v60 = vpop.f32.mrf.mxu0  ;;  %23691 = vmatmul.mubr.f32.vlgmr.msra.gmra.mxu0 %v14365_v25  ;;  %23704 = vmatpush3.msra.mxu1 %v25790_v16  ;;  %v24229_v61 = vld [vmem:[%s24331_s30 + $0x10] sm:$0xff] }
 0x190   : > { %v7260_v54 = vadd.f32 %v7259_v24, %v7183_v60  ;;  %23699 = vmatpush3.msra.mxu0 %v25810_v8  ;;  %v23217_v44 = vpop.f32.mrf.mxu1  ;;  %23700 = vmatprep.mubr.msk.f32.mxu0 %vm24267_vm0, %v24266_v0  ;;  %v14743_v49 = vadd.f32 %v24229_v61, %v24228_v53  ;;  %v24230_v60 = vld [vmem:[%s24318_s24 + $0x10] sm:$0xff] }
 0x191   : > { %v23212_v48 = vpop.f32.mrf.mxu0  ;;  %23705 = vmatprep.mubr.msk.f32.mxu1 %vm24267_vm0, %v24266_v0  ;;  %23708 = vmatprep.subr.mxu0 %v24266_v0  ;;  %v24231_v24 = vld [vmem:[%s24996_s8 + $0x10] sm:$0xff] }
 0x192   : > { %v7407_v32 = vpop.f32.mrf.mxu1  ;;  %23706 = vmatmul.mubr.f32.vlgmr.msra.gmra.mxu1 %v14363_v36  ;;  %23713 = vmatprep.subr.mxu1 %v24266_v0  ;;  %v25919_v36 = vsub.f32 %v14758_v58, %v25899_v26  ;;  %v14759_v23 = vadd.f32 %v24231_v24, %v24230_v60 }
 0x193   : > { %v7333_v47 = vpop.f32.mrf.mxu0  ;;  %23701 = vmatmul.mubr.f32.vlgmr.msra.gmra.mxu0 %v25818_v19  ;;  %23714 = vmatpush3.msra.mxu1 %v25790_v16  ;;  %v14887_v19 = vand.u32 4294901760, %v14886_v13  ;;  %v14846_v16 = vand.u32 4294901760, %v14845_v29  ;;  %v15293_v13 = vand.u32 4294901760, %v25927_v43 }
 0x194   : > { %v7334_v11 = vadd.f32 %v7333_v47, %v7260_v54  ;;  %23709 = vmatpush3.msra.mxu0 %v14404_v10  ;;  %v23227_v55 = vpop.f32.mrf.mxu1  ;;  %23710 = vmatprep.mubr.msk.f32.mxu0 %vm24267_vm0, %v24266_v0  ;;  %v15672_v47 = vsel %vm372_vm1, %v14743_v49, 0 }
 0x195   : > { %v23222_v25 = vpop.f32.mrf.mxu0  ;;  %23715 = vmatprep.mubr.msk.f32.mxu1 %vm24267_vm0, %v24266_v0  ;;  %23718 = vmatprep.subr.mxu0 %v24266_v0 }
 0x196   : > { %v7408_v45 = vadd.f32 %v7407_v32, %v7334_v11  ;;  %v7553_v10 = vpop.f32.mrf.mxu1  ;;  %23716 = vmatmul.mubr.f32.vlgmr.msra.gmra.mxu1 %v25795_v39  ;;  %23723 = vmatprep.subr.mxu1 %v24266_v0  ;;  %v25954_v25 = vand.u32 4294901760, %v14759_v23 }
 0x197   : > { %v7481_v8 = vpop.f32.mrf.mxu0  ;;  %23711 = vmatmul.mubr.f32.vlgmr.msra.gmra.mxu0 %v25795_v39  ;;  %23724 = vmatpush3.msra.mxu1 %v14887_v19  ;;  %v15334_v39 = vand.u32 4294901760, %v25919_v36  ;;  %v25959_v19 = vand.u32 4294901760, %v15672_v47 }
 0x198   : > { %v7482_v14 = vadd.f32 %v7481_v8, %v7408_v45  ;;  %23719 = vmatpush3.msra.mxu0 %v25844_v20  ;;  %v23237_v58 = vpop.f32.mrf.mxu1  ;;  %23720 = vmatprep.mubr.msk.f32.mxu0 %vm24267_vm0, %v24266_v0 }
 0x199   : > { %v23232_v3 = vpop.f32.mrf.mxu0  ;;  %23725 = vmatprep.mubr.msk.f32.mxu1 %vm24267_vm0, %v24266_v0  ;;  %23728 = vmatprep.subr.mxu0 %v24266_v0  ;;  %v15335_v11 = vsub.f32 %v25919_v36, %v15334_v39 }
 0x19a   : > { %v25938_v54 = vadd.f32 %v7553_v10, %v7482_v14  ;;  %v7708_v44 = vpop.f32.mrf.mxu1  ;;  %23726 = vmatmul.mubr.f32.vlgmr.msra.gmra.mxu1 %v25849_v9  ;;  %23733 = vmatprep.subr.mxu1 %v24266_v0  ;;  %v15294_v10 = vsub.f32 %v25927_v43, %v15293_v13  ;;  %v25982_v14 = vsub.f32 %v15672_v47, %v25959_v19 }
 0x19b   : > { %v7632_v48 = vpop.f32.mrf.mxu0  ;;  %23721 = vmatmul.mubr.f32.vlgmr.msra.gmra.mxu0 %v14846_v16  ;;  %23734 = vmatpush3.msra.mxu1 %v25844_v20  ;;  %v15336_v49 = vand.u32 4294901760, %v15335_v11  ;;  %v16121_v11 = vsel %vm372_vm1, %v24357_v28, 0 }
 0x19c   : > { %23729 = vmatpush3.msra.mxu0 %v25864_v57  ;;  %v23247_v29 = vpop.f32.mrf.mxu1  ;;  %23730 = vmatprep.mubr.msk.f32.mxu0 %vm24267_vm0, %v24266_v0  ;;  %v7709_v55 = vadd.f32 %v7708_v44, %v7632_v48 }
 0x19d   : > { %v23242_v32 = vpop.f32.mrf.mxu0  ;;  %23735 = vmatprep.mubr.msk.f32.mxu1 %vm24267_vm0, %v24266_v0  ;;  %23738 = vmatprep.subr.mxu0 %v24266_v0  ;;  %v15742_v29 = vand.u32 4294901760, %v25982_v14 }
 0x19e   : > { %v7856_v8 = vpop.f32.mrf.mxu1  ;;  %23736 = vmatmul.mubr.f32.vlgmr.msra.gmra.mxu1 %v14844_v33  ;;  %23743 = vmatprep.subr.mxu1 %v24266_v0 }
 0x19f   : > { %v7782_v45 = vpop.f32.mrf.mxu0  ;;  %23731 = vmatmul.mubr.f32.vlgmr.msra.gmra.mxu0 %v25870_v12  ;;  %23744 = vmatpush3.msra.mxu1 %v25844_v20  ;;  %v25974_v12 = vsub.f32 %v14759_v23, %v25954_v25  ;;  %v15295_v20 = vand.u32 4294901760, %v15294_v10  ;;  %v24232_v23 = vld [vmem:[%s24318_s24 + $0x18] sm:$0xff] }
 0x1a0   : > { %v7783_v16 = vadd.f32 %v7782_v45, %v7709_v55  ;;  %23739 = vmatpush3.msra.mxu0 %v14885_v34  ;;  %v23257_v61 = vpop.f32.mrf.mxu1  ;;  %23740 = vmatprep.mubr.msk.f32.mxu0 %vm24267_vm0, %v24266_v0 }
 0x1a1   : > { %v23252_v53 = vpop.f32.mrf.mxu0  ;;  %23745 = vmatprep.mubr.msk.f32.mxu1 %vm24267_vm0, %v24266_v0  ;;  %23748 = vmatprep.subr.mxu0 %v24266_v0  ;;  %v15783_v24 = vand.u32 4294901760, %v25974_v12 }
 0x1a2   : > { %v7857_v33 = vadd.f32 %v7856_v8, %v7783_v16  ;;  %v8002_v34 = vpop.f32.mrf.mxu1  ;;  %23746 = vmatmul.mubr.f32.vlgmr.msra.gmra.mxu1 %v25849_v9  ;;  %23753 = vmatprep.subr.mxu1 %v24266_v0  ;;  %v26023_v53 = vand.u32 4294901760, %v16121_v11 }
 0x1a3   : > { %v7930_v57 = vpop.f32.mrf.mxu0  ;;  %23741 = vmatmul.mubr.f32.vlgmr.msra.gmra.mxu0 %v25849_v9  ;;  %23754 = vmatpush3.msra.mxu1 %v15336_v49  ;;  %v24233_v9 = vld [vmem:[%s24996_s8 + $0x18] sm:$0xff]  ;;  %v15784_v10 = vsub.f32 %v25974_v12, %v15783_v24 }
 0x1a4   : > { %v7931_v3 = vadd.f32 %v7930_v57, %v7857_v33  ;;  %23749 = vmatpush3.msra.mxu0 %v25899_v26  ;;  %v23267_v60 = vpop.f32.mrf.mxu1  ;;  %23750 = vmatprep.mubr.msk.f32.mxu0 %vm24267_vm0, %v24266_v0  ;;  %v14760_v48 = vadd.f32 %v24233_v9, %v24232_v23  ;;  %v15743_v33 = vsub.f32 %v25982_v14, %v15742_v29 }
 0x1a5   : > { %v23262_v58 = vpop.f32.mrf.mxu0  ;;  %23755 = vmatprep.mubr.msk.f32.mxu1 %vm24267_vm0, %v24266_v0  ;;  %23758 = vmatprep.subr.mxu0 %v24266_v0 }
 0x1a6   : > { %v25991_v44 = vadd.f32 %v8002_v34, %v7931_v3  ;;  %v8157_v32 = vpop.f32.mrf.mxu1  ;;  %23756 = vmatmul.mubr.f32.vlgmr.msra.gmra.mxu1 %v25904_v5  ;;  %23763 = vmatprep.subr.mxu1 %v24266_v0  ;;  %v26016_v16 = vand.u32 4294901760, %v14760_v48  ;;  %v15785_v3 = vand.u32 4294901760, %v15784_v10  ;;  %v26046_v58 = vsub.f32 %v16121_v11, %v26023_v53 }
 0x1a7   : > { %v8081_v47 = vpop.f32.mrf.mxu0  ;;  %23751 = vmatmul.mubr.f32.vlgmr.msra.gmra.mxu0 %v15295_v20  ;;  %23764 = vmatpush3.msra.mxu1 %v25899_v26  ;;  %v16570_v10 = vsel %vm372_vm1, %v24377_v35, 0 }
 0x1a8   : > { %v21957_v55 = vsub.f32 %v25136_v37, %v25991_v44  ;;  %23759 = vmatpush3.msra.mxu0 %v25919_v36  ;;  %v23277_v8 = vpop.f32.mrf.mxu1  ;;  %23760 = vmatprep.mubr.msk.f32.mxu0 %vm24267_vm0, %v24266_v0  ;;  %v8158_v28 = vadd.f32 %v8157_v32, %v8081_v47  ;;  %v24234_v47 = vld [vmem:[%s24318_s24 + $0x20] sm:$0xff] }
 0x1a9   : > { %v23272_v45 = vpop.f32.mrf.mxu0  ;;  %23765 = vmatprep.mubr.msk.f32.mxu1 %vm24267_vm0, %v24266_v0  ;;  %23768 = vmatprep.subr.mxu0 %v24266_v0  ;;  %v24235_v32 = vld [vmem:[%s24996_s8 + $0x20] sm:$0xff]  ;;  %v16191_v8 = vand.u32 4294901760, %v26046_v58 }
 0x1aa   : > { %21973 = vst.msk [vmem:[%s26000_s11] sm:$0xff] %vm372_vm1, %v21957_v55  ;;  %v8305_v49 = vpop.f32.mrf.mxu1  ;;  %23766 = vmatmul.mubr.f32.vlgmr.msra.gmra.mxu1 %v15293_v13  ;;  %23773 = vmatprep.subr.mxu1 %v24266_v0 }
 0x1ab   : > { %v8231_v61 = vpop.f32.mrf.mxu0  ;;  %23761 = vmatmul.mubr.f32.vlgmr.msra.gmra.mxu0 %v25927_v43  ;;  %23774 = vmatpush3.msra.mxu1 %v25899_v26  ;;  %v26038_v43 = vsub.f32 %v14760_v48, %v26016_v16  ;;  %v15744_v26 = vand.u32 4294901760, %v15743_v33 }
 0x1ac   : > { %v8232_v57 = vadd.f32 %v8231_v61, %v8158_v28  ;;  %23769 = vmatpush3.msra.mxu0 %v15334_v39  ;;  %v23287_v20 = vpop.f32.mrf.mxu1  ;;  %23770 = vmatprep.mubr.msk.f32.mxu0 %vm24267_vm0, %v24266_v0 }
 0x1ad   : > { %v23282_v34 = vpop.f32.mrf.mxu0  ;;  %23775 = vmatprep.mubr.msk.f32.mxu1 %vm24267_vm0, %v24266_v0  ;;  %23778 = vmatprep.subr.mxu0 %v24266_v0  ;;  %v16232_v48 = vand.u32 4294901760, %v26038_v43 }
 0x1ae   : > { %v8306_v13 = vadd.f32 %v8305_v49, %v8232_v57  ;;  %v8451_v39 = vpop.f32.mrf.mxu1  ;;  %23776 = vmatmul.mubr.f32.vlgmr.msra.gmra.mxu1 %v25904_v5  ;;  %23783 = vmatprep.subr.mxu1 %v24266_v0  ;;  %v26081_v34 = vand.u32 4294901760, %v16570_v10 }
 0x1af   : > { %v8379_v36 = vpop.f32.mrf.mxu0  ;;  %23771 = vmatmul.mubr.f32.vlgmr.msra.gmra.mxu0 %v25904_v5  ;;  %23784 = vmatpush3.msra.mxu1 %v15785_v3  ;;  %v14761_v5 = vadd.f32 %v24235_v32, %v24234_v47  ;;  %v16233_v33 = vsub.f32 %v26038_v43, %v16232_v48 }
 0x1b0   : > { %v8380_v60 = vadd.f32 %v8379_v36, %v8306_v13  ;;  %23779 = vmatpush3.msra.mxu0 %v25954_v25  ;;  %v23297_v9 = vpop.f32.mrf.mxu1  ;;  %23780 = vmatprep.mubr.msk.f32.mxu0 %vm24267_vm0, %v24266_v0  ;;  %v16192_v13 = vsub.f32 %v26046_v58, %v16191_v8 }
 0x1b1   : > { %v23292_v23 = vpop.f32.mrf.mxu0  ;;  %23785 = vmatprep.mubr.msk.f32.mxu1 %vm24267_vm0, %v24266_v0  ;;  %23788 = vmatprep.subr.mxu0 %v24266_v0  ;;  %v26074_v57 = vand.u32 4294901760, %v14761_v5 }
 0x1b2   : > { %v26055_v55 = vadd.f32 %v8451_v39, %v8380_v60  ;;  %v8606_v45 = vpop.f32.mrf.mxu1  ;;  %23786 = vmatmul.mubr.f32.vlgmr.msra.gmra.mxu1 %v25959_v19  ;;  %23793 = vmatprep.subr.mxu1 %v24266_v0  ;;  %v16234_v60 = vand.u32 4294901760, %v16233_v33  ;;  %v26104_v23 = vsub.f32 %v16570_v10, %v26081_v34  ;;  %v17019_v33 = vsel %vm372_vm1, %v24396_v42, 0 }
 0x1b3   : > { %v8530_v11 = vpop.f32.mrf.mxu0  ;;  %23781 = vmatmul.mubr.f32.vlgmr.msra.gmra.mxu0 %v15744_v26  ;;  %23794 = vmatpush3.msra.mxu1 %v25954_v25 }
 0x1b4   : > { %v21958_v28 = vsub.f32 %v25189_v17, %v26055_v55  ;;  %23789 = vmatpush3.msra.mxu0 %v25974_v12  ;;  %v23307_v49 = vpop.f32.mrf.mxu1  ;;  %23790 = vmatprep.mubr.msk.f32.mxu0 %vm24267_vm0, %v24266_v0  ;;  %v8607_v35 = vadd.f32 %v8606_v45, %v8530_v11  ;;  %v24236_v11 = vld [vmem:[%s24318_s24 + $0x28] sm:$0xff] }
 0x1b5   : > { %v23302_v61 = vpop.f32.mrf.mxu0  ;;  %23795 = vmatprep.mubr.msk.f32.mxu1 %vm24267_vm0, %v24266_v0  ;;  %23798 = vmatprep.subr.mxu0 %v24266_v0  ;;  %v24237_v45 = vld [vmem:[%s24996_s8 + $0x28] sm:$0xff]  ;;  %v16640_v49 = vand.u32 4294901760, %v26104_v23 }
 0x1b6   : > { %21974 = vst.msk [vmem:[%s26000_s11 + $0x8] sm:$0xff] %vm372_vm1, %v21958_v28  ;;  %v8754_v3 = vpop.f32.mrf.mxu1  ;;  %23796 = vmatmul.mubr.f32.vlgmr.msra.gmra.mxu1 %v15742_v29  ;;  %23803 = vmatprep.subr.mxu1 %v24266_v0 }
 0x1b7   : > { %v8680_v20 = vpop.f32.mrf.mxu0  ;;  %23791 = vmatmul.mubr.f32.vlgmr.msra.gmra.mxu0 %v25982_v14  ;;  %23804 = vmatpush3.msra.mxu1 %v25954_v25  ;;  %v26096_v14 = vsub.f32 %v14761_v5, %v26074_v57  ;;  %v16193_v25 = vand.u32 4294901760, %v16192_v13 }
 0x1b8   : > { %v8681_v36 = vadd.f32 %v8680_v20, %v8607_v35  ;;  %23799 = vmatpush3.msra.mxu0 %v15783_v24  ;;  %v23317_v26 = vpop.f32.mrf.mxu1  ;;  %23800 = vmatprep.mubr.msk.f32.mxu0 %vm24267_vm0, %v24266_v0 }
 0x1b9   : > { %v23312_v39 = vpop.f32.mrf.mxu0  ;;  %23805 = vmatprep.mubr.msk.f32.mxu1 %vm24267_vm0, %v24266_v0  ;;  %23808 = vmatprep.subr.mxu0 %v24266_v0  ;;  %v16681_v5 = vand.u32 4294901760, %v26096_v14 }
 0x1ba   : > { %v8755_v29 = vadd.f32 %v8754_v3, %v8681_v36  ;;  %v8900_v24 = vpop.f32.mrf.mxu1  ;;  %23806 = vmatmul.mubr.f32.vlgmr.msra.gmra.mxu1 %v25959_v19  ;;  %23813 = vmatprep.subr.mxu1 %v24266_v0  ;;  %v26139_v39 = vand.u32 4294901760, %v17019_v33 }
 0x1bb   : > { %v8828_v12 = vpop.f32.mrf.mxu0  ;;  %23801 = vmatmul.mubr.f32.vlgmr.msra.gmra.mxu0 %v25959_v19  ;;  %23814 = vmatpush3.msra.mxu1 %v16234_v60  ;;  %v14762_v19 = vadd.f32 %v24237_v45, %v24236_v11  ;;  %v16682_v13 = vsub.f32 %v26096_v14, %v16681_v5 }
 0x1bc   : > { %v8829_v9 = vadd.f32 %v8828_v12, %v8755_v29  ;;  %23809 = vmatpush3.msra.mxu0 %v26016_v16  ;;  %v23327_v32 = vpop.f32.mrf.mxu1  ;;  %23810 = vmatprep.mubr.msk.f32.mxu0 %vm24267_vm0, %v24266_v0  ;;  %v16641_v29 = vsub.f32 %v26104_v23, %v16640_v49 }
 0x1bd   : > { %v23322_v47 = vpop.f32.mrf.mxu0  ;;  %23815 = vmatprep.mubr.msk.f32.mxu1 %vm24267_vm0, %v24266_v0  ;;  %23818 = vmatprep.subr.mxu0 %v24266_v0  ;;  %v26132_v36 = vand.u32 4294901760, %v14762_v19 }
 0x1be   : > { %v26113_v28 = vadd.f32 %v8900_v24, %v8829_v9  ;;  %v9055_v61 = vpop.f32.mrf.mxu1  ;;  %23816 = vmatmul.mubr.f32.vlgmr.msra.gmra.mxu1 %v26023_v53  ;;  %23823 = vmatprep.subr.mxu1 %v24266_v0  ;;  %v16683_v9 = vand.u32 4294901760, %v16682_v13  ;;  %v26162_v47 = vsub.f32 %v17019_v33, %v26139_v39  ;;  %v17468_v13 = vsel %vm372_vm1, %v24417_v50, 0 }
 0x1bf   : > { %v8979_v10 = vpop.f32.mrf.mxu0  ;;  %23811 = vmatmul.mubr.f32.vlgmr.msra.gmra.mxu0 %v16193_v25  ;;  %23824 = vmatpush3.msra.mxu1 %v26016_v16 }
 0x1c0   : > { %v21959_v35 = vsub.f32 %v25242_v2, %v26113_v28  ;;  %23819 = vmatpush3.msra.mxu0 %v26038_v43  ;;  %v23337_v3 = vpop.f32.mrf.mxu1  ;;  %23820 = vmatprep.mubr.msk.f32.mxu0 %vm24267_vm0, %v24266_v0  ;;  %v9056_v42 = vadd.f32 %v9055_v61, %v8979_v10  ;;  %v24238_v10 = vld [vmem:[%s24318_s24 + $0x30] sm:$0xff] }
 0x1c1   : > { %v23332_v20 = vpop.f32.mrf.mxu0  ;;  %23825 = vmatprep.mubr.msk.f32.mxu1 %vm24267_vm0, %v24266_v0  ;;  %23828 = vmatprep.subr.mxu0 %v24266_v0  ;;  %v24239_v61 = vld [vmem:[%s24996_s8 + $0x30] sm:$0xff]  ;;  %v17089_v3 = vand.u32 4294901760, %v26162_v47 }
 0x1c2   : > { %21975 = vst.msk [vmem:[%s26000_s11 + $0x10] sm:$0xff] %vm372_vm1, %v21959_v35  ;;  %v9203_v60 = vpop.f32.mrf.mxu1  ;;  %23826 = vmatmul.mubr.f32.vlgmr.msra.gmra.mxu1 %v16191_v8  ;;  %23833 = vmatprep.subr.mxu1 %v24266_v0 }
 0x1c3   : > { %v9129_v26 = vpop.f32.mrf.mxu0  ;;  %23821 = vmatmul.mubr.f32.vlgmr.msra.gmra.mxu0 %v26046_v58  ;;  %23834 = vmatpush3.msra.mxu1 %v26016_v16  ;;  %v26154_v58 = vsub.f32 %v14762_v19, %v26132_v36  ;;  %v16642_v16 = vand.u32 4294901760, %v16641_v29 }
 0x1c4   : > { %v9130_v12 = vadd.f32 %v9129_v26, %v9056_v42  ;;  %23829 = vmatpush3.msra.mxu0 %v16232_v48  ;;  %v23347_v25 = vpop.f32.mrf.mxu1  ;;  %23830 = vmatprep.mubr.msk.f32.mxu0 %vm24267_vm0, %v24266_v0 }
 0x1c5   : > { %v23342_v24 = vpop.f32.mrf.mxu0  ;;  %23835 = vmatprep.mubr.msk.f32.mxu1 %vm24267_vm0, %v24266_v0  ;;  %23838 = vmatprep.subr.mxu0 %v24266_v0  ;;  %v17130_v19 = vand.u32 4294901760, %v26154_v58 }
 0x1c6   : > { %v9204_v8 = vadd.f32 %v9203_v60, %v9130_v12  ;;  %v9349_v48 = vpop.f32.mrf.mxu1  ;;  %23836 = vmatmul.mubr.f32.vlgmr.msra.gmra.mxu1 %v26023_v53  ;;  %23843 = vmatprep.subr.mxu1 %v24266_v0  ;;  %v26197_v24 = vand.u32 4294901760, %v17468_v13 }
 0x1c7   : > { %v9277_v43 = vpop.f32.mrf.mxu0  ;;  %23831 = vmatmul.mubr.f32.vlgmr.msra.gmra.mxu0 %v26023_v53  ;;  %23844 = vmatpush3.msra.mxu1 %v16683_v9  ;;  %v14763_v53 = vadd.f32 %v24239_v61, %v24238_v10  ;;  %v17131_v29 = vsub.f32 %v26154_v58, %v17130_v19 }
 0x1c8   : > { %v9278_v32 = vadd.f32 %v9277_v43, %v9204_v8  ;;  %23839 = vmatpush3.msra.mxu0 %v26074_v57  ;;  %v23357_v45 = vpop.f32.mrf.mxu1  ;;  %23840 = vmatprep.mubr.msk.f32.mxu0 %vm24267_vm0, %v24266_v0  ;;  %v17090_v8 = vsub.f32 %v26162_v47, %v17089_v3 }
 0x1c9   : > { %v23352_v11 = vpop.f32.mrf.mxu0  ;;  %23845 = vmatprep.mubr.msk.f32.mxu1 %vm24267_vm0, %v24266_v0  ;;  %23848 = vmatprep.subr.mxu0 %v24266_v0  ;;  %v26190_v12 = vand.u32 4294901760, %v14763_v53 }
 0x1ca   : > { %v26171_v35 = vadd.f32 %v9349_v48, %v9278_v32  ;;  %v9504_v20 = vpop.f32.mrf.mxu1  ;;  %23846 = vmatmul.mubr.f32.vlgmr.msra.gmra.mxu1 %v26081_v34  ;;  %23853 = vmatprep.subr.mxu1 %v24266_v0  ;;  %v17132_v32 = vand.u32 4294901760, %v17131_v29  ;;  %v26220_v11 = vsub.f32 %v17468_v13, %v26197_v24  ;;  %v17917_v29 = vsel %vm372_vm1, %v24438_v56, 0 }
 0x1cb   : > { %v9428_v33 = vpop.f32.mrf.mxu0  ;;  %23841 = vmatmul.mubr.f32.vlgmr.msra.gmra.mxu0 %v16642_v16  ;;  %23854 = vmatpush3.msra.mxu1 %v26074_v57 }
 0x1cc   : > { %v21960_v42 = vsub.f32 %v25295_v40, %v26171_v35  ;;  %23849 = vmatpush3.msra.mxu0 %v26096_v14  ;;  %v23367_v60 = vpop.f32.mrf.mxu1  ;;  %23850 = vmatprep.mubr.msk.f32.mxu0 %vm24267_vm0, %v24266_v0  ;;  %v9505_v50 = vadd.f32 %v9504_v20, %v9428_v33  ;;  %v24240_v33 = vld [vmem:[%s24318_s24 + $0x38] sm:$0xff] }
 0x1cd   : > { %v23362_v26 = vpop.f32.mrf.mxu0  ;;  %23855 = vmatprep.mubr.msk.f32.mxu1 %vm24267_vm0, %v24266_v0  ;;  %23858 = vmatprep.subr.mxu0 %v24266_v0  ;;  %v24241_v20 = vld [vmem:[%s24996_s8 + $0x38] sm:$0xff]  ;;  %v17538_v60 = vand.u32 4294901760, %v26220_v11 }
 0x1ce   : > { %21976 = vst.msk [vmem:[%s26000_s11 + $0x18] sm:$0xff] %vm372_vm1, %v21960_v42  ;;  %v9652_v9 = vpop.f32.mrf.mxu1  ;;  %23856 = vmatmul.mubr.f32.vlgmr.msra.gmra.mxu1 %v16640_v49  ;;  %23863 = vmatprep.subr.mxu1 %v24266_v0 }
 0x1cf   : > { %v9578_v25 = vpop.f32.mrf.mxu0  ;;  %23851 = vmatmul.mubr.f32.vlgmr.msra.gmra.mxu0 %v26104_v23  ;;  %23864 = vmatpush3.msra.mxu1 %v26074_v57  ;;  %v26212_v23 = vsub.f32 %v14763_v53, %v26190_v12  ;;  %v17091_v57 = vand.u32 4294901760, %v17090_v8 }
 0x1d0   : > { %v9579_v43 = vadd.f32 %v9578_v25, %v9505_v50  ;;  %23859 = vmatpush3.msra.mxu0 %v16681_v5  ;;  %v23377_v16 = vpop.f32.mrf.mxu1  ;;  %23860 = vmatprep.mubr.msk.f32.mxu0 %vm24267_vm0, %v24266_v0 }
 0x1d1   : > { %v23372_v48 = vpop.f32.mrf.mxu0  ;;  %23865 = vmatprep.mubr.msk.f32.mxu1 %vm24267_vm0, %v24266_v0  ;;  %23868 = vmatprep.subr.mxu0 %v24266_v0  ;;  %v17579_v53 = vand.u32 4294901760, %v26212_v23 }
 0x1d2   : > { %v9653_v49 = vadd.f32 %v9652_v9, %v9579_v43  ;;  %v9798_v5 = vpop.f32.mrf.mxu1  ;;  %23866 = vmatmul.mubr.f32.vlgmr.msra.gmra.mxu1 %v26081_v34  ;;  %23873 = vmatprep.subr.mxu1 %v24266_v0  ;;  %v26255_v48 = vand.u32 4294901760, %v17917_v29 }
 0x1d3   : > { %v9726_v14 = vpop.f32.mrf.mxu0  ;;  %23861 = vmatmul.mubr.f32.vlgmr.msra.gmra.mxu0 %v26081_v34  ;;  %23874 = vmatpush3.msra.mxu1 %v17132_v32  ;;  %v14764_v34 = vadd.f32 %v24241_v20, %v24240_v33  ;;  %v17580_v8 = vsub.f32 %v26212_v23, %v17579_v53 }
 0x1d4   : > { %v9727_v45 = vadd.f32 %v9726_v14, %v9653_v49  ;;  %23869 = vmatpush3.msra.mxu0 %v26132_v36  ;;  %v23387_v61 = vpop.f32.mrf.mxu1  ;;  %23870 = vmatprep.mubr.msk.f32.mxu0 %vm24267_vm0, %v24266_v0  ;;  %v17539_v49 = vsub.f32 %v26220_v11, %v17538_v60 }
 0x1d5   : > { %v23382_v10 = vpop.f32.mrf.mxu0  ;;  %23875 = vmatprep.mubr.msk.f32.mxu1 %vm24267_vm0, %v24266_v0  ;;  %23878 = vmatprep.subr.mxu0 %v24266_v0  ;;  %v26248_v43 = vand.u32 4294901760, %v14764_v34 }
 0x1d6   : > { %v26229_v42 = vadd.f32 %v9798_v5, %v9727_v45  ;;  %v9953_v26 = vpop.f32.mrf.mxu1  ;;  %23876 = vmatmul.mubr.f32.vlgmr.msra.gmra.mxu1 %v26139_v39  ;;  %23883 = vmatprep.subr.mxu1 %v24266_v0  ;;  %v17581_v45 = vand.u32 4294901760, %v17580_v8  ;;  %v26278_v10 = vsub.f32 %v17917_v29, %v26255_v48  ;;  %v18366_v8 = vsel %vm372_vm1, %v24461_v63, 0 }
 0x1d7   : > { %v9877_v13 = vpop.f32.mrf.mxu0  ;;  %23871 = vmatmul.mubr.f32.vlgmr.msra.gmra.mxu0 %v17091_v57  ;;  %23884 = vmatpush3.msra.mxu1 %v26132_v36 }
 0x1d8   : > { %v21961_v50 = vsub.f32 %v25348_v59, %v26229_v42  ;;  %23879 = vmatpush3.msra.mxu0 %v26154_v58  ;;  %v23397_v9 = vpop.f32.mrf.mxu1  ;;  %23880 = vmatprep.mubr.msk.f32.mxu0 %vm24267_vm0, %v24266_v0  ;;  %v9954_v56 = vadd.f32 %v9953_v26, %v9877_v13  ;;  %v24242_v13 = vld [vmem:[%s24318_s24 + $0x40] sm:$0xff] }
 0x1d9   : > { %v23392_v25 = vpop.f32.mrf.mxu0  ;;  %23885 = vmatprep.mubr.msk.f32.mxu1 %vm24267_vm0, %v24266_v0  ;;  %23888 = vmatprep.subr.mxu0 %v24266_v0  ;;  %v24243_v26 = vld [vmem:[%s24996_s8 + $0x40] sm:$0xff]  ;;  %v17987_v9 = vand.u32 4294901760, %v26278_v10 }
 0x1da   : > { %21977 = vst.msk [vmem:[%s26000_s11 + $0x20] sm:$0xff] %vm372_vm1, %v21961_v50  ;;  %v10101_v32 = vpop.f32.mrf.mxu1  ;;  %23886 = vmatmul.mubr.f32.vlgmr.msra.gmra.mxu1 %v17089_v3  ;;  %23893 = vmatprep.subr.mxu1 %v24266_v0 }
 0x1db   : > { %v10027_v16 = vpop.f32.mrf.mxu0  ;;  %23881 = vmatmul.mubr.f32.vlgmr.msra.gmra.mxu0 %v26162_v47  ;;  %23894 = vmatpush3.msra.mxu1 %v26132_v36  ;;  %v26270_v47 = vsub.f32 %v14764_v34, %v26248_v43  ;;  %v17540_v36 = vand.u32 4294901760, %v17539_v49 }
 0x1dc   : > { %v10028_v14 = vadd.f32 %v10027_v16, %v9954_v56  ;;  %23889 = vmatpush3.msra.mxu0 %v17130_v19  ;;  %v23407_v57 = vpop.f32.mrf.mxu1  ;;  %23890 = vmatprep.mubr.msk.f32.mxu0 %vm24267_vm0, %v24266_v0 }
 0x1dd   : > { %v23402_v5 = vpop.f32.mrf.mxu0  ;;  %23895 = vmatprep.mubr.msk.f32.mxu1 %vm24267_vm0, %v24266_v0  ;;  %23898 = vmatprep.subr.mxu0 %v24266_v0  ;;  %v18028_v34 = vand.u32 4294901760, %v26270_v47 }
 0x1de   : > { %v10102_v3 = vadd.f32 %v10101_v32, %v10028_v14  ;;  %v10247_v19 = vpop.f32.mrf.mxu1  ;;  %23896 = vmatmul.mubr.f32.vlgmr.msra.gmra.mxu1 %v26139_v39  ;;  %23903 = vmatprep.subr.mxu1 %v24266_v0  ;;  %v26313_v5 = vand.u32 4294901760, %v18366_v8 }
 0x1df   : > { %v10175_v58 = vpop.f32.mrf.mxu0  ;;  %23891 = vmatmul.mubr.f32.vlgmr.msra.gmra.mxu0 %v26139_v39  ;;  %23904 = vmatpush3.msra.mxu1 %v17581_v45  ;;  %v14765_v39 = vadd.f32 %v24243_v26, %v24242_v13  ;;  %v18029_v49 = vsub.f32 %v26270_v47, %v18028_v34 }
 0x1e0   : > { %v10176_v61 = vadd.f32 %v10175_v58, %v10102_v3  ;;  %23899 = vmatpush3.msra.mxu0 %v26190_v12  ;;  %v23417_v20 = vpop.f32.mrf.mxu1  ;;  %23900 = vmatprep.mubr.msk.f32.mxu0 %vm24267_vm0, %v24266_v0  ;;  %v17988_v3 = vsub.f32 %v26278_v10, %v17987_v9 }
 0x1e1   : > { %v23412_v33 = vpop.f32.mrf.mxu0  ;;  %23905 = vmatprep.mubr.msk.f32.mxu1 %vm24267_vm0, %v24266_v0  ;;  %23908 = vmatprep.subr.mxu0 %v24266_v0  ;;  %v26306_v14 = vand.u32 4294901760, %v14765_v39 }
 0x1e2   : > { %v26287_v50 = vadd.f32 %v10247_v19, %v10176_v61  ;;  %v10402_v25 = vpop.f32.mrf.mxu1  ;;  %23906 = vmatmul.mubr.f32.vlgmr.msra.gmra.mxu1 %v26197_v24  ;;  %23913 = vmatprep.subr.mxu1 %v24266_v0  ;;  %v18030_v61 = vand.u32 4294901760, %v18029_v49  ;;  %v26336_v33 = vsub.f32 %v18366_v8, %v26313_v5  ;;  %v18815_v49 = vsel %vm372_vm1, %v24482_v7, 0 }
 0x1e3   : > { %v10326_v29 = vpop.f32.mrf.mxu0  ;;  %23901 = vmatmul.mubr.f32.vlgmr.msra.gmra.mxu0 %v17540_v36  ;;  %23914 = vmatpush3.msra.mxu1 %v26190_v12 }
 0x1e4   : > { %v21962_v56 = vsub.f32 %v25401_v62, %v26287_v50  ;;  %23909 = vmatpush3.msra.mxu0 %v26212_v23  ;;  %v23427_v32 = vpop.f32.mrf.mxu1  ;;  %23910 = vmatprep.mubr.msk.f32.mxu0 %vm24267_vm0, %v24266_v0  ;;  %v10403_v63 = vadd.f32 %v10402_v25, %v10326_v29  ;;  %v24244_v29 = vld [vmem:[%s24318_s24 + $0x48] sm:$0xff] }
 0x1e5   : > { %v23422_v16 = vpop.f32.mrf.mxu0  ;;  %23915 = vmatprep.mubr.msk.f32.mxu1 %vm24267_vm0, %v24266_v0  ;;  %23918 = vmatprep.subr.mxu0 %v24266_v0  ;;  %v24245_v25 = vld [vmem:[%s24996_s8 + $0x48] sm:$0xff]  ;;  %v18436_v32 = vand.u32 4294901760, %v26336_v33 }
 0x1e6   : > { %21978 = vst.msk [vmem:[%s26000_s11 + $0x28] sm:$0xff] %vm372_vm1, %v21962_v56  ;;  %v10550_v45 = vpop.f32.mrf.mxu1  ;;  %23916 = vmatmul.mubr.f32.vlgmr.msra.gmra.mxu1 %v17538_v60  ;;  %23923 = vmatprep.subr.mxu1 %v24266_v0 }
 0x1e7   : > { %v10476_v57 = vpop.f32.mrf.mxu0  ;;  %23911 = vmatmul.mubr.f32.vlgmr.msra.gmra.mxu0 %v26220_v11  ;;  %23924 = vmatpush3.msra.mxu1 %v26190_v12  ;;  %v26328_v11 = vsub.f32 %v14765_v39, %v26306_v14  ;;  %v17989_v12 = vand.u32 4294901760, %v17988_v3 }
 0x1e8   : > { %v10477_v58 = vadd.f32 %v10476_v57, %v10403_v63  ;;  %23919 = vmatpush3.msra.mxu0 %v17579_v53  ;;  %v23437_v36 = vpop.f32.mrf.mxu1  ;;  %23920 = vmatprep.mubr.msk.f32.mxu0 %vm24267_vm0, %v24266_v0 }
 0x1e9   : > { %v23432_v19 = vpop.f32.mrf.mxu0  ;;  %23925 = vmatprep.mubr.msk.f32.mxu1 %vm24267_vm0, %v24266_v0  ;;  %23928 = vmatprep.subr.mxu0 %v24266_v0  ;;  %v18477_v39 = vand.u32 4294901760, %v26328_v11 }
 0x1ea   : > { %v10551_v60 = vadd.f32 %v10550_v45, %v10477_v58  ;;  %v10696_v53 = vpop.f32.mrf.mxu1  ;;  %23926 = vmatmul.mubr.f32.vlgmr.msra.gmra.mxu1 %v26197_v24  ;;  %23933 = vmatprep.subr.mxu1 %v24266_v0  ;;  %v26371_v19 = vand.u32 4294901760, %v18815_v49 }
 0x1eb   : > { %v10624_v23 = vpop.f32.mrf.mxu0  ;;  %23921 = vmatmul.mubr.f32.vlgmr.msra.gmra.mxu0 %v26197_v24  ;;  %23934 = vmatpush3.msra.mxu1 %v18030_v61  ;;  %v14766_v24 = vadd.f32 %v24245_v25, %v24244_v29  ;;  %v18478_v3 = vsub.f32 %v26328_v11, %v18477_v39 }
 0x1ec   : > { %v10625_v20 = vadd.f32 %v10624_v23, %v10551_v60  ;;  %23929 = vmatpush3.msra.mxu0 %v26248_v43  ;;  %v23447_v26 = vpop.f32.mrf.mxu1  ;;  %23930 = vmatprep.mubr.msk.f32.mxu0 %vm24267_vm0, %v24266_v0  ;;  %v18437_v60 = vsub.f32 %v26336_v33, %v18436_v32 }
 0x1ed   : > { %v23442_v13 = vpop.f32.mrf.mxu0  ;;  %23935 = vmatprep.mubr.msk.f32.mxu1 %vm24267_vm0, %v24266_v0  ;;  %23938 = vmatprep.subr.mxu0 %v24266_v0  ;;  %v26364_v58 = vand.u32 4294901760, %v14766_v24 }
 0x1ee   : > { %v26345_v56 = vadd.f32 %v10696_v53, %v10625_v20  ;;  %v10851_v16 = vpop.f32.mrf.mxu1  ;;  %23936 = vmatmul.mubr.f32.vlgmr.msra.gmra.mxu1 %v26255_v48  ;;  %23943 = vmatprep.subr.mxu1 %v24266_v0  ;;  %v18479_v20 = vand.u32 4294901760, %v18478_v3  ;;  %v26394_v13 = vsub.f32 %v18815_v49, %v26371_v19  ;;  %v19264_v3 = vsel %vm372_vm1, %v24506_v15, 0 }
 0x1ef   : > { %v10775_v8 = vpop.f32.mrf.mxu0  ;;  %23931 = vmatmul.mubr.f32.vlgmr.msra.gmra.mxu0 %v17989_v12  ;;  %23944 = vmatpush3.msra.mxu1 %v26248_v43 }
 0x1f0   : > { %v21963_v63 = vsub.f32 %v25454_v52, %v26345_v56  ;;  %23939 = vmatpush3.msra.mxu0 %v26270_v47  ;;  %v23457_v45 = vpop.f32.mrf.mxu1  ;;  %23940 = vmatprep.mubr.msk.f32.mxu0 %vm24267_vm0, %v24266_v0  ;;  %v10852_v7 = vadd.f32 %v10851_v16, %v10775_v8  ;;  %v24246_v8 = vld [vmem:[%s24318_s24 + $0x50] sm:$0xff] }
 0x1f1   : > { %v23452_v57 = vpop.f32.mrf.mxu0  ;;  %23945 = vmatprep.mubr.msk.f32.mxu1 %vm24267_vm0, %v24266_v0  ;;  %23948 = vmatprep.subr.mxu0 %v24266_v0  ;;  %v24247_v16 = vld [vmem:[%s24996_s8 + $0x50] sm:$0xff]  ;;  %v18885_v45 = vand.u32 4294901760, %v26394_v13 }
 0x1f2   : > { %21979 = vst.msk [vmem:[%s26000_s11 + $0x30] sm:$0xff] %vm372_vm1, %v21963_v63  ;;  %v10999_v61 = vpop.f32.mrf.mxu1  ;;  %23946 = vmatmul.mubr.f32.vlgmr.msra.gmra.mxu1 %v17987_v9  ;;  %23953 = vmatprep.subr.mxu1 %v24266_v0 }
 0x1f3   : > { %v10925_v36 = vpop.f32.mrf.mxu0  ;;  %23941 = vmatmul.mubr.f32.vlgmr.msra.gmra.mxu0 %v26278_v10  ;;  %23954 = vmatpush3.msra.mxu1 %v26248_v43  ;;  %v26386_v10 = vsub.f32 %v14766_v24, %v26364_v58  ;;  %v18438_v43 = vand.u32 4294901760, %v18437_v60 }
 0x1f4   : > { %v10926_v23 = vadd.f32 %v10925_v36, %v10852_v7  ;;  %23949 = vmatpush3.msra.mxu0 %v18028_v34  ;;  %v23467_v12 = vpop.f32.mrf.mxu1  ;;  %23950 = vmatprep.mubr.msk.f32.mxu0 %vm24267_vm0, %v24266_v0 }
 0x1f5   : > { %v23462_v53 = vpop.f32.mrf.mxu0  ;;  %23955 = vmatprep.mubr.msk.f32.mxu1 %vm24267_vm0, %v24266_v0  ;;  %23958 = vmatprep.subr.mxu0 %v24266_v0  ;;  %v18926_v24 = vand.u32 4294901760, %v26386_v10 }
 0x1f6   : > { %v11000_v9 = vadd.f32 %v10999_v61, %v10926_v23  ;;  %v11145_v34 = vpop.f32.mrf.mxu1  ;;  %23956 = vmatmul.mubr.f32.vlgmr.msra.gmra.mxu1 %v26255_v48  ;;  %23963 = vmatprep.subr.mxu1 %v24266_v0  ;;  %v26429_v53 = vand.u32 4294901760, %v19264_v3 }
 0x1f7   : > { %v11073_v47 = vpop.f32.mrf.mxu0  ;;  %23951 = vmatmul.mubr.f32.vlgmr.msra.gmra.mxu0 %v26255_v48  ;;  %23964 = vmatpush3.msra.mxu1 %v18479_v20  ;;  %v14767_v48 = vadd.f32 %v24247_v16, %v24246_v8  ;;  %v18927_v60 = vsub.f32 %v26386_v10, %v18926_v24 }
 0x1f8   : > { %v11074_v26 = vadd.f32 %v11073_v47, %v11000_v9  ;;  %23959 = vmatpush3.msra.mxu0 %v26306_v14  ;;  %v23477_v25 = vpop.f32.mrf.mxu1  ;;  %23960 = vmatprep.mubr.msk.f32.mxu0 %vm24267_vm0, %v24266_v0  ;;  %v18886_v9 = vsub.f32 %v26394_v13, %v18885_v45 }
 0x1f9   : > { %v23472_v29 = vpop.f32.mrf.mxu0  ;;  %23965 = vmatprep.mubr.msk.f32.mxu1 %vm24267_vm0, %v24266_v0  ;;  %23968 = vmatprep.subr.mxu0 %v24266_v0  ;;  %v26422_v23 = vand.u32 4294901760, %v14767_v48 }
 0x1fa   : > { %v26403_v63 = vadd.f32 %v11145_v34, %v11074_v26  ;;  %v11300_v57 = vpop.f32.mrf.mxu1  ;;  %23966 = vmatmul.mubr.f32.vlgmr.msra.gmra.mxu1 %v26313_v5  ;;  %23973 = vmatprep.subr.mxu1 %v24266_v0  ;;  %v18928_v26 = vand.u32 4294901760, %v18927_v60  ;;  %v26452_v29 = vsub.f32 %v19264_v3, %v26429_v53  ;;  %v19713_v60 = vsel %vm372_vm1, %v24529_v22, 0 }
 0x1fb   : > { %v11224_v49 = vpop.f32.mrf.mxu0  ;;  %23961 = vmatmul.mubr.f32.vlgmr.msra.gmra.mxu0 %v18438_v43  ;;  %23974 = vmatpush3.msra.mxu1 %v26306_v14 }
 0x1fc   : > { %v21964_v7 = vsub.f32 %v25507_v21, %v26403_v63  ;;  %23969 = vmatpush3.msra.mxu0 %v26328_v11  ;;  %v23487_v61 = vpop.f32.mrf.mxu1  ;;  %23970 = vmatprep.mubr.msk.f32.mxu0 %vm24267_vm0, %v24266_v0  ;;  %v11301_v15 = vadd.f32 %v11300_v57, %v11224_v49  ;;  %v24248_v49 = vld [vmem:[%s24318_s24 + $0x58] sm:$0xff] }
 0x1fd   : > { %v23482_v36 = vpop.f32.mrf.mxu0  ;;  %23975 = vmatprep.mubr.msk.f32.mxu1 %vm24267_vm0, %v24266_v0  ;;  %23978 = vmatprep.subr.mxu0 %v24266_v0  ;;  %v24249_v57 = vld [vmem:[%s24996_s8 + $0x58] sm:$0xff]  ;;  %v19334_v61 = vand.u32 4294901760, %v26452_v29 }
 0x1fe   : > { %21980 = vst.msk [vmem:[%s26000_s11 + $0x38] sm:$0xff] %vm372_vm1, %v21964_v7  ;;  %v11448_v20 = vpop.f32.mrf.mxu1  ;;  %23976 = vmatmul.mubr.f32.vlgmr.msra.gmra.mxu1 %v18436_v32  ;;  %23983 = vmatprep.subr.mxu1 %v24266_v0 }
 0x1ff   : > { %v11374_v12 = vpop.f32.mrf.mxu0  ;;  %23971 = vmatmul.mubr.f32.vlgmr.msra.gmra.mxu0 %v26336_v33  ;;  %23984 = vmatpush3.msra.mxu1 %v26306_v14  ;;  %v26444_v33 = vsub.f32 %v14767_v48, %v26422_v23  ;;  %v18887_v14 = vand.u32 4294901760, %v18886_v9 }
 0x200   : > { %v11375_v47 = vadd.f32 %v11374_v12, %v11301_v15  ;;  %23979 = vmatpush3.msra.mxu0 %v18477_v39  ;;  %v23497_v43 = vpop.f32.mrf.mxu1  ;;  %23980 = vmatprep.mubr.msk.f32.mxu0 %vm24267_vm0, %v24266_v0 }
 0x201   : > { %v23492_v34 = vpop.f32.mrf.mxu0  ;;  %23985 = vmatprep.mubr.msk.f32.mxu1 %vm24267_vm0, %v24266_v0  ;;  %23988 = vmatprep.subr.mxu0 %v24266_v0  ;;  %v19375_v48 = vand.u32 4294901760, %v26444_v33 }
 0x202   : > { %v11449_v32 = vadd.f32 %v11448_v20, %v11375_v47  ;;  %v11594_v39 = vpop.f32.mrf.mxu1  ;;  %23986 = vmatmul.mubr.f32.vlgmr.msra.gmra.mxu1 %v26313_v5  ;;  %23993 = vmatprep.subr.mxu1 %v24266_v0  ;;  %v26487_v34 = vand.u32 4294901760, %v19713_v60 }
 0x203   : > { %v11522_v11 = vpop.f32.mrf.mxu0  ;;  %23981 = vmatmul.mubr.f32.vlgmr.msra.gmra.mxu0 %v26313_v5  ;;  %23994 = vmatpush3.msra.mxu1 %v18928_v26  ;;  %v14768_v5 = vadd.f32 %v24249_v57, %v24248_v49  ;;  %v19376_v9 = vsub.f32 %v26444_v33, %v19375_v48 }
 0x204   : > { %v11523_v25 = vadd.f32 %v11522_v11, %v11449_v32  ;;  %23989 = vmatpush3.msra.mxu0 %v26364_v58  ;;  %v23507_v16 = vpop.f32.mrf.mxu1  ;;  %23990 = vmatprep.mubr.msk.f32.mxu0 %vm24267_vm0, %v24266_v0  ;;  %v19335_v32 = vsub.f32 %v26452_v29, %v19334_v61 }
 0x205   : > { %v23502_v8 = vpop.f32.mrf.mxu0  ;;  %23995 = vmatprep.mubr.msk.f32.mxu1 %vm24267_vm0, %v24266_v0  ;;  %23998 = vmatprep.subr.mxu0 %v24266_v0  ;;  %v26480_v47 = vand.u32 4294901760, %v14768_v5 }
 0x206   : > { %v26461_v7 = vadd.f32 %v11594_v39, %v11523_v25  ;;  %v11749_v36 = vpop.f32.mrf.mxu1  ;;  %23996 = vmatmul.mubr.f32.vlgmr.msra.gmra.mxu1 %v26371_v19  ;;  %24003 = vmatprep.subr.mxu1 %v24266_v0  ;;  %v19377_v25 = vand.u32 4294901760, %v19376_v9  ;;  %v26510_v8 = vsub.f32 %v19713_v60, %v26487_v34  ;;  %v20162_v9 = vsel %vm372_vm1, %v24550_v30, 0 }
 0x207   : > { %v11673_v3 = vpop.f32.mrf.mxu0  ;;  %23991 = vmatmul.mubr.f32.vlgmr.msra.gmra.mxu0 %v18887_v14  ;;  %24004 = vmatpush3.msra.mxu1 %v26364_v58 }
 0x208   : > { %v21965_v15 = vsub.f32 %v25560_v27, %v26461_v7  ;;  %23999 = vmatpush3.msra.mxu0 %v26386_v10  ;;  %v23517_v20 = vpop.f32.mrf.mxu1  ;;  %24000 = vmatprep.mubr.msk.f32.mxu0 %vm24267_vm0, %v24266_v0  ;;  %v11750_v22 = vadd.f32 %v11749_v36, %v11673_v3  ;;  %v24250_v3 = vld [vmem:[%s24318_s24 + $0x60] sm:$0xff] }
 0x209   : > { %v23512_v12 = vpop.f32.mrf.mxu0  ;;  %24005 = vmatprep.mubr.msk.f32.mxu1 %vm24267_vm0, %v24266_v0  ;;  %24008 = vmatprep.subr.mxu0 %v24266_v0  ;;  %v24251_v36 = vld [vmem:[%s24996_s8 + $0x60] sm:$0xff]  ;;  %v19783_v20 = vand.u32 4294901760, %v26510_v8 }
 0x20a   : > { %21981 = vst.msk [vmem:[%s26000_s11 + $0x40] sm:$0xff] %vm372_vm1, %v21965_v15  ;;  %v11897_v26 = vpop.f32.mrf.mxu1  ;;  %24006 = vmatmul.mubr.f32.vlgmr.msra.gmra.mxu1 %v18885_v45  ;;  %24013 = vmatprep.subr.mxu1 %v24266_v0 }
 0x20b   : > { %v11823_v43 = vpop.f32.mrf.mxu0  ;;  %24001 = vmatmul.mubr.f32.vlgmr.msra.gmra.mxu0 %v26394_v13  ;;  %24014 = vmatpush3.msra.mxu1 %v26364_v58  ;;  %v26502_v13 = vsub.f32 %v14768_v5, %v26480_v47  ;;  %v19336_v58 = vand.u32 4294901760, %v19335_v32 }
 0x20c   : > { %v11824_v11 = vadd.f32 %v11823_v43, %v11750_v22  ;;  %24009 = vmatpush3.msra.mxu0 %v18926_v24  ;;  %v23527_v14 = vpop.f32.mrf.mxu1  ;;  %24010 = vmatprep.mubr.msk.f32.mxu0 %vm24267_vm0, %v24266_v0 }
 0x20d   : > { %v23522_v39 = vpop.f32.mrf.mxu0  ;;  %24015 = vmatprep.mubr.msk.f32.mxu1 %vm24267_vm0, %v24266_v0  ;;  %24018 = vmatprep.subr.mxu0 %v24266_v0  ;;  %v19824_v5 = vand.u32 4294901760, %v26502_v13 }
 0x20e   : > { %v11898_v45 = vadd.f32 %v11897_v26, %v11824_v11  ;;  %v12043_v24 = vpop.f32.mrf.mxu1  ;;  %24016 = vmatmul.mubr.f32.vlgmr.msra.gmra.mxu1 %v26371_v19  ;;  %24023 = vmatprep.subr.mxu1 %v24266_v0  ;;  %v26545_v39 = vand.u32 4294901760, %v20162_v9 }
 0x20f   : > { %v11971_v10 = vpop.f32.mrf.mxu0  ;;  %24011 = vmatmul.mubr.f32.vlgmr.msra.gmra.mxu0 %v26371_v19  ;;  %24024 = vmatpush3.msra.mxu1 %v19377_v25  ;;  %v14769_v19 = vadd.f32 %v24251_v36, %v24250_v3  ;;  %v19825_v32 = vsub.f32 %v26502_v13, %v19824_v5 }
 0x210   : > { %v11972_v16 = vadd.f32 %v11971_v10, %v11898_v45  ;;  %24019 = vmatpush3.msra.mxu0 %v26422_v23  ;;  %v23537_v57 = vpop.f32.mrf.mxu1  ;;  %24020 = vmatprep.mubr.msk.f32.mxu0 %vm24267_vm0, %v24266_v0  ;;  %v19784_v45 = vsub.f32 %v26510_v8, %v19783_v20 }
 0x211   : > { %v23532_v49 = vpop.f32.mrf.mxu0  ;;  %24025 = vmatprep.mubr.msk.f32.mxu1 %vm24267_vm0, %v24266_v0  ;;  %24028 = vmatprep.subr.mxu0 %v24266_v0  ;;  %v26538_v11 = vand.u32 4294901760, %v14769_v19 }
 0x212   : > { %v26519_v15 = vadd.f32 %v12043_v24, %v11972_v16  ;;  %v12198_v12 = vpop.f32.mrf.mxu1  ;;  %24026 = vmatmul.mubr.f32.vlgmr.msra.gmra.mxu1 %v26429_v53  ;;  %24033 = vmatprep.subr.mxu1 %v24266_v0  ;;  %v19826_v16 = vand.u32 4294901760, %v19825_v32  ;;  %v26568_v49 = vsub.f32 %v20162_v9, %v26545_v39  ;;  %v20611_v32 = vsel %vm372_vm1, %v24574_v38, 0 }
 0x213   : > { %v12122_v60 = vpop.f32.mrf.mxu0  ;;  %24021 = vmatmul.mubr.f32.vlgmr.msra.gmra.mxu0 %v19336_v58  ;;  %24034 = vmatpush3.msra.mxu1 %v26422_v23 }
 0x214   : > { %v21966_v22 = vsub.f32 %v25613_v51, %v26519_v15  ;;  %24029 = vmatpush3.msra.mxu0 %v26444_v33  ;;  %v23547_v26 = vpop.f32.mrf.mxu1  ;;  %24030 = vmatprep.mubr.msk.f32.mxu0 %vm24267_vm0, %v24266_v0  ;;  %v12199_v30 = vadd.f32 %v12198_v12, %v12122_v60  ;;  %v24252_v60 = vld [vmem:[%s24318_s24 + $0x68] sm:$0xff] }
 0x215   : > { %v23542_v43 = vpop.f32.mrf.mxu0  ;;  %24035 = vmatprep.mubr.msk.f32.mxu1 %vm24267_vm0, %v24266_v0  ;;  %24038 = vmatprep.subr.mxu0 %v24266_v0  ;;  %v24253_v12 = vld [vmem:[%s24996_s8 + $0x68] sm:$0xff]  ;;  %v20232_v26 = vand.u32 4294901760, %v26568_v49 }
 0x216   : > { %21982 = vst.msk [vmem:[%s26000_s11 + $0x48] sm:$0xff] %vm372_vm1, %v21966_v22  ;;  %v12346_v25 = vpop.f32.mrf.mxu1  ;;  %24036 = vmatmul.mubr.f32.vlgmr.msra.gmra.mxu1 %v19334_v61  ;;  %24043 = vmatprep.subr.mxu1 %v24266_v0 }
 0x217   : > { %v12272_v14 = vpop.f32.mrf.mxu0  ;;  %24031 = vmatmul.mubr.f32.vlgmr.msra.gmra.mxu0 %v26452_v29  ;;  %24044 = vmatpush3.msra.mxu1 %v26422_v23  ;;  %v26560_v29 = vsub.f32 %v14769_v19, %v26538_v11  ;;  %v19785_v23 = vand.u32 4294901760, %v19784_v45 }
 0x218   : > { %v12273_v10 = vadd.f32 %v12272_v14, %v12199_v30  ;;  %24039 = vmatpush3.msra.mxu0 %v19375_v48  ;;  %v23557_v58 = vpop.f32.mrf.mxu1  ;;  %24040 = vmatprep.mubr.msk.f32.mxu0 %vm24267_vm0, %v24266_v0 }
 0x219   : > { %v23552_v24 = vpop.f32.mrf.mxu0  ;;  %24045 = vmatprep.mubr.msk.f32.mxu1 %vm24267_vm0, %v24266_v0  ;;  %24048 = vmatprep.subr.mxu0 %v24266_v0  ;;  %v20273_v19 = vand.u32 4294901760, %v26560_v29 }
 0x21a   : > { %v12347_v61 = vadd.f32 %v12346_v25, %v12273_v10  ;;  %v12492_v48 = vpop.f32.mrf.mxu1  ;;  %24046 = vmatmul.mubr.f32.vlgmr.msra.gmra.mxu1 %v26429_v53  ;;  %24053 = vmatprep.subr.mxu1 %v24266_v0  ;;  %v26603_v24 = vand.u32 4294901760, %v20611_v32 }
 0x21b   : > { %v12420_v33 = vpop.f32.mrf.mxu0  ;;  %24041 = vmatmul.mubr.f32.vlgmr.msra.gmra.mxu0 %v26429_v53  ;;  %24054 = vmatpush3.msra.mxu1 %v19826_v16  ;;  %v14770_v53 = vadd.f32 %v24253_v12, %v24252_v60  ;;  %v20274_v45 = vsub.f32 %v26560_v29, %v20273_v19 }
 0x21c   : > { %v12421_v57 = vadd.f32 %v12420_v33, %v12347_v61  ;;  %24049 = vmatpush3.msra.mxu0 %v26480_v47  ;;  %v23567_v36 = vpop.f32.mrf.mxu1  ;;  %24050 = vmatprep.mubr.msk.f32.mxu0 %vm24267_vm0, %v24266_v0  ;;  %v20233_v61 = vsub.f32 %v26568_v49, %v20232_v26 }
 0x21d   : > { %v23562_v3 = vpop.f32.mrf.mxu0  ;;  %24055 = vmatprep.mubr.msk.f32.mxu1 %vm24267_vm0, %v24266_v0  ;;  %24058 = vmatprep.subr.mxu0 %v24266_v0  ;;  %v26596_v10 = vand.u32 4294901760, %v14770_v53 }
 0x21e   : > { %v26577_v22 = vadd.f32 %v12492_v48, %v12421_v57  ;;  %v12647_v43 = vpop.f32.mrf.mxu1  ;;  %24056 = vmatmul.mubr.f32.vlgmr.msra.gmra.mxu1 %v26487_v34  ;;  %24063 = vmatprep.subr.mxu1 %v24266_v0  ;;  %v20275_v57 = vand.u32 4294901760, %v20274_v45  ;;  %v26626_v3 = vsub.f32 %v20611_v32, %v26603_v24  ;;  %v21060_v45 = vsel %vm372_vm1, %v24597_v46, 0 }
 0x21f   : > { %v12571_v9 = vpop.f32.mrf.mxu0  ;;  %24051 = vmatmul.mubr.f32.vlgmr.msra.gmra.mxu0 %v19785_v23  ;;  %24064 = vmatpush3.msra.mxu1 %v26480_v47 }
 0x220   : > { %v21967_v30 = vsub.f32 %v25666_v6, %v26577_v22  ;;  %24059 = vmatpush3.msra.mxu0 %v26502_v13  ;;  %v23577_v25 = vpop.f32.mrf.mxu1  ;;  %24060 = vmatprep.mubr.msk.f32.mxu0 %vm24267_vm0, %v24266_v0  ;;  %v12648_v38 = vadd.f32 %v12647_v43, %v12571_v9  ;;  %v24254_v9 = vld [vmem:[%s24318_s24 + $0x70] sm:$0xff] }
 0x221   : > { %v23572_v14 = vpop.f32.mrf.mxu0  ;;  %24065 = vmatprep.mubr.msk.f32.mxu1 %vm24267_vm0, %v24266_v0  ;;  %24068 = vmatprep.subr.mxu0 %v24266_v0  ;;  %v24255_v43 = vld [vmem:[%s24996_s8 + $0x70] sm:$0xff]  ;;  %v20681_v25 = vand.u32 4294901760, %v26626_v3 }
 0x222   : > { %21983 = vst.msk [vmem:[%s26000_s11 + $0x50] sm:$0xff] %vm372_vm1, %v21967_v30  ;;  %v12795_v16 = vpop.f32.mrf.mxu1  ;;  %24066 = vmatmul.mubr.f32.vlgmr.msra.gmra.mxu1 %v19783_v20  ;;  %24073 = vmatprep.subr.mxu1 %v24266_v0 }
 0x223   : > { %v12721_v58 = vpop.f32.mrf.mxu0  ;;  %24061 = vmatmul.mubr.f32.vlgmr.msra.gmra.mxu0 %v26510_v8  ;;  %24074 = vmatpush3.msra.mxu1 %v26480_v47  ;;  %v26618_v8 = vsub.f32 %v14770_v53, %v26596_v10  ;;  %v20234_v47 = vand.u32 4294901760, %v20233_v61 }
 0x224   : > { %v12722_v33 = vadd.f32 %v12721_v58, %v12648_v38  ;;  %24069 = vmatpush3.msra.mxu0 %v19824_v5  ;;  %v23587_v23 = vpop.f32.mrf.mxu1  ;;  %24070 = vmatprep.mubr.msk.f32.mxu0 %vm24267_vm0, %v24266_v0 }
 0x225   : > { %v23582_v48 = vpop.f32.mrf.mxu0  ;;  %24075 = vmatprep.mubr.msk.f32.mxu1 %vm24267_vm0, %v24266_v0  ;;  %24078 = vmatprep.subr.mxu0 %v24266_v0  ;;  %v20722_v53 = vand.u32 4294901760, %v26618_v8 }
 0x226   : > { %v12796_v20 = vadd.f32 %v12795_v16, %v12722_v33  ;;  %v12941_v5 = vpop.f32.mrf.mxu1  ;;  %24076 = vmatmul.mubr.f32.vlgmr.msra.gmra.mxu1 %v26487_v34  ;;  %24083 = vmatprep.subr.mxu1 %v24266_v0  ;;  %v26661_v48 = vand.u32 4294901760, %v21060_v45 }
 0x227   : > { %v12869_v13 = vpop.f32.mrf.mxu0  ;;  %24071 = vmatmul.mubr.f32.vlgmr.msra.gmra.mxu0 %v26487_v34  ;;  %24084 = vmatpush3.msra.mxu1 %v20275_v57  ;;  %v14771_v34 = vadd.f32 %v24255_v43, %v24254_v9  ;;  %v20723_v61 = vsub.f32 %v26618_v8, %v20722_v53 }
 0x228   : > { %v12870_v36 = vadd.f32 %v12869_v13, %v12796_v20  ;;  %24079 = vmatpush3.msra.mxu0 %v26538_v11  ;;  %v23597_v12 = vpop.f32.mrf.mxu1  ;;  %24080 = vmatprep.mubr.msk.f32.mxu0 %vm24267_vm0, %v24266_v0  ;;  %v20682_v20 = vsub.f32 %v26626_v3, %v20681_v25 }
 0x229   : > { %v23592_v60 = vpop.f32.mrf.mxu0  ;;  %24085 = vmatprep.mubr.msk.f32.mxu1 %vm24267_vm0, %v24266_v0  ;;  %24088 = vmatprep.subr.mxu0 %v24266_v0  ;;  %v26654_v33 = vand.u32 4294901760, %v14771_v34 }
 0x22a   : > { %v26635_v30 = vadd.f32 %v12941_v5, %v12870_v36  ;;  %v13096_v14 = vpop.f32.mrf.mxu1  ;;  %24086 = vmatmul.mubr.f32.vlgmr.msra.gmra.mxu1 %v26545_v39  ;;  %24093 = vmatprep.subr.mxu1 %v24266_v0  ;;  %v20724_v36 = vand.u32 4294901760, %v20723_v61  ;;  %v26684_v60 = vsub.f32 %v21060_v45, %v26661_v48  ;;  %v21509_v61 = vsel %vm372_vm1, %v24633_v1, 0 }
 0x22b   : > { %v13020_v32 = vpop.f32.mrf.mxu0  ;;  %24081 = vmatmul.mubr.f32.vlgmr.msra.gmra.mxu0 %v20234_v47  ;;  %24094 = vmatpush3.msra.mxu1 %v26538_v11 }
 0x22c   : > { %v21968_v38 = vsub.f32 %v25719_v4, %v26635_v30  ;;  %24089 = vmatpush3.msra.mxu0 %v26560_v29  ;;  %v23607_v16 = vpop.f32.mrf.mxu1  ;;  %24090 = vmatprep.mubr.msk.f32.mxu0 %vm24267_vm0, %v24266_v0  ;;  %v13097_v46 = vadd.f32 %v13096_v14, %v13020_v32  ;;  %v24256_v32 = vld [vmem:[%s24318_s24 + $0x78] sm:$0xff] }
 0x22d   : > { %v23602_v58 = vpop.f32.mrf.mxu0  ;;  %24095 = vmatprep.mubr.msk.f32.mxu1 %vm24267_vm0, %v24266_v0  ;;  %24098 = vmatprep.subr.mxu0 %v24266_v0  ;;  %v24257_v14 = vld [vmem:[%s24996_s8 + $0x78] sm:$0xff]  ;;  %v21130_v16 = vand.u32 4294901760, %v26684_v60 }
 0x22e   : > { %21984 = vst.msk [vmem:[%s26000_s11 + $0x58] sm:$0xff] %vm372_vm1, %v21968_v38  ;;  %v13244_v57 = vpop.f32.mrf.mxu1  ;;  %24096 = vmatmul.mubr.f32.vlgmr.msra.gmra.mxu1 %v20232_v26  ;;  %24103 = vmatprep.subr.mxu1 %v24266_v0 }
 0x22f   : > { %v13170_v23 = vpop.f32.mrf.mxu0  ;;  %24091 = vmatmul.mubr.f32.vlgmr.msra.gmra.mxu0 %v26568_v49  ;;  %24104 = vmatpush3.msra.mxu1 %v26538_v11  ;;  %v26676_v49 = vsub.f32 %v14771_v34, %v26654_v33  ;;  %v20683_v11 = vand.u32 4294901760, %v20682_v20 }
 0x230   : > { %v13171_v13 = vadd.f32 %v13170_v23, %v13097_v46  ;;  %24099 = vmatpush3.msra.mxu0 %v20273_v19  ;;  %v23617_v47 = vpop.f32.mrf.mxu1  ;;  %24100 = vmatprep.mubr.msk.f32.mxu0 %vm24267_vm0, %v24266_v0 }
 0x231   : > { %v23612_v5 = vpop.f32.mrf.mxu0  ;;  %24105 = vmatprep.mubr.msk.f32.mxu1 %vm24267_vm0, %v24266_v0  ;;  %24108 = vmatprep.subr.mxu0 %v24266_v0  ;;  %v21171_v34 = vand.u32 4294901760, %v26676_v49 }
 0x232   : > { %v13245_v26 = vadd.f32 %v13244_v57, %v13171_v13  ;;  %v13390_v19 = vpop.f32.mrf.mxu1  ;;  %24106 = vmatmul.mubr.f32.vlgmr.msra.gmra.mxu1 %v26545_v39  ;;  %24113 = vmatprep.subr.mxu1 %v24266_v0  ;;  %v26719_v5 = vand.u32 4294901760, %v21509_v61 }
 0x233   : > { %v13318_v29 = vpop.f32.mrf.mxu0  ;;  %24101 = vmatmul.mubr.f32.vlgmr.msra.gmra.mxu0 %v26545_v39  ;;  %24114 = vmatpush3.msra.mxu1 %v20724_v36  ;;  %v14772_v39 = vadd.f32 %v24257_v14, %v24256_v32  ;;  %v21172_v20 = vsub.f32 %v26676_v49, %v21171_v34 }
 0x234   : > { %v13319_v12 = vadd.f32 %v13318_v29, %v13245_v26  ;;  %24109 = vmatpush3.msra.mxu0 %v26596_v10  ;;  %v23627_v43 = vpop.f32.mrf.mxu1  ;;  %24110 = vmatprep.mubr.msk.f32.mxu0 %vm24267_vm0, %v24266_v0  ;;  %v21131_v26 = vsub.f32 %v26684_v60, %v21130_v16 }
 0x235   : > { %v23622_v9 = vpop.f32.mrf.mxu0  ;;  %24115 = vmatprep.mubr.msk.f32.mxu1 %vm24267_vm0, %v24266_v0  ;;  %24118 = vmatprep.subr.mxu0 %v24266_v0  ;;  %v26712_v13 = vand.u32 4294901760, %v14772_v39 }
 0x236   : > { %v26693_v38 = vadd.f32 %v13390_v19, %v13319_v12  ;;  %v13545_v58 = vpop.f32.mrf.mxu1  ;;  %24116 = vmatmul.mubr.f32.vlgmr.msra.gmra.mxu1 %v26603_v24  ;;  %24123 = vmatprep.subr.mxu1 %v24266_v0  ;;  %v21173_v12 = vand.u32 4294901760, %v21172_v20  ;;  %v26742_v9 = vsub.f32 %v21509_v61, %v26719_v5 }
 0x237   : > { %v13469_v45 = vpop.f32.mrf.mxu0  ;;  %24111 = vmatmul.mubr.f32.vlgmr.msra.gmra.mxu0 %v20683_v11  ;;  %24124 = vmatpush3.msra.mxu1 %v26596_v10 }
 0x238   : > { %v21969_v46 = vsub.f32 %v25772_v41, %v26693_v38  ;;  %24119 = vmatpush3.msra.mxu0 %v26618_v8  ;;  %v23637_v57 = vpop.f32.mrf.mxu1  ;;  %24120 = vmatprep.mubr.msk.f32.mxu0 %vm24267_vm0, %v24266_v0  ;;  %v13546_v1 = vadd.f32 %v13545_v58, %v13469_v45  ;;  %v21579_v61 = vand.u32 4294901760, %v26742_v9 }
 0x239   : > { %v23632_v23 = vpop.f32.mrf.mxu0  ;;  %24125 = vmatprep.mubr.msk.f32.mxu1 %vm24267_vm0, %v24266_v0  ;;  %24128 = vmatprep.subr.mxu0 %v24266_v0 }
 0x23a   : > { %21985 = vst.msk [vmem:[%s26000_s11 + $0x60] sm:$0xff] %vm372_vm1, %v21969_v46  ;;  %v13693_v36 = vpop.f32.mrf.mxu1  ;;  %24126 = vmatmul.mubr.f32.vlgmr.msra.gmra.mxu1 %v20681_v25  ;;  %24133 = vmatprep.subr.mxu1 %v24266_v0 }
 0x23b   : > { %v13619_v47 = vpop.f32.mrf.mxu0  ;;  %24121 = vmatmul.mubr.f32.vlgmr.msra.gmra.mxu0 %v26626_v3  ;;  %24134 = vmatpush3.msra.mxu1 %v26596_v10  ;;  %v26734_v3 = vsub.f32 %v14772_v39, %v26712_v13  ;;  %v21132_v10 = vand.u32 4294901760, %v21131_v26  ;;  %v21580_v26 = vsub.f32 %v26742_v9, %v21579_v61 }
 0x23c   : > { %v13620_v29 = vadd.f32 %v13619_v47, %v13546_v1  ;;  %24129 = vmatpush3.msra.mxu0 %v20722_v53  ;;  %v23647_v11 = vpop.f32.mrf.mxu1  ;;  %24130 = vmatprep.mubr.msk.f32.mxu0 %vm24267_vm0, %v24266_v0 }
 0x23d   : > { %v23642_v19 = vpop.f32.mrf.mxu0  ;;  %24135 = vmatprep.mubr.msk.f32.mxu1 %vm24267_vm0, %v24266_v0  ;;  %24138 = vmatprep.subr.mxu0 %v24266_v0  ;;  %v21620_v39 = vand.u32 4294901760, %v26734_v3 }
 0x23e   : > { %v13694_v25 = vadd.f32 %v13693_v36, %v13620_v29  ;;  %v13839_v53 = vpop.f32.mrf.mxu1  ;;  %24136 = vmatmul.mubr.f32.vlgmr.msra.gmra.mxu1 %v26603_v24  ;;  %24143 = vmatprep.subr.mxu1 %v24266_v0 }
 0x23f   : > { %v13767_v8 = vpop.f32.mrf.mxu0  ;;  %24131 = vmatmul.mubr.f32.vlgmr.msra.gmra.mxu0 %v26603_v24  ;;  %24144 = vmatpush3.msra.mxu1 %v21173_v12  ;;  %v21621_v20 = vsub.f32 %v26734_v3, %v21620_v39 }
 0x240   : > { %v13768_v43 = vadd.f32 %v13767_v8, %v13694_v25  ;;  %24139 = vmatpush3.msra.mxu0 %v26654_v33  ;;  %v23657_v14 = vpop.f32.mrf.mxu1  ;;  %24140 = vmatprep.mubr.msk.f32.mxu0 %vm24267_vm0, %v24266_v0 }
 0x241   : > { %v23652_v32 = vpop.f32.mrf.mxu0  ;;  %24145 = vmatprep.mubr.msk.f32.mxu1 %vm24267_vm0, %v24266_v0  ;;  %24148 = vmatprep.subr.mxu0 %v24266_v0  ;;  %v21622_v12 = vand.u32 4294901760, %v21621_v20 }
 0x242   : > { %v26749_v45 = vadd.f32 %v13839_v53, %v13768_v43  ;;  %v13994_v58 = vpop.f32.mrf.mxu1  ;;  %24146 = vmatmul.mubr.f32.vlgmr.msra.gmra.mxu1 %v26661_v48  ;;  %24153 = vmatprep.subr.mxu1 %v24266_v0 }
 0x243   : > { %v13918_v24 = vpop.f32.mrf.mxu0  ;;  %24141 = vmatmul.mubr.f32.vlgmr.msra.gmra.mxu0 %v21132_v10  ;;  %24154 = vmatpush3.msra.mxu1 %v26654_v33 }
 0x244   : > { %v21970_v46 = vsub.f32 %v25827_v31, %v26749_v45  ;;  %24149 = vmatpush3.msra.mxu0 %v26676_v49  ;;  %v23667_v57 = vpop.f32.mrf.mxu1  ;;  %24150 = vmatprep.mubr.msk.f32.mxu0 %vm24267_vm0, %v24266_v0  ;;  %v13995_v1 = vadd.f32 %v13994_v58, %v13918_v24  ;;  %v21581_v49 = vand.u32 4294901760, %v21580_v26 }
 0x245   : > { %v23662_v23 = vpop.f32.mrf.mxu0  ;;  %24155 = vmatprep.mubr.msk.f32.mxu1 %vm24267_vm0, %v24266_v0  ;;  %24158 = vmatprep.subr.mxu0 %v24266_v0 }
 0x246   : > { %21986 = vst.msk [vmem:[%s26000_s11 + $0x68] sm:$0xff] %vm372_vm1, %v21970_v46  ;;  %v14142_v36 = vpop.f32.mrf.mxu1  ;;  %24156 = vmatmul.mubr.f32.vlgmr.msra.gmra.mxu1 %v21130_v16  ;;  %24163 = vmatprep.subr.mxu1 %v24266_v0 }
 0x247   : > { %v14068_v47 = vpop.f32.mrf.mxu0  ;;  %24151 = vmatmul.mubr.f32.vlgmr.msra.gmra.mxu0 %v26684_v60  ;;  %24164 = vmatpush3.msra.mxu1 %v26654_v33 }
 0x248   : > { %v14069_v29 = vadd.f32 %v14068_v47, %v13995_v1  ;;  %24159 = vmatpush3.msra.mxu0 %v21171_v34  ;;  %v23677_v11 = vpop.f32.mrf.mxu1  ;;  %24160 = vmatprep.mubr.msk.f32.mxu0 %vm24267_vm0, %v24266_v0 }
 0x249   : > { %v23672_v19 = vpop.f32.mrf.mxu0  ;;  %24165 = vmatprep.mubr.msk.f32.mxu1 %vm24267_vm0, %v24266_v0  ;;  %24168 = vmatprep.subr.mxu0 %v24266_v0 }
 0x24a   : > { %v14143_v25 = vadd.f32 %v14142_v36, %v14069_v29  ;;  %v14288_v16 = vpop.f32.mrf.mxu1  ;;  %24166 = vmatmul.mubr.f32.vlgmr.msra.gmra.mxu1 %v26661_v48  ;;  %24173 = vmatprep.subr.mxu1 %v24266_v0 }
 0x24b   : > { %v14216_v60 = vpop.f32.mrf.mxu0  ;;  %24161 = vmatmul.mubr.f32.vlgmr.msra.gmra.mxu0 %v26661_v48  ;;  %24174 = vmatpush3.msra.mxu1 %v21622_v12 }
 0x24c   : > { %v14217_v34 = vadd.f32 %v14216_v60, %v14143_v25  ;;  %24169 = vmatpush3.msra.mxu0 %v26712_v13  ;;  %v23687_v8 = vpop.f32.mrf.mxu1  ;;  %24170 = vmatprep.mubr.msk.f32.mxu0 %vm24267_vm0, %v24266_v0 }
 0x24d   : > { %v23682_v33 = vpop.f32.mrf.mxu0  ;;  %24175 = vmatprep.mubr.msk.f32.mxu1 %vm24267_vm0, %v24266_v0  ;;  %24178 = vmatprep.subr.mxu0 %v24266_v0 }
 0x24e   : > { %v26790_v53 = vadd.f32 %v14288_v16, %v14217_v34  ;;  %v14443_v10 = vpop.f32.mrf.mxu1  ;;  %24176 = vmatmul.mubr.f32.vlgmr.msra.gmra.mxu1 %v26719_v5  ;;  %24183 = vmatprep.subr.mxu1 %v24266_v0 }
 0x24f   : > { %v14367_v48 = vpop.f32.mrf.mxu0  ;;  %24171 = vmatmul.mubr.f32.vlgmr.msra.gmra.mxu0 %v21581_v49  ;;  %24184 = vmatpush3.msra.mxu1 %v26712_v13 }
 0x250   : > { %v21971_v43 = vsub.f32 %v25883_v18, %v26790_v53  ;;  %24179 = vmatpush3.msra.mxu0 %v26734_v3  ;;  %v23697_v14 = vpop.f32.mrf.mxu1  ;;  %24180 = vmatprep.mubr.msk.f32.mxu0 %vm24267_vm0, %v24266_v0  ;;  %v14444_v24 = vadd.f32 %v14443_v10, %v14367_v48 }
 0x251   : > { %v23692_v32 = vpop.f32.mrf.mxu0  ;;  %24185 = vmatprep.mubr.msk.f32.mxu1 %vm24267_vm0, %v24266_v0  ;;  %24188 = vmatprep.subr.mxu0 %v24266_v0 }
 0x252   : > { %21987 = vst.msk [vmem:[%s26000_s11 + $0x70] sm:$0xff] %vm372_vm1, %v21971_v43  ;;  %v14591_v46 = vpop.f32.mrf.mxu1  ;;  %24186 = vmatmul.mubr.f32.vlgmr.msra.gmra.mxu1 %v21579_v61  ;;  %24193 = vmatprep.subr.mxu1 %v24266_v0 }
 0x253   : > { %v14517_v58 = vpop.f32.mrf.mxu0  ;;  %24181 = vmatmul.mubr.f32.vlgmr.msra.gmra.mxu0 %v26742_v9  ;;  %24194 = vmatpush3.msra.mxu1 %v26712_v13 }
 0x254   : > { %v14518_v23 = vadd.f32 %v14517_v58, %v14444_v24  ;;  %24189 = vmatpush3.msra.mxu0 %v21620_v39  ;;  %v23707_v20 = vpop.f32.mrf.mxu1  ;;  %24190 = vmatprep.mubr.msk.f32.mxu0 %vm24267_vm0, %v24266_v0 }
 0x255   : > { %v23702_v57 = vpop.f32.mrf.mxu0  ;;  %24195 = vmatprep.mubr.msk.f32.mxu1 %vm24267_vm0, %v24266_v0 }
 0x256   : > { %v14592_v1 = vadd.f32 %v14591_v46, %v14518_v23  ;;  %v14737_v61 = vpop.f32.mrf.mxu1  ;;  %24196 = vmatmul.mubr.f32.vlgmr.msra.gmra.mxu1 %v26719_v5 }
 0x257   : > { %v14665_v9 = vpop.f32.mrf.mxu0  ;;  %24191 = vmatmul.mubr.f32.vlgmr.msra.gmra.mxu0 %v26719_v5 }
 0x258   : > { %v14666_v3 = vadd.f32 %v14665_v9, %v14592_v1  ;;  %v23717_v47 = vpop.f32.mrf.mxu1 }
 0x259   : > { %v23712_v39 = vpop.f32.mrf.mxu0 }
 0x25a   : > { %v26819_v36 = vadd.f32 %v14737_v61, %v14666_v3  ;;  %v14924_v26 = vpop.f32.mrf.mxu1 }
 0x25b   : > { %v14848_v13 = vpop.f32.mrf.mxu0 }
 0x25c   : > { %v21972_v29 = vsub.f32 %v25938_v54, %v26819_v36  ;;  %v23727_v11 = vpop.f32.mrf.mxu1  ;;  %v14925_v0 = vadd.f32 %v14924_v26, %v14848_v13 }
 0x25d   : > { %v23722_v19 = vpop.f32.mrf.mxu0 }
 0x25e   : > { %21988 = vst.msk [vmem:[%s26000_s11 + $0x78] sm:$0xff] %vm372_vm1, %v21972_v29  ;;  %v15072_v25 = vpop.f32.mrf.mxu1 }
 0x25f   : > { %v14998_v12 = vpop.f32.mrf.mxu0 }
 0x260   : > { %v14999_v60 = vadd.f32 %v14998_v12, %v14925_v0  ;;  %v23737_v16 = vpop.f32.mrf.mxu1 }
 0x261   : > { %v23732_v5 = vpop.f32.mrf.mxu0 }
 0x262   : > { %v15073_v49 = vadd.f32 %v15072_v25, %v14999_v60  ;;  %v15218_v33 = vpop.f32.mrf.mxu1 }
 0x263   : > { %v15146_v34 = vpop.f32.mrf.mxu0 }
 0x264   : > { %v15147_v8 = vadd.f32 %v15146_v34, %v15073_v49  ;;  %v23747_v10 = vpop.f32.mrf.mxu1 }
 0x265   : > { %v23742_v48 = vpop.f32.mrf.mxu0 }
 0x266   : > { %v15219_v43 = vadd.f32 %v15218_v33, %v15147_v8  ;;  %v15373_v14 = vpop.f32.mrf.mxu1 }
 0x267   : > { %v15297_v32 = vpop.f32.mrf.mxu0 }
 0x268   : > { %v21989_v24 = vsub.f32 %v15219_v43, %v25136_v37  ;;  %v23757_v46 = vpop.f32.mrf.mxu1  ;;  %v15374_v57 = vadd.f32 %v15373_v14, %v15297_v32 }
 0x269   : > { %v23752_v58 = vpop.f32.mrf.mxu0 }
 0x26a   : > { %v22005_v23 = vsub.f32 %v21989_v24, %v25991_v44  ;;  %v15521_v1 = vpop.f32.mrf.mxu1 }
 0x26b   : > { %v15447_v20 = vpop.f32.mrf.mxu0 }
 0x26c   : > { %22021 = vst.msk [vmem:[%s26830_s14] sm:$0xff] %vm372_vm1, %v22005_v23  ;;  %v15448_v9 = vadd.f32 %v15447_v20, %v15374_v57  ;;  %v23767_v3 = vpop.f32.mrf.mxu1 }
 0x26d   : > { %v23762_v61 = vpop.f32.mrf.mxu0 }
 0x26e   : > { %v15522_v39 = vadd.f32 %v15521_v1, %v15448_v9  ;;  %v15667_v47 = vpop.f32.mrf.mxu1 }
 0x26f   : > { %v15595_v37 = vpop.f32.mrf.mxu0 }
 0x270   : > { %v15596_v13 = vadd.f32 %v15595_v37, %v15522_v39  ;;  %v23777_v29 = vpop.f32.mrf.mxu1 }
 0x271   : > { %v23772_v26 = vpop.f32.mrf.mxu0 }
 0x272   : > { %v15668_v19 = vadd.f32 %v15667_v47, %v15596_v13  ;;  %v15822_v0 = vpop.f32.mrf.mxu1 }
 0x273   : > { %v15746_v11 = vpop.f32.mrf.mxu0 }
 0x274   : > { %v21990_v44 = vsub.f32 %v15668_v19, %v25189_v17  ;;  %v23787_v25 = vpop.f32.mrf.mxu1  ;;  %v15823_v5 = vadd.f32 %v15822_v0, %v15746_v11 }
 0x275   : > { %v23782_v12 = vpop.f32.mrf.mxu0 }
 0x276   : > { %v22006_v60 = vsub.f32 %v21990_v44, %v26055_v55  ;;  %v15970_v49 = vpop.f32.mrf.mxu1 }
 0x277   : > { %v15896_v16 = vpop.f32.mrf.mxu0 }
 0x278   : > { %22022 = vst.msk [vmem:[%s26830_s14 + $0x8] sm:$0xff] %vm372_vm1, %v22006_v60  ;;  %v15897_v34 = vadd.f32 %v15896_v16, %v15823_v5  ;;  %v23797_v8 = vpop.f32.mrf.mxu1 }
 0x279   : > { %v23792_v33 = vpop.f32.mrf.mxu0 }
 0x27a   : > { %v15971_v48 = vadd.f32 %v15970_v49, %v15897_v34  ;;  %v16116_v43 = vpop.f32.mrf.mxu1 }
 0x27b   : > { %v16044_v10 = vpop.f32.mrf.mxu0 }
 0x27c   : > { %v16045_v32 = vadd.f32 %v16044_v10, %v15971_v48  ;;  %v23807_v24 = vpop.f32.mrf.mxu1 }
 0x27d   : > { %v23802_v14 = vpop.f32.mrf.mxu0 }
 0x27e   : > { %v16117_v17 = vadd.f32 %v16116_v43, %v16045_v32  ;;  %v16271_v46 = vpop.f32.mrf.mxu1 }
 0x27f   : > { %v16195_v58 = vpop.f32.mrf.mxu0 }
 0x280   : > { %v21991_v55 = vsub.f32 %v16117_v17, %v25242_v2  ;;  %v23817_v57 = vpop.f32.mrf.mxu1  ;;  %v16272_v1 = vadd.f32 %v16271_v46, %v16195_v58 }
 0x281   : > { %v23812_v23 = vpop.f32.mrf.mxu0 }
 0x282   : > { %v22007_v20 = vsub.f32 %v21991_v55, %v26113_v28  ;;  %v16419_v61 = vpop.f32.mrf.mxu1 }
 0x283   : > { %v16345_v9 = vpop.f32.mrf.mxu0 }
 0x284   : > { %22023 = vst.msk [vmem:[%s26830_s14 + $0x10] sm:$0xff] %vm372_vm1, %v22007_v20  ;;  %v16346_v3 = vadd.f32 %v16345_v9, %v16272_v1  ;;  %v23827_v37 = vpop.f32.mrf.mxu1 }
 0x285   : > { %v23822_v39 = vpop.f32.mrf.mxu0 }
 0x286   : > { %v16420_v47 = vadd.f32 %v16419_v61, %v16346_v3  ;;  %v16565_v26 = vpop.f32.mrf.mxu1 }
 0x287   : > { %v16493_v13 = vpop.f32.mrf.mxu0 }
 0x288   : > { %v16494_v29 = vadd.f32 %v16493_v13, %v16420_v47  ;;  %v23837_v11 = vpop.f32.mrf.mxu1 }
 0x289   : > { %v23832_v19 = vpop.f32.mrf.mxu0 }
 0x28a   : > { %v16566_v2 = vadd.f32 %v16565_v26, %v16494_v29  ;;  %v16720_v44 = vpop.f32.mrf.mxu1 }
 0x28b   : > { %v16644_v0 = vpop.f32.mrf.mxu0 }
 0x28c   : > { %v21992_v28 = vsub.f32 %v16566_v2, %v25295_v40  ;;  %v23847_v25 = vpop.f32.mrf.mxu1  ;;  %v16721_v5 = vadd.f32 %v16720_v44, %v16644_v0 }
 0x28d   : > { %v23842_v12 = vpop.f32.mrf.mxu0 }
 0x28e   : > { %v22008_v60 = vsub.f32 %v21992_v28, %v26171_v35  ;;  %v16868_v49 = vpop.f32.mrf.mxu1 }
 0x28f   : > { %v16794_v16 = vpop.f32.mrf.mxu0 }
 0x290   : > { %22024 = vst.msk [vmem:[%s26830_s14 + $0x18] sm:$0xff] %vm372_vm1, %v22008_v60  ;;  %v16795_v34 = vadd.f32 %v16794_v16, %v16721_v5  ;;  %v23857_v8 = vpop.f32.mrf.mxu1 }
 0x291   : > { %v23852_v33 = vpop.f32.mrf.mxu0 }
 0x292   : > { %v16869_v48 = vadd.f32 %v16868_v49, %v16795_v34  ;;  %v17014_v43 = vpop.f32.mrf.mxu1 }
 0x293   : > { %v16942_v10 = vpop.f32.mrf.mxu0 }
 0x294   : > { %v16943_v32 = vadd.f32 %v16942_v10, %v16869_v48  ;;  %v23867_v24 = vpop.f32.mrf.mxu1 }
 0x295   : > { %v23862_v14 = vpop.f32.mrf.mxu0 }
 0x296   : > { %v17015_v40 = vadd.f32 %v17014_v43, %v16943_v32  ;;  %v17169_v58 = vpop.f32.mrf.mxu1 }
 0x297   : > { %v17093_v17 = vpop.f32.mrf.mxu0 }
 0x298   : > { %v21993_v35 = vsub.f32 %v17015_v40, %v25348_v59  ;;  %v23877_v55 = vpop.f32.mrf.mxu1  ;;  %v17170_v57 = vadd.f32 %v17169_v58, %v17093_v17 }
 0x299   : > { %v23872_v46 = vpop.f32.mrf.mxu0 }
 0x29a   : > { %v22009_v23 = vsub.f32 %v21993_v35, %v26229_v42  ;;  %v17317_v1 = vpop.f32.mrf.mxu1 }
 0x29b   : > { %v17243_v20 = vpop.f32.mrf.mxu0 }
 0x29c   : > { %22025 = vst.msk [vmem:[%s26830_s14 + $0x20] sm:$0xff] %vm372_vm1, %v22009_v23  ;;  %v17244_v9 = vadd.f32 %v17243_v20, %v17170_v57  ;;  %v23887_v3 = vpop.f32.mrf.mxu1 }
 0x29d   : > { %v23882_v61 = vpop.f32.mrf.mxu0 }
 0x29e   : > { %v17318_v39 = vadd.f32 %v17317_v1, %v17244_v9  ;;  %v17463_v47 = vpop.f32.mrf.mxu1 }
 0x29f   : > { %v17391_v37 = vpop.f32.mrf.mxu0 }
 0x2a0   : > { %v17392_v13 = vadd.f32 %v17391_v37, %v17318_v39  ;;  %v23897_v29 = vpop.f32.mrf.mxu1 }
 0x2a1   : > { %v23892_v26 = vpop.f32.mrf.mxu0 }
 0x2a2   : > { %v17464_v59 = vadd.f32 %v17463_v47, %v17392_v13  ;;  %v17618_v11 = vpop.f32.mrf.mxu1 }
 0x2a3   : > { %v17542_v19 = vpop.f32.mrf.mxu0 }
 0x2a4   : > { %v21994_v42 = vsub.f32 %v17464_v59, %v25401_v62  ;;  %v23907_v0 = vpop.f32.mrf.mxu1  ;;  %v17619_v28 = vadd.f32 %v17618_v11, %v17542_v19 }
 0x2a5   : > { %v23902_v2 = vpop.f32.mrf.mxu0 }
 0x2a6   : > { %v22010_v44 = vsub.f32 %v21994_v42, %v26287_v50  ;;  %v17766_v25 = vpop.f32.mrf.mxu1 }
 0x2a7   : > { %v17692_v12 = vpop.f32.mrf.mxu0 }
 0x2a8   : > { %22026 = vst.msk [vmem:[%s26830_s14 + $0x28] sm:$0xff] %vm372_vm1, %v22010_v44  ;;  %v17693_v60 = vadd.f32 %v17692_v12, %v17619_v28  ;;  %v23917_v16 = vpop.f32.mrf.mxu1 }
 0x2a9   : > { %v23912_v5 = vpop.f32.mrf.mxu0 }
 0x2aa   : > { %v17767_v49 = vadd.f32 %v17766_v25, %v17693_v60  ;;  %v17912_v33 = vpop.f32.mrf.mxu1 }
 0x2ab   : > { %v17840_v34 = vpop.f32.mrf.mxu0 }
 0x2ac   : > { %v17841_v8 = vadd.f32 %v17840_v34, %v17767_v49  ;;  %v23927_v10 = vpop.f32.mrf.mxu1 }
 0x2ad   : > { %v23922_v48 = vpop.f32.mrf.mxu0 }
 0x2ae   : > { %v17913_v62 = vadd.f32 %v17912_v33, %v17841_v8  ;;  %v18067_v32 = vpop.f32.mrf.mxu1 }
 0x2af   : > { %v17991_v43 = vpop.f32.mrf.mxu0 }
 0x2b0   : > { %v21995_v50 = vsub.f32 %v17913_v62, %v25454_v52  ;;  %v23937_v24 = vpop.f32.mrf.mxu1  ;;  %v18068_v17 = vadd.f32 %v18067_v32, %v17991_v43 }
 0x2b1   : > { %v23932_v14 = vpop.f32.mrf.mxu0 }
 0x2b2   : > { %v22011_v40 = vsub.f32 %v21995_v50, %v26345_v56  ;;  %v18215_v35 = vpop.f32.mrf.mxu1 }
 0x2b3   : > { %v18141_v58 = vpop.f32.mrf.mxu0 }
 0x2b4   : > { %22027 = vst.msk [vmem:[%s26830_s14 + $0x30] sm:$0xff] %vm372_vm1, %v22011_v40  ;;  %v18142_v46 = vadd.f32 %v18141_v58, %v18068_v17  ;;  %v23947_v23 = vpop.f32.mrf.mxu1 }
 0x2b5   : > { %v23942_v55 = vpop.f32.mrf.mxu0 }
 0x2b6   : > { %v18216_v57 = vadd.f32 %v18215_v35, %v18142_v46  ;;  %v18361_v1 = vpop.f32.mrf.mxu1 }
 0x2b7   : > { %v18289_v20 = vpop.f32.mrf.mxu0 }
 0x2b8   : > { %v18290_v9 = vadd.f32 %v18289_v20, %v18216_v57  ;;  %v23957_v3 = vpop.f32.mrf.mxu1 }
 0x2b9   : > { %v23952_v61 = vpop.f32.mrf.mxu0 }
 0x2ba   : > { %v18362_v52 = vadd.f32 %v18361_v1, %v18290_v9  ;;  %v18516_v37 = vpop.f32.mrf.mxu1 }
 0x2bb   : > { %v18440_v39 = vpop.f32.mrf.mxu0 }
 0x2bc   : > { %v21996_v56 = vsub.f32 %v18362_v52, %v25507_v21  ;;  %v23967_v13 = vpop.f32.mrf.mxu1  ;;  %v18517_v29 = vadd.f32 %v18516_v37, %v18440_v39 }
 0x2bd   : > { %v23962_v47 = vpop.f32.mrf.mxu0 }
 0x2be   : > { %v22012_v26 = vsub.f32 %v21996_v56, %v26403_v63  ;;  %v18664_v19 = vpop.f32.mrf.mxu1 }
 0x2bf   : > { %v18590_v59 = vpop.f32.mrf.mxu0 }
 0x2c0   : > { %22028 = vst.msk [vmem:[%s26830_s14 + $0x38] sm:$0xff] %vm372_vm1, %v22012_v26  ;;  %v18591_v11 = vadd.f32 %v18590_v59, %v18517_v29  ;;  %v23977_v2 = vpop.f32.mrf.mxu1 }
 0x2c1   : > { %v23972_v42 = vpop.f32.mrf.mxu0 }
 0x2c2   : > { %v18665_v0 = vadd.f32 %v18664_v19, %v18591_v11  ;;  %v18810_v28 = vpop.f32.mrf.mxu1 }
 0x2c3   : > { %v18738_v44 = vpop.f32.mrf.mxu0 }
 0x2c4   : > { %v18739_v12 = vadd.f32 %v18738_v44, %v18665_v0  ;;  %v23987_v60 = vpop.f32.mrf.mxu1 }
 0x2c5   : > { %v23982_v25 = vpop.f32.mrf.mxu0 }
 0x2c6   : > { %v18811_v21 = vadd.f32 %v18810_v28, %v18739_v12  ;;  %v18965_v16 = vpop.f32.mrf.mxu1 }
 0x2c7   : > { %v18889_v5 = vpop.f32.mrf.mxu0 }
 0x2c8   : > { %v21997_v63 = vsub.f32 %v18811_v21, %v25560_v27  ;;  %v23997_v34 = vpop.f32.mrf.mxu1  ;;  %v18966_v8 = vadd.f32 %v18965_v16, %v18889_v5 }
 0x2c9   : > { %v23992_v49 = vpop.f32.mrf.mxu0 }
 0x2ca   : > { %v22013_v33 = vsub.f32 %v21997_v63, %v26461_v7  ;;  %v19113_v10 = vpop.f32.mrf.mxu1 }
 0x2cb   : > { %v19039_v48 = vpop.f32.mrf.mxu0 }
 0x2cc   : > { %22029 = vst.msk [vmem:[%s26830_s14 + $0x40] sm:$0xff] %vm372_vm1, %v22013_v33  ;;  %v19040_v62 = vadd.f32 %v19039_v48, %v18966_v8  ;;  %v24007_v32 = vpop.f32.mrf.mxu1 }
 0x2cd   : > { %v24002_v43 = vpop.f32.mrf.mxu0 }
 0x2ce   : > { %v19114_v50 = vadd.f32 %v19113_v10, %v19040_v62  ;;  %v19259_v24 = vpop.f32.mrf.mxu1 }
 0x2cf   : > { %v19187_v14 = vpop.f32.mrf.mxu0 }
 0x2d0   : > { %v19188_v40 = vadd.f32 %v19187_v14, %v19114_v50  ;;  %v24017_v58 = vpop.f32.mrf.mxu1 }
 0x2d1   : > { %v24012_v17 = vpop.f32.mrf.mxu0 }
 0x2d2   : > { %v19260_v27 = vadd.f32 %v19259_v24, %v19188_v40  ;;  %v19414_v46 = vpop.f32.mrf.mxu1 }
 0x2d3   : > { %v19338_v35 = vpop.f32.mrf.mxu0 }
 0x2d4   : > { %v21998_v7 = vsub.f32 %v19260_v27, %v25613_v51  ;;  %v24027_v23 = vpop.f32.mrf.mxu1  ;;  %v19415_v20 = vadd.f32 %v19414_v46, %v19338_v35 }
 0x2d5   : > { %v24022_v55 = vpop.f32.mrf.mxu0 }
 0x2d6   : > { %v22014_v57 = vsub.f32 %v21998_v7, %v26519_v15  ;;  %v19562_v9 = vpop.f32.mrf.mxu1 }
 0x2d7   : > { %v19488_v1 = vpop.f32.mrf.mxu0 }
 0x2d8   : > { %22030 = vst.msk [vmem:[%s26830_s14 + $0x48] sm:$0xff] %vm372_vm1, %v22014_v57  ;;  %v19489_v61 = vadd.f32 %v19488_v1, %v19415_v20  ;;  %v24037_v52 = vpop.f32.mrf.mxu1 }
 0x2d9   : > { %v24032_v3 = vpop.f32.mrf.mxu0 }
 0x2da   : > { %v19563_v39 = vadd.f32 %v19562_v9, %v19489_v61  ;;  %v19708_v56 = vpop.f32.mrf.mxu1 }
 0x2db   : > { %v19636_v37 = vpop.f32.mrf.mxu0 }
 0x2dc   : > { %v19637_v47 = vadd.f32 %v19636_v37, %v19563_v39  ;;  %v24047_v26 = vpop.f32.mrf.mxu1 }
 0x2dd   : > { %v24042_v13 = vpop.f32.mrf.mxu0 }
 0x2de   : > { %v19709_v51 = vadd.f32 %v19708_v56, %v19637_v47  ;;  %v19863_v59 = vpop.f32.mrf.mxu1 }
 0x2df   : > { %v19787_v29 = vpop.f32.mrf.mxu0 }
 0x2e0   : > { %v21999_v15 = vsub.f32 %v19709_v51, %v25666_v6  ;;  %v24057_v11 = vpop.f32.mrf.mxu1  ;;  %v19864_v2 = vadd.f32 %v19863_v59, %v19787_v29 }
 0x2e1   : > { %v24052_v19 = vpop.f32.mrf.mxu0 }
 0x2e2   : > { %v22015_v42 = vsub.f32 %v21999_v15, %v26577_v22  ;;  %v20011_v44 = vpop.f32.mrf.mxu1 }
 0x2e3   : > { %v19937_v0 = vpop.f32.mrf.mxu0 }
 0x2e4   : > { %22031 = vst.msk [vmem:[%s26830_s14 + $0x50] sm:$0xff] %vm372_vm1, %v22015_v42  ;;  %v19938_v28 = vadd.f32 %v19937_v0, %v19864_v2  ;;  %v24067_v25 = vpop.f32.mrf.mxu1 }
 0x2e5   : > { %v24062_v12 = vpop.f32.mrf.mxu0 }
 0x2e6   : > { %v20012_v60 = vadd.f32 %v20011_v44, %v19938_v28  ;;  %v20157_v5 = vpop.f32.mrf.mxu1 }
 0x2e7   : > { %v20085_v21 = vpop.f32.mrf.mxu0 }
 0x2e8   : > { %v20086_v16 = vadd.f32 %v20085_v21, %v20012_v60  ;;  %v24077_v49 = vpop.f32.mrf.mxu1 }
 0x2e9   : > { %v24072_v63 = vpop.f32.mrf.mxu0 }
 0x2ea   : > { %v20158_v6 = vadd.f32 %v20157_v5, %v20086_v16  ;;  %v20312_v33 = vpop.f32.mrf.mxu1 }
 0x2eb   : > { %v20236_v34 = vpop.f32.mrf.mxu0 }
 0x2ec   : > { %v22000_v22 = vsub.f32 %v20158_v6, %v25719_v4  ;;  %v24087_v48 = vpop.f32.mrf.mxu1  ;;  %v20313_v62 = vadd.f32 %v20312_v33, %v20236_v34 }
 0x2ed   : > { %v24082_v8 = vpop.f32.mrf.mxu0 }
 0x2ee   : > { %v22016_v10 = vsub.f32 %v22000_v22, %v26635_v30  ;;  %v20460_v32 = vpop.f32.mrf.mxu1 }
 0x2ef   : > { %v20386_v43 = vpop.f32.mrf.mxu0 }
 0x2f0   : > { %22032 = vst.msk [vmem:[%s26830_s14 + $0x58] sm:$0xff] %vm372_vm1, %v22016_v10  ;;  %v20387_v50 = vadd.f32 %v20386_v43, %v20313_v62  ;;  %v24097_v24 = vpop.f32.mrf.mxu1 }
 0x2f1   : > { %v24092_v14 = vpop.f32.mrf.mxu0 }
 0x2f2   : > { %v20461_v40 = vadd.f32 %v20460_v32, %v20387_v50  ;;  %v20606_v58 = vpop.f32.mrf.mxu1 }
 0x2f3   : > { %v20534_v17 = vpop.f32.mrf.mxu0 }
 0x2f4   : > { %v20535_v27 = vadd.f32 %v20534_v17, %v20461_v40  ;;  %v24107_v46 = vpop.f32.mrf.mxu1 }
 0x2f5   : > { %v24102_v35 = vpop.f32.mrf.mxu0 }
 0x2f6   : > { %v20607_v4 = vadd.f32 %v20606_v58, %v20535_v27  ;;  %v20761_v55 = vpop.f32.mrf.mxu1 }
 0x2f7   : > { %v20685_v7 = vpop.f32.mrf.mxu0 }
 0x2f8   : > { %v22001_v30 = vsub.f32 %v20607_v4, %v25772_v41  ;;  %v24117_v57 = vpop.f32.mrf.mxu1  ;;  %v20762_v1 = vadd.f32 %v20761_v55, %v20685_v7 }
 0x2f9   : > { %v24112_v23 = vpop.f32.mrf.mxu0 }
 0x2fa   : > { %v22017_v20 = vsub.f32 %v22001_v30, %v26693_v38  ;;  %v20909_v61 = vpop.f32.mrf.mxu1 }
 0x2fb   : > { %v20835_v9 = vpop.f32.mrf.mxu0 }
 0x2fc   : > { %22033 = vst.msk [vmem:[%s26830_s14 + $0x60] sm:$0xff] %vm372_vm1, %v22017_v20  ;;  %v20836_v3 = vadd.f32 %v20835_v9, %v20762_v1  ;;  %v24127_v39 = vpop.f32.mrf.mxu1 }
 0x2fd   : > { %v24122_v52 = vpop.f32.mrf.mxu0 }
 0x2fe   : > { %v20910_v37 = vadd.f32 %v20909_v61, %v20836_v3  ;;  %v21055_v47 = vpop.f32.mrf.mxu1 }
 0x2ff   : > { %v20983_v56 = vpop.f32.mrf.mxu0 }
 0x300   : > { %v20984_v13 = vadd.f32 %v20983_v56, %v20910_v37  ;;  %v24137_v51 = vpop.f32.mrf.mxu1 }
 0x301   : > { %v24132_v26 = vpop.f32.mrf.mxu0 }
 0x302   : > { %v21056_v41 = vadd.f32 %v21055_v47, %v20984_v13  ;;  %v21210_v59 = vpop.f32.mrf.mxu1 }
 0x303   : > { %v21134_v29 = vpop.f32.mrf.mxu0 }
 0x304   : > { %v22002_v38 = vsub.f32 %v21056_v41, %v25827_v31  ;;  %v24147_v19 = vpop.f32.mrf.mxu1  ;;  %v21211_v42 = vadd.f32 %v21210_v59, %v21134_v29 }
 0x305   : > { %v24142_v15 = vpop.f32.mrf.mxu0 }
 0x306   : > { %v22018_v11 = vsub.f32 %v22002_v38, %v26749_v45  ;;  %v21358_v0 = vpop.f32.mrf.mxu1 }
 0x307   : > { %v21284_v2 = vpop.f32.mrf.mxu0 }
 0x308   : > { %22034 = vst.msk [vmem:[%s26830_s14 + $0x68] sm:$0xff] %vm372_vm1, %v22018_v11  ;;  %v21285_v44 = vadd.f32 %v21284_v2, %v21211_v42  ;;  %v24157_v12 = vpop.f32.mrf.mxu1 }
 0x309   : > { %v24152_v28 = vpop.f32.mrf.mxu0 }
 0x30a   : > { %v21359_v25 = vadd.f32 %v21358_v0, %v21285_v44  ;;  %v21504_v21 = vpop.f32.mrf.mxu1 }
 0x30b   : > { %v21432_v60 = vpop.f32.mrf.mxu0 }
 0x30c   : > { %v21433_v5 = vadd.f32 %v21432_v60, %v21359_v25  ;;  %v24167_v63 = vpop.f32.mrf.mxu1 }
 0x30d   : > { %v24162_v16 = vpop.f32.mrf.mxu0 }
 0x30e   : > { %v21505_v31 = vadd.f32 %v21504_v21, %v21433_v5  ;;  %v21659_v6 = vpop.f32.mrf.mxu1 }
 0x30f   : > { %v21583_v49 = vpop.f32.mrf.mxu0 }
 0x310   : > { %v22003_v45 = vsub.f32 %v21505_v31, %v25883_v18  ;;  %v24177_v33 = vpop.f32.mrf.mxu1  ;;  %v21660_v8 = vadd.f32 %v21659_v6, %v21583_v49 }
 0x311   : > { %v24172_v34 = vpop.f32.mrf.mxu0 }
 0x312   : > { %v22019_v22 = vsub.f32 %v22003_v45, %v26790_v53  ;;  %v21807_v10 = vpop.f32.mrf.mxu1 }
 0x313   : > { %v21733_v48 = vpop.f32.mrf.mxu0 }
 0x314   : > { %22035 = vst.msk [vmem:[%s26830_s14 + $0x70] sm:$0xff] %vm372_vm1, %v22019_v22  ;;  %v21734_v62 = vadd.f32 %v21733_v48, %v21660_v8  ;;  %v24187_v32 = vpop.f32.mrf.mxu1 }
 0x315   : > { %v24182_v43 = vpop.f32.mrf.mxu0 }
 0x316   : > { %v21808_v50 = vadd.f32 %v21807_v10, %v21734_v62  ;;  %v21953_v24 = vpop.f32.mrf.mxu1 }
 0x317   : > { %v21881_v14 = vpop.f32.mrf.mxu0 }
 0x318   : > { %v21882_v40 = vadd.f32 %v21881_v14, %v21808_v50  ;;  %v24197_v58 = vpop.f32.mrf.mxu1 }
 0x319   : > { %v24192_v17 = vpop.f32.mrf.mxu0 }
 0x31a   : > { %v21954_v18 = vadd.f32 %v21953_v24, %v21882_v40 }
 0x31c   : > { %v22004_v27 = vsub.f32 %v21954_v18, %v25938_v54 }
 0x31e   : > { %v22020_v53 = vsub.f32 %v22004_v27, %v26819_v36 }
 0x320   : > { %22036 = vst.msk [vmem:[%s26830_s14 + $0x78] sm:$0xff] %vm372_vm1, %v22020_v53 }
 0x321 PF: > { %s16_s18 = sadd.s32 1, %s24264_s18  }
 0x322   : > { %p13_p4 = scmp.ge.s32.totalorder %s16_s18, 4  }
 0x324   :  { %15 = sbr.rel (!%p13_p4) target bundleno = 1 (0x1), region = 87 }

</bundles_post_ra>
